<compile_context>
chip_gen: v5e
topology: v5e:2x2
jax: 0.10.0
libtpu: 0.0.40
codegen_flags: <defaults>
</compile_context>

<pallas_src>
import functools

import jax
import jax.numpy as jnp
from jax.experimental import pallas as pl
from jax.experimental.pallas import tpu as pltpu

_K_SINGLE_BLOCK_MAX = 2048  # single resident weight block up to this Kp


def _round_up(x, m):
    return (x + m - 1) // m * m


@functools.lru_cache(maxsize=1)
def _vmem_limit_bytes():
    """Per-generation VMEM limit: ~half of physical (64 MiB on v5e/v6e, 32 MiB on v7x)."""
    try:
        cap = int(pltpu.get_tpu_info().vmem_capacity_bytes)
        if cap > 0:
            return min(cap // 2, 64 * 1024 * 1024)
    except Exception:
        pass
    return 32 * 1024 * 1024


def _pad_k(k):
    kp = _round_up(k, 128)
    if kp > _K_SINGLE_BLOCK_MAX:
        kp = _round_up(k, 512)
    return kp


def _choose_tm(m, n_pad):
    cap = 1024 if n_pad <= 128 else 512
    if m >= 2 * cap:
        return cap
    if m >= 1024:
        return 512
    if m >= 512:
        return 256
    if m >= 32:
        return _round_up((m + 1) // 2, 16)   # >=2 grid steps, bf16 (16,128) tile
    return _round_up(max(m, 1), 16)


def _epilogue(y, act):
    if act == "leaky":
        return jnp.where(y > 0, y, 0.1 * y)   # nn.LeakyReLU(0.1) in the spec
    if act == "sigmoid":
        return jax.nn.sigmoid(y)
    return y


# ---------------------------------------------------------------------------
# Pallas kernels
# ---------------------------------------------------------------------------
def _matmul_bias_act_kernel(x_ref, w_ref, b_ref, o_ref, *, act):
    """Single-K path: o = act( x @ w + bias ); BN already folded into w / bias."""
    y = jnp.dot(x_ref[...], w_ref[...], preferred_element_type=jnp.float32)
    y = _epilogue(y + b_ref[...], act)
    o_ref[...] = y.astype(o_ref.dtype)


def _matmul_bias_act_ktiled_kernel(x_ref, w_ref, b_ref, o_ref, acc_ref, *, act):
    """Fallback path for very large K: accumulate over a K grid axis."""
    k = pl.program_id(1)

    @pl.when(k == 0)
    def _():
        acc_ref[...] = jnp.zeros_like(acc_ref)

    acc_ref[...] += jnp.dot(x_ref[...], w_ref[...],
                            preferred_element_type=jnp.float32)

    @pl.when(k == pl.num_programs(1) - 1)
    def _():
        y = _epilogue(acc_ref[...] + b_ref[...], act)
        o_ref[...] = y.astype(o_ref.dtype)


def _separable_kernel(x_ref, dww_ref, dwb_ref, pww_ref, pwb_ref, o_ref, *, H, W):
    """Fused depthwise 3x3 (s=1, pre-padded) -> pointwise 1x1 (+BN) -> LeakyReLU."""
    xv = x_ref[...]                              # (1, H+2, W+2, C) bf16
    wv = dww_ref[...]                            # (9, C) f32, tap-major
    C = xv.shape[-1]

    # Three W-shifted views, materialized once and reused across the 3 row taps.
    xj = [xv[:, :, j:j + W, :] for j in range(3)]   # (1, H+2, W, C) each

    acc = jnp.zeros((1, H, W, C), jnp.float32)
    for i in range(3):
        for j in range(3):
            acc = acc + xj[j][:, i:i + H, :, :].astype(jnp.float32) * wv[3 * i + j, :]
    # Depthwise output kept in f32 until the MXU input (bf16 cast at the dot).
    dw = (acc + dwb_ref[0, :]).reshape(H * W, C).astype(jnp.bfloat16)

    # One pointwise matmul over all H*W pixels (BN folded into pww/pwb),
    # single epilogue and single dense block store.
    y = jnp.dot(dw, pww_ref[...], preferred_element_type=jnp.float32)
    y = y + pwb_ref[...]
    y = jnp.where(y > 0, y, 0.1 * y)
    o_ref[...] = y.reshape(1, H, W, C).astype(o_ref.dtype)


# ---------------------------------------------------------------------------
# Kernel wrappers
# ---------------------------------------------------------------------------
def matmul_bias_act(x, w_p, b_p, n_valid, act, out_dtype=jnp.bfloat16):
    """x: (M, K), w_p: (Kp, Np) bf16 pre-padded, b_p: (1, Np) f32 (BN folded)."""
    M, K = x.shape
    Kp, Np = w_p.shape

    TM = _choose_tm(M, Np)
    Mp = _round_up(M, TM)

    xp = x.astype(jnp.bfloat16)
    if Mp != M or Kp != K:
        xp = jnp.pad(xp, ((0, Mp - M), (0, Kp - K)))

    if Kp <= _K_SINGLE_BLOCK_MAX:
        out = pl.pallas_call(
            functools.partial(_matmul_bias_act_kernel, act=act),
            out_shape=jax.ShapeDtypeStruct((Mp, Np), out_dtype),
            grid=(Mp // TM,),
            in_specs=[
                pl.BlockSpec((TM, Kp), lambda m: (m, 0)),
                pl.BlockSpec((Kp, Np), lambda m: (0, 0)),   # weight stays resident
                pl.BlockSpec((1, Np), lambda m: (0, 0)),
            ],
            out_specs=pl.BlockSpec((TM, Np), lambda m: (m, 0)),
            compiler_params=pltpu.CompilerParams(
                dimension_semantics=("parallel",),
                vmem_limit_bytes=_vmem_limit_bytes()),
        )(xp, w_p, b_p)
    else:
        TK = 512
        out = pl.pallas_call(
            functools.partial(_matmul_bias_act_ktiled_kernel, act=act),
            out_shape=jax.ShapeDtypeStruct((Mp, Np), out_dtype),
            grid=(Mp // TM, Kp // TK),
            in_specs=[
                pl.BlockSpec((TM, TK), lambda m, k: (m, k)),
                pl.BlockSpec((TK, Np), lambda m, k: (k, 0)),
                pl.BlockSpec((1, Np), lambda m, k: (0, 0)),
            ],
            out_specs=pl.BlockSpec((TM, Np), lambda m, k: (m, 0)),
            scratch_shapes=[pltpu.VMEM((TM, Np), jnp.float32)],
            compiler_params=pltpu.CompilerParams(
                dimension_semantics=("parallel", "arbitrary"),
                vmem_limit_bytes=_vmem_limit_bytes()),
        )(xp, w_p, b_p)

    if Mp != M or Np != n_valid:
        out = out[:M, :n_valid]
    return out


def separable_bn_act(x, params):
    """Fused depthwise(3x3,s1,p1) + pointwise(1x1) + folded BN + LeakyReLU."""
    N, H, W, C = x.shape
    xp = jnp.pad(x, ((0, 0), (1, 1), (1, 1), (0, 0)))
    out = pl.pallas_call(
        functools.partial(_separable_kernel, H=H, W=W),
        out_shape=jax.ShapeDtypeStruct((N, H, W, C), jnp.bfloat16),
        grid=(N,),
        in_specs=[
            pl.BlockSpec((1, H + 2, W + 2, C), lambda n: (n, 0, 0, 0)),
            pl.BlockSpec((9, C), lambda n: (0, 0)),
            pl.BlockSpec((1, C), lambda n: (0, 0)),
            pl.BlockSpec((C, C), lambda n: (0, 0)),
            pl.BlockSpec((1, C), lambda n: (0, 0)),
        ],
        out_specs=pl.BlockSpec((1, H, W, C), lambda n: (n, 0, 0, 0)),
        compiler_params=pltpu.CompilerParams(
            dimension_semantics=("parallel",),
            vmem_limit_bytes=_vmem_limit_bytes()),
    )(xp, params["dww"], params["dwb"], params["pww"], params["pwb"])
    return out


# ---------------------------------------------------------------------------
# Conv building blocks (thin XLA glue around the Pallas matmul)
# ---------------------------------------------------------------------------
def _im2col(x, kh, kw, stride, pad):
    """x: (N, H, W, C) -> ((N*OH*OW, kh*kw*C), (N, OH, OW))"""
    if pad:
        x = jnp.pad(x, ((0, 0), (pad, pad), (pad, pad), (0, 0)))
    N, Hp, Wp, C = x.shape
    OH = (Hp - kh) // stride + 1
    OW = (Wp - kw) // stride + 1
    cols = []
    for i in range(kh):
        for j in range(kw):
            cols.append(
                x[:, i:i + stride * (OH - 1) + 1:stride,
                     j:j + stride * (OW - 1) + 1:stride, :]
            )
    patches = jnp.stack(cols, axis=3)            # (N, OH, OW, kh*kw, C)
    return patches.reshape(N * OH * OW, kh * kw * C), (N, OH, OW)


def conv2d_bn_act(x, layer, ksize, stride, pad, cout, act,
                  out_dtype=jnp.bfloat16):
    cols, (N, OH, OW) = _im2col(x, ksize, ksize, stride, pad)
    y = matmul_bias_act(cols, layer["w"], layer["b"], cout, act, out_dtype)
    return y.reshape(N, OH, OW, cout)


def deconv2d_bn_act(x, layer, cout, act, out_dtype=jnp.bfloat16):
    """ConvTranspose2d(k=3,s=2,p=1,output_padding=1) + folded BN + act,
    via sub-pixel (phase) decomposition over the UN-dilated input:
      out[2r+py, 2c+px] = sum_{dy,dx} x[r+dy, c+dx] @ W_phase[(dy,dx),(py,px)]
    Phase-packed weights were built at init time; one matmul does all 4 phases."""
    N, H, W, C = x.shape
    xp = jnp.pad(x, ((0, 0), (0, 1), (0, 1), (0, 0)))          # bottom/right halo
    cols = jnp.stack(
        [xp[:, dy:dy + H, dx:dx + W, :] for dy in (0, 1) for dx in (0, 1)],
        axis=3)                                                # (N, H, W, 4, C)
    cols = cols.reshape(N * H * W, 4 * C)
    y = matmul_bias_act(cols, layer["w"], layer["b"], 4 * cout, act, out_dtype)
    y = y.reshape(N, H, W, 2, 2, cout)                         # (..., py, px, cout)
    y = jnp.transpose(y, (0, 1, 3, 2, 4, 5)).reshape(N, 2 * H, 2 * W, cout)
    return y


# ---------------------------------------------------------------------------
# Parameter init (deterministic; BN folded & weights packed/padded once)
# ---------------------------------------------------------------------------
def _fold_bn(cout):
    eps = 1e-5
    gamma = jnp.ones((cout,), jnp.float32)
    beta = jnp.zeros((cout,), jnp.float32)
    rmean = jnp.zeros((cout,), jnp.float32)
    rvar = jnp.ones((cout,), jnp.float32)
    scale = gamma / jnp.sqrt(rvar + eps)
    shift = beta - rmean * scale
    return scale, shift


def _pack_matmul_weights(wmat, bias, scale, shift):
    """Fold BN into (K, Cout) weight / bias, pad to (Kp, Np) bf16 / (1, Np) f32."""
    K, Cout = wmat.shape
    Kp, Np = _pad_k(K), _round_up(Cout, 128)
    wf = (wmat * scale[None, :]).astype(jnp.bfloat16)
    bf = bias * scale + shift
    wp = jnp.zeros((Kp, Np), jnp.bfloat16).at[:K, :Cout].set(wf)
    bp = jnp.zeros((1, Np), jnp.float32).at[:, :Cout].set(bf[None, :])
    return {"w": wp, "b": bp}


def init_params(key):
    keys = jax.random.split(key, 11)

    def conv_block(k, cin, cout, ks):
        w = jax.random.normal(k, (cout, cin, ks, ks), jnp.float32) / jnp.sqrt(float(cin * ks * ks))
        b = jnp.zeros((cout,), jnp.float32)
        scale, shift = _fold_bn(cout)
        wmat = jnp.transpose(w, (2, 3, 1, 0)).reshape(ks * ks * cin, cout)
        return _pack_matmul_weights(wmat, b, scale, shift)

    def deconv_block(k, cin, cout, with_bn=True):
        w = jax.random.normal(k, (cin, cout, 3, 3), jnp.float32) / jnp.sqrt(float(cin * 9))
        b = jnp.zeros((cout,), jnp.float32)
        if with_bn:
            scale, shift = _fold_bn(cout)
        else:
            scale = jnp.ones((cout,), jnp.float32)
            shift = jnp.zeros((cout,), jnp.float32)
        # Sub-pixel phase decomposition of ConvTranspose2d(k=3, s=2, p=1, op=1):
        #   out[2r+py, 2c+px] += x[r+dy, c+dx] @ w[:, :, TAP[(py,dy)], TAP[(px,dx)]]
        # where the transpose-conv weight tap used by (output parity, input offset):
        #   (py=0, dy=0) -> 1 ; (py=1, dy=0) -> 2 ; (py=1, dy=1) -> 0 ;
        #   (py=0, dy=1) -> no contribution (same table for x / columns).
        TAP = {(0, 0): 1, (1, 0): 2, (1, 1): 0}
        wmat = jnp.zeros((4 * cin, 4 * cout), jnp.float32)
        for dy in (0, 1):
            for dx in (0, 1):
                t = 2 * dy + dx
                for py in (0, 1):
                    for px in (0, 1):
                        if (py, dy) in TAP and (px, dx) in TAP:
                            p = 2 * py + px
                            blk = w[:, :, TAP[(py, dy)], TAP[(px, dx)]]   # (cin, cout)
                            wmat = wmat.at[t * cin:(t + 1) * cin,
                                           p * cout:(p + 1) * cout].set(blk)
        return _pack_matmul_weights(wmat, jnp.tile(b, 4),
                                    jnp.tile(scale, 4), jnp.tile(shift, 4))

    def sep_block(k, c):
        k1, k2 = jax.random.split(k)
        dw_w = jax.random.normal(k1, (c, 1, 3, 3), jnp.float32) / 3.0
        dw_b = jnp.zeros((c,), jnp.float32)
        pw_w = jax.random.normal(k2, (c, c, 1, 1), jnp.float32) / jnp.sqrt(float(c))
        pw_b = jnp.zeros((c,), jnp.float32)
        scale, shift = _fold_bn(c)
        pwmat = pw_w.reshape(c, c).T * scale[None, :]        # (Cin, Cout), BN-folded
        pwb = pw_b * scale + shift
        return {
            "dww": dw_w.reshape(c, 9).T,                     # (9, C) tap-major, f32
            "dwb": dw_b[None, :],                            # (1, C) f32
            "pww": pwmat.astype(jnp.bfloat16),               # (C, C) bf16
            "pwb": pwb[None, :],                             # (1, C) f32
        }

    p = {}
    p["layer1"] = conv_block(keys[0], 3, 16, 9)
    p["layer2"] = conv_block(keys[1], 16, 32, 3)
    p["layer3"] = conv_block(keys[2], 32, 64, 3)
    p["layer4"] = conv_block(keys[3], 64, 128, 3)
    p["connector1"] = sep_block(keys[4], 128)
    p["connector2"] = sep_block(keys[5], 64)
    p["connector3"] = sep_block(keys[6], 32)
    p["layer5"] = deconv_block(keys[7], 256, 64)
    p["layer6"] = deconv_block(keys[8], 128, 32)
    p["layer7"] = deconv_block(keys[9], 64, 16)
    p["layer8"] = deconv_block(keys[10], 16, 3, with_bn=False)
    return p


# ---------------------------------------------------------------------------
# Forward pass (mirrors StyleNetwork.forward)
# ---------------------------------------------------------------------------
def style_network_forward(x_nchw, params):
    x = jnp.transpose(x_nchw, (0, 2, 3, 1)).astype(jnp.bfloat16)   # -> NHWC bf16
    x1 = conv2d_bn_act(x, params["layer1"], 9, 2, 4, 16, "leaky")
    x2 = conv2d_bn_act(x1, params["layer2"], 3, 2, 1, 32, "leaky")
    x3 = conv2d_bn_act(x2, params["layer3"], 3, 2, 1, 64, "leaky")
    x4 = conv2d_bn_act(x3, params["layer4"], 3, 2, 1, 128, "leaky")
    xs4 = separable_bn_act(x4, params["connector1"])
    xs3 = separable_bn_act(x3, params["connector2"])
    xs2 = separable_bn_act(x2, params["connector3"])
    c1 = jnp.concatenate([x4, xs4], axis=-1)
    x5 = deconv2d_bn_act(c1, params["layer5"], 64, "leaky")
    c2 = jnp.concatenate([x5, xs3], axis=-1)
    x6 = deconv2d_bn_act(c2, params["layer6"], 32, "leaky")
    c3 = jnp.concatenate([x6, xs2], axis=-1)
    x7 = deconv2d_bn_act(c3, params["layer7"], 16, "leaky")
    out = deconv2d_bn_act(x7, params["layer8"], 3, "sigmoid",
                          out_dtype=jnp.float32)                   # layer8 + Sigmoid
    return jnp.transpose(out, (0, 3, 1, 2))                        # -> NCHW


# ---------------------------------------------------------------------------
if __name__ == "__main__":
    key = jax.random.PRNGKey(0)
    kx, kp = jax.random.split(key)
    x = jax.random.uniform(kx, (2, 3, 32, 32), jnp.float32)        # NCHW like PyTorch
    params = init_params(kp)

    out = jax.jit(style_network_forward)(x, params)
    out = jax.block_until_ready(out)

    assert out.shape == (2, 3, 32, 32), out.shape
    assert bool(jnp.all(jnp.isfinite(out)))
    assert bool(jnp.all((out >= 0.0) & (out <= 1.0)))              # sigmoid range
    print("KERNEL_OK")
</pallas_src>

<mosaic_0001>
module attributes {stable_mosaic.version = 11 : i64} {
  func.func @_matmul_bias_act_kernel(%arg0: i32, %arg1: memref<256x256xbf16, #tpu.memory_space<vmem>>, %arg2: memref<256x128xbf16, #tpu.memory_space<vmem>>, %arg3: memref<1x128xf32, #tpu.memory_space<vmem>>, %arg4: memref<256x128xbf16, #tpu.memory_space<vmem>>) attributes {dimension_semantics = [#tpu.dimension_semantics<parallel>], iteration_bounds = array<i64: 2>, scalar_prefetch = 0 : i64, scratch_operands = 0 : i64, tpu.core_type = #tpu.core_type<tc>, window_params = [{transform_indices = @transform_0, window_bounds = array<i64: 256, 256>}, {pipeline_mode = #tpu.pipeline_mode<synchronous>, transform_indices = @transform_1, window_bounds = array<i64: 256, 128>}, {pipeline_mode = #tpu.pipeline_mode<synchronous>, transform_indices = @transform_2, window_bounds = array<i64: 1, 128>}, {transform_indices = @transform_3, window_bounds = array<i64: 256, 128>}]} {
    %c0 = arith.constant 0 : index
    %c0_0 = arith.constant 0 : index
    %0 = vector.load %arg1[%c0, %c0_0] : memref<256x256xbf16, #tpu.memory_space<vmem>>, vector<256x256xbf16>
    %c0_1 = arith.constant 0 : index
    %c0_2 = arith.constant 0 : index
    %1 = vector.load %arg2[%c0_1, %c0_2] : memref<256x128xbf16, #tpu.memory_space<vmem>>, vector<256x128xbf16>
    %cst = arith.constant dense<0.000000e+00> : vector<256x128xf32>
    %2 = tpu.matmul %0, %1, %cst {dimension_numbers = #tpu.dot_dimension_numbers<[1], [0], [0], [1], [0, 0, 1, 1], [], []>} : vector<256x256xbf16>, vector<256x128xbf16>, vector<256x128xf32> -> vector<256x128xf32>
    %c0_3 = arith.constant 0 : index
    %c0_4 = arith.constant 0 : index
    %3 = vector.load %arg3[%c0_3, %c0_4] : memref<1x128xf32, #tpu.memory_space<vmem>>, vector<1x128xf32>
    %4 = vector.broadcast %3 : vector<1x128xf32> to vector<256x128xf32>
    %5 = arith.addf %2, %4 : vector<256x128xf32>
    %cst_5 = arith.constant 0.000000e+00 : f32
    %6 = vector.broadcast %cst_5 : f32 to vector<256x128xf32>
    %7 = arith.cmpf ogt, %5, %6 : vector<256x128xf32>
    %cst_6 = arith.constant 1.000000e-01 : f32
    %8 = vector.broadcast %cst_6 : f32 to vector<256x128xf32>
    %9 = arith.mulf %8, %5 : vector<256x128xf32>
    %10 = arith.select %7, %5, %9 : vector<256x128xi1>, vector<256x128xf32>
    %11 = arith.truncf %10 : vector<256x128xf32> to vector<256x128xbf16>
    %c0_7 = arith.constant 0 : index
    %c0_8 = arith.constant 0 : index
    %12 = vector.load %arg4[%c0_7, %c0_8] : memref<256x128xbf16, #tpu.memory_space<vmem>>, vector<256x128xbf16>
    tpu.vector_store %arg4[%c0_7, %c0_8], %11 {strides = array<i32>} : memref<256x128xbf16, #tpu.memory_space<vmem>>, vector<256x128xbf16>,
    return
  }
  func.func @transform_0(%arg0: i32) -> (i32, i32) {
    %c0_i32 = arith.constant 0 : i32
    %c0_i32_0 = arith.constant 0 : i32
    return %arg0, %c0_i32 : i32, i32
  }
  func.func @transform_1(%arg0: i32) -> (i32, i32) {
    %c0_i32 = arith.constant 0 : i32
    %c0_i32_0 = arith.constant 0 : i32
    %c0_i32_1 = arith.constant 0 : i32
    return %c0_i32, %c0_i32_0 : i32, i32
  }
  func.func @transform_2(%arg0: i32) -> (i32, i32) {
    %c0_i32 = arith.constant 0 : i32
    %c0_i32_0 = arith.constant 0 : i32
    %c0_i32_1 = arith.constant 0 : i32
    return %c0_i32, %c0_i32_0 : i32, i32
  }
  func.func @transform_3(%arg0: i32) -> (i32, i32) {
    %c0_i32 = arith.constant 0 : i32
    %c0_i32_0 = arith.constant 0 : i32
    return %arg0, %c0_i32 : i32, i32
  }
}

module attributes {stable_mosaic.version = 11 : i64} {
  func.func @_matmul_bias_act_kernel(%arg0: i32, %arg1: memref<64x256xbf16, #tpu.memory_space<vmem>>, %arg2: memref<256x128xbf16, #tpu.memory_space<vmem>>, %arg3: memref<1x128xf32, #tpu.memory_space<vmem>>, %arg4: memref<64x128xbf16, #tpu.memory_space<vmem>>) attributes {dimension_semantics = [#tpu.dimension_semantics<parallel>], iteration_bounds = array<i64: 2>, scalar_prefetch = 0 : i64, scratch_operands = 0 : i64, tpu.core_type = #tpu.core_type<tc>, window_params = [{transform_indices = @transform_0, window_bounds = array<i64: 64, 256>}, {pipeline_mode = #tpu.pipeline_mode<synchronous>, transform_indices = @transform_1, window_bounds = array<i64: 256, 128>}, {pipeline_mode = #tpu.pipeline_mode<synchronous>, transform_indices = @transform_2, window_bounds = array<i64: 1, 128>}, {transform_indices = @transform_3, window_bounds = array<i64: 64, 128>}]} {
    %c0 = arith.constant 0 : index
    %c0_0 = arith.constant 0 : index
    %0 = vector.load %arg1[%c0, %c0_0] : memref<64x256xbf16, #tpu.memory_space<vmem>>, vector<64x256xbf16>
    %c0_1 = arith.constant 0 : index
    %c0_2 = arith.constant 0 : index
    %1 = vector.load %arg2[%c0_1, %c0_2] : memref<256x128xbf16, #tpu.memory_space<vmem>>, vector<256x128xbf16>
    %cst = arith.constant dense<0.000000e+00> : vector<64x128xf32>
    %2 = tpu.matmul %0, %1, %cst {dimension_numbers = #tpu.dot_dimension_numbers<[1], [0], [0], [1], [0, 0, 1, 1], [], []>} : vector<64x256xbf16>, vector<256x128xbf16>, vector<64x128xf32> -> vector<64x128xf32>
    %c0_3 = arith.constant 0 : index
    %c0_4 = arith.constant 0 : index
    %3 = vector.load %arg3[%c0_3, %c0_4] : memref<1x128xf32, #tpu.memory_space<vmem>>, vector<1x128xf32>
    %4 = vector.broadcast %3 : vector<1x128xf32> to vector<64x128xf32>
    %5 = arith.addf %2, %4 : vector<64x128xf32>
    %cst_5 = arith.constant 0.000000e+00 : f32
    %6 = vector.broadcast %cst_5 : f32 to vector<64x128xf32>
    %7 = arith.cmpf ogt, %5, %6 : vector<64x128xf32>
    %cst_6 = arith.constant 1.000000e-01 : f32
    %8 = vector.broadcast %cst_6 : f32 to vector<64x128xf32>
    %9 = arith.mulf %8, %5 : vector<64x128xf32>
    %10 = arith.select %7, %5, %9 : vector<64x128xi1>, vector<64x128xf32>
    %11 = arith.truncf %10 : vector<64x128xf32> to vector<64x128xbf16>
    %c0_7 = arith.constant 0 : index
    %c0_8 = arith.constant 0 : index
    %12 = vector.load %arg4[%c0_7, %c0_8] : memref<64x128xbf16, #tpu.memory_space<vmem>>, vector<64x128xbf16>
    tpu.vector_store %arg4[%c0_7, %c0_8], %11 {strides = array<i32>} : memref<64x128xbf16, #tpu.memory_space<vmem>>, vector<64x128xbf16>,
    return
  }
  func.func @transform_0(%arg0: i32) -> (i32, i32) {
    %c0_i32 = arith.constant 0 : i32
    %c0_i32_0 = arith.constant 0 : i32
    return %arg0, %c0_i32 : i32, i32
  }
  func.func @transform_1(%arg0: i32) -> (i32, i32) {
    %c0_i32 = arith.constant 0 : i32
    %c0_i32_0 = arith.constant 0 : i32
    %c0_i32_1 = arith.constant 0 : i32
    return %c0_i32, %c0_i32_0 : i32, i32
  }
  func.func @transform_2(%arg0: i32) -> (i32, i32) {
    %c0_i32 = arith.constant 0 : i32
    %c0_i32_0 = arith.constant 0 : i32
    %c0_i32_1 = arith.constant 0 : i32
    return %c0_i32, %c0_i32_0 : i32, i32
  }
  func.func @transform_3(%arg0: i32) -> (i32, i32) {
    %c0_i32 = arith.constant 0 : i32
    %c0_i32_0 = arith.constant 0 : i32
    return %arg0, %c0_i32 : i32, i32
  }
}

module attributes {stable_mosaic.version = 11 : i64} {
  func.func @_matmul_bias_act_kernel(%arg0: i32, %arg1: memref<16x384xbf16, #tpu.memory_space<vmem>>, %arg2: memref<384x128xbf16, #tpu.memory_space<vmem>>, %arg3: memref<1x128xf32, #tpu.memory_space<vmem>>, %arg4: memref<16x128xbf16, #tpu.memory_space<vmem>>) attributes {dimension_semantics = [#tpu.dimension_semantics<parallel>], iteration_bounds = array<i64: 2>, scalar_prefetch = 0 : i64, scratch_operands = 0 : i64, tpu.core_type = #tpu.core_type<tc>, window_params = [{transform_indices = @transform_0, window_bounds = array<i64: 16, 384>}, {pipeline_mode = #tpu.pipeline_mode<synchronous>, transform_indices = @transform_1, window_bounds = array<i64: 384, 128>}, {pipeline_mode = #tpu.pipeline_mode<synchronous>, transform_indices = @transform_2, window_bounds = array<i64: 1, 128>}, {transform_indices = @transform_3, window_bounds = array<i64: 16, 128>}]} {
    %c0 = arith.constant 0 : index
    %c0_0 = arith.constant 0 : index
    %0 = vector.load %arg1[%c0, %c0_0] : memref<16x384xbf16, #tpu.memory_space<vmem>>, vector<16x384xbf16>
    %c0_1 = arith.constant 0 : index
    %c0_2 = arith.constant 0 : index
    %1 = vector.load %arg2[%c0_1, %c0_2] : memref<384x128xbf16, #tpu.memory_space<vmem>>, vector<384x128xbf16>
    %cst = arith.constant dense<0.000000e+00> : vector<16x128xf32>
    %2 = tpu.matmul %0, %1, %cst {dimension_numbers = #tpu.dot_dimension_numbers<[1], [0], [0], [1], [0, 0, 1, 1], [], []>} : vector<16x384xbf16>, vector<384x128xbf16>, vector<16x128xf32> -> vector<16x128xf32>
    %c0_3 = arith.constant 0 : index
    %c0_4 = arith.constant 0 : index
    %3 = vector.load %arg3[%c0_3, %c0_4] : memref<1x128xf32, #tpu.memory_space<vmem>>, vector<1x128xf32>
    %4 = vector.broadcast %3 : vector<1x128xf32> to vector<16x128xf32>
    %5 = arith.addf %2, %4 : vector<16x128xf32>
    %cst_5 = arith.constant 0.000000e+00 : f32
    %6 = vector.broadcast %cst_5 : f32 to vector<16x128xf32>
    %7 = arith.cmpf ogt, %5, %6 : vector<16x128xf32>
    %cst_6 = arith.constant 1.000000e-01 : f32
    %8 = vector.broadcast %cst_6 : f32 to vector<16x128xf32>
    %9 = arith.mulf %8, %5 : vector<16x128xf32>
    %10 = arith.select %7, %5, %9 : vector<16x128xi1>, vector<16x128xf32>
    %11 = arith.truncf %10 : vector<16x128xf32> to vector<16x128xbf16>
    %c0_7 = arith.constant 0 : index
    %c0_8 = arith.constant 0 : index
    %12 = vector.load %arg4[%c0_7, %c0_8] : memref<16x128xbf16, #tpu.memory_space<vmem>>, vector<16x128xbf16>
    tpu.vector_store %arg4[%c0_7, %c0_8], %11 {strides = array<i32>} : memref<16x128xbf16, #tpu.memory_space<vmem>>, vector<16x128xbf16>,
    return
  }
  func.func @transform_0(%arg0: i32) -> (i32, i32) {
    %c0_i32 = arith.constant 0 : i32
    %c0_i32_0 = arith.constant 0 : i32
    return %arg0, %c0_i32 : i32, i32
  }
  func.func @transform_1(%arg0: i32) -> (i32, i32) {
    %c0_i32 = arith.constant 0 : i32
    %c0_i32_0 = arith.constant 0 : i32
    %c0_i32_1 = arith.constant 0 : i32
    return %c0_i32, %c0_i32_0 : i32, i32
  }
  func.func @transform_2(%arg0: i32) -> (i32, i32) {
    %c0_i32 = arith.constant 0 : i32
    %c0_i32_0 = arith.constant 0 : i32
    %c0_i32_1 = arith.constant 0 : i32
    return %c0_i32, %c0_i32_0 : i32, i32
  }
  func.func @transform_3(%arg0: i32) -> (i32, i32) {
    %c0_i32 = arith.constant 0 : i32
    %c0_i32_0 = arith.constant 0 : i32
    return %arg0, %c0_i32 : i32, i32
  }
}

module attributes {stable_mosaic.version = 11 : i64} {
  func.func @_separable_kernel(%arg0: i32, %arg1: memref<1x4x4x128xbf16, #tpu.memory_space<vmem>>, %arg2: memref<9x128xf32, #tpu.memory_space<vmem>>, %arg3: memref<1x128xf32, #tpu.memory_space<vmem>>, %arg4: memref<128x128xbf16, #tpu.memory_space<vmem>>, %arg5: memref<1x128xf32, #tpu.memory_space<vmem>>, %arg6: memref<1x2x2x128xbf16, #tpu.memory_space<vmem>>) attributes {dimension_semantics = [#tpu.dimension_semantics<parallel>], iteration_bounds = array<i64: 2>, scalar_prefetch = 0 : i64, scratch_operands = 0 : i64, tpu.core_type = #tpu.core_type<tc>, window_params = [{transform_indices = @transform_0, window_bounds = array<i64: 1, 4, 4, 128>}, {pipeline_mode = #tpu.pipeline_mode<synchronous>, transform_indices = @transform_1, window_bounds = array<i64: 9, 128>}, {pipeline_mode = #tpu.pipeline_mode<synchronous>, transform_indices = @transform_2, window_bounds = array<i64: 1, 128>}, {pipeline_mode = #tpu.pipeline_mode<synchronous>, transform_indices = @transform_3, window_bounds = array<i64: 128, 128>}, {pipeline_mode = #tpu.pipeline_mode<synchronous>, transform_indices = @transform_4, window_bounds = array<i64: 1, 128>}, {transform_indices = @transform_5, window_bounds = array<i64: 1, 2, 2, 128>}]} {
    %c0 = arith.constant 0 : index
    %c0_0 = arith.constant 0 : index
    %c0_1 = arith.constant 0 : index
    %c0_2 = arith.constant 0 : index
    %0 = vector.load %arg1[%c0, %c0_0, %c0_1, %c0_2] : memref<1x4x4x128xbf16, #tpu.memory_space<vmem>>, vector<1x4x4x128xbf16>
    %c0_3 = arith.constant 0 : index
    %c0_4 = arith.constant 0 : index
    %1 = vector.load %arg2[%c0_3, %c0_4] : memref<9x128xf32, #tpu.memory_space<vmem>>, vector<9x128xf32>
    %2 = vector.extract_strided_slice %0 {offsets = [0, 0, 0, 0], sizes = [1, 4, 2, 128], strides = [1, 1, 1, 1]} : vector<1x4x4x128xbf16> to vector<1x4x2x128xbf16>
    %3 = vector.extract_strided_slice %0 {offsets = [0, 0, 1, 0], sizes = [1, 4, 2, 128], strides = [1, 1, 1, 1]} : vector<1x4x4x128xbf16> to vector<1x4x2x128xbf16>
    %4 = vector.extract_strided_slice %0 {offsets = [0, 0, 2, 0], sizes = [1, 4, 2, 128], strides = [1, 1, 1, 1]} : vector<1x4x4x128xbf16> to vector<1x4x2x128xbf16>
    %cst = arith.constant 0.000000e+00 : f32
    %5 = vector.broadcast %cst : f32 to vector<1x2x2x128xf32>
    %6 = vector.extract_strided_slice %2 {offsets = [0, 0, 0, 0], sizes = [1, 2, 2, 128], strides = [1, 1, 1, 1]} : vector<1x4x2x128xbf16> to vector<1x2x2x128xbf16>
    %7 = arith.extf %6 : vector<1x2x2x128xbf16> to vector<1x2x2x128xf32>
    %8 = vector.extract_strided_slice %1 {offsets = [0, 0], sizes = [1, 128], strides = [1, 1]} : vector<9x128xf32> to vector<1x128xf32>
    %9 = vector.shape_cast %8 : vector<1x128xf32> to vector<128xf32>
    %10 = vector.shape_cast %9 : vector<128xf32> to vector<1x1x1x128xf32>
    %11 = vector.broadcast %10 : vector<1x1x1x128xf32> to vector<1x2x2x128xf32>
    %12 = arith.mulf %7, %11 : vector<1x2x2x128xf32>
    %13 = arith.addf %5, %12 : vector<1x2x2x128xf32>
    %14 = vector.extract_strided_slice %3 {offsets = [0, 0, 0, 0], sizes = [1, 2, 2, 128], strides = [1, 1, 1, 1]} : vector<1x4x2x128xbf16> to vector<1x2x2x128xbf16>
    %15 = arith.extf %14 : vector<1x2x2x128xbf16> to vector<1x2x2x128xf32>
    %16 = vector.extract_strided_slice %1 {offsets = [1, 0], sizes = [1, 128], strides = [1, 1]} : vector<9x128xf32> to vector<1x128xf32>
    %17 = vector.shape_cast %16 : vector<1x128xf32> to vector<128xf32>
    %18 = vector.shape_cast %17 : vector<128xf32> to vector<1x1x1x128xf32>
    %19 = vector.broadcast %18 : vector<1x1x1x128xf32> to vector<1x2x2x128xf32>
    %20 = arith.mulf %15, %19 : vector<1x2x2x128xf32>
    %21 = arith.addf %13, %20 : vector<1x2x2x128xf32>
    %22 = vector.extract_strided_slice %4 {offsets = [0, 0, 0, 0], sizes = [1, 2, 2, 128], strides = [1, 1, 1, 1]} : vector<1x4x2x128xbf16> to vector<1x2x2x128xbf16>
    %23 = arith.extf %22 : vector<1x2x2x128xbf16> to vector<1x2x2x128xf32>
    %24 = vector.extract_strided_slice %1 {offsets = [2, 0], sizes = [1, 128], strides = [1, 1]} : vector<9x128xf32> to vector<1x128xf32>
    %25 = vector.shape_cast %24 : vector<1x128xf32> to vector<128xf32>
    %26 = vector.shape_cast %25 : vector<128xf32> to vector<1x1x1x128xf32>
    %27 = vector.broadcast %26 : vector<1x1x1x128xf32> to vector<1x2x2x128xf32>
    %28 = arith.mulf %23, %27 : vector<1x2x2x128xf32>
    %29 = arith.addf %21, %28 : vector<1x2x2x128xf32>
    %30 = vector.extract_strided_slice %2 {offsets = [0, 1, 0, 0], sizes = [1, 2, 2, 128], strides = [1, 1, 1, 1]} : vector<1x4x2x128xbf16> to vector<1x2x2x128xbf16>
    %31 = arith.extf %30 : vector<1x2x2x128xbf16> to vector<1x2x2x128xf32>
    %32 = vector.extract_strided_slice %1 {offsets = [3, 0], sizes = [1, 128], strides = [1, 1]} : vector<9x128xf32> to vector<1x128xf32>
    %33 = vector.shape_cast %32 : vector<1x128xf32> to vector<128xf32>
    %34 = vector.shape_cast %33 : vector<128xf32> to vector<1x1x1x128xf32>
    %35 = vector.broadcast %34 : vector<1x1x1x128xf32> to vector<1x2x2x128xf32>
    %36 = arith.mulf %31, %35 : vector<1x2x2x128xf32>
    %37 = arith.addf %29, %36 : vector<1x2x2x128xf32>
    %38 = vector.extract_strided_slice %3 {offsets = [0, 1, 0, 0], sizes = [1, 2, 2, 128], strides = [1, 1, 1, 1]} : vector<1x4x2x128xbf16> to vector<1x2x2x128xbf16>
    %39 = arith.extf %38 : vector<1x2x2x128xbf16> to vector<1x2x2x128xf32>
    %40 = vector.extract_strided_slice %1 {offsets = [4, 0], sizes = [1, 128], strides = [1, 1]} : vector<9x128xf32> to vector<1x128xf32>
    %41 = vector.shape_cast %40 : vector<1x128xf32> to vector<128xf32>
    %42 = vector.shape_cast %41 : vector<128xf32> to vector<1x1x1x128xf32>
    %43 = vector.broadcast %42 : vector<1x1x1x128xf32> to vector<1x2x2x128xf32>
    %44 = arith.mulf %39, %43 : vector<1x2x2x128xf32>
    %45 = arith.addf %37, %44 : vector<1x2x2x128xf32>
    %46 = vector.extract_strided_slice %4 {offsets = [0, 1, 0, 0], sizes = [1, 2, 2, 128], strides = [1, 1, 1, 1]} : vector<1x4x2x128xbf16> to vector<1x2x2x128xbf16>
    %47 = arith.extf %46 : vector<1x2x2x128xbf16> to vector<1x2x2x128xf32>
    %48 = vector.extract_strided_slice %1 {offsets = [5, 0], sizes = [1, 128], strides = [1, 1]} : vector<9x128xf32> to vector<1x128xf32>
    %49 = vector.shape_cast %48 : vector<1x128xf32> to vector<128xf32>
    %50 = vector.shape_cast %49 : vector<128xf32> to vector<1x1x1x128xf32>
    %51 = vector.broadcast %50 : vector<1x1x1x128xf32> to vector<1x2x2x128xf32>
    %52 = arith.mulf %47, %51 : vector<1x2x2x128xf32>
    %53 = arith.addf %45, %52 : vector<1x2x2x128xf32>
    %54 = vector.extract_strided_slice %2 {offsets = [0, 2, 0, 0], sizes = [1, 2, 2, 128], strides = [1, 1, 1, 1]} : vector<1x4x2x128xbf16> to vector<1x2x2x128xbf16>
    %55 = arith.extf %54 : vector<1x2x2x128xbf16> to vector<1x2x2x128xf32>
    %56 = vector.extract_strided_slice %1 {offsets = [6, 0], sizes = [1, 128], strides = [1, 1]} : vector<9x128xf32> to vector<1x128xf32>
    %57 = vector.shape_cast %56 : vector<1x128xf32> to vector<128xf32>
    %58 = vector.shape_cast %57 : vector<128xf32> to vector<1x1x1x128xf32>
    %59 = vector.broadcast %58 : vector<1x1x1x128xf32> to vector<1x2x2x128xf32>
    %60 = arith.mulf %55, %59 : vector<1x2x2x128xf32>
    %61 = arith.addf %53, %60 : vector<1x2x2x128xf32>
    %62 = vector.extract_strided_slice %3 {offsets = [0, 2, 0, 0], sizes = [1, 2, 2, 128], strides = [1, 1, 1, 1]} : vector<1x4x2x128xbf16> to vector<1x2x2x128xbf16>
    %63 = arith.extf %62 : vector<1x2x2x128xbf16> to vector<1x2x2x128xf32>
    %64 = vector.extract_strided_slice %1 {offsets = [7, 0], sizes = [1, 128], strides = [1, 1]} : vector<9x128xf32> to vector<1x128xf32>
    %65 = vector.shape_cast %64 : vector<1x128xf32> to vector<128xf32>
    %66 = vector.shape_cast %65 : vector<128xf32> to vector<1x1x1x128xf32>
    %67 = vector.broadcast %66 : vector<1x1x1x128xf32> to vector<1x2x2x128xf32>
    %68 = arith.mulf %63, %67 : vector<1x2x2x128xf32>
    %69 = arith.addf %61, %68 : vector<1x2x2x128xf32>
    %70 = vector.extract_strided_slice %4 {offsets = [0, 2, 0, 0], sizes = [1, 2, 2, 128], strides = [1, 1, 1, 1]} : vector<1x4x2x128xbf16> to vector<1x2x2x128xbf16>
    %71 = arith.extf %70 : vector<1x2x2x128xbf16> to vector<1x2x2x128xf32>
    %72 = vector.extract_strided_slice %1 {offsets = [8, 0], sizes = [1, 128], strides = [1, 1]} : vector<9x128xf32> to vector<1x128xf32>
    %73 = vector.shape_cast %72 : vector<1x128xf32> to vector<128xf32>
    %74 = vector.shape_cast %73 : vector<128xf32> to vector<1x1x1x128xf32>
    %75 = vector.broadcast %74 : vector<1x1x1x128xf32> to vector<1x2x2x128xf32>
    %76 = arith.mulf %71, %75 : vector<1x2x2x128xf32>
    %77 = arith.addf %69, %76 : vector<1x2x2x128xf32>
    %c0_5 = arith.constant 0 : index
    %c0_6 = arith.constant 0 : index
    %78 = vector.load %arg3[%c0_5, %c0_6] : memref<1x128xf32, #tpu.memory_space<vmem>>, vector<1x128xf32>
    %79 = vector.shape_cast %78 : vector<1x128xf32> to vector<128xf32>
    %80 = vector.shape_cast %79 : vector<128xf32> to vector<1x1x1x128xf32>
    %81 = vector.broadcast %80 : vector<1x1x1x128xf32> to vector<1x2x2x128xf32>
    %82 = arith.addf %77, %81 : vector<1x2x2x128xf32>
    %83 = vector.shape_cast %82 : vector<1x2x2x128xf32> to vector<4x128xf32>
    %84 = arith.truncf %83 : vector<4x128xf32> to vector<4x128xbf16>
    %c0_7 = arith.constant 0 : index
    %c0_8 = arith.constant 0 : index
    %85 = vector.load %arg4[%c0_7, %c0_8] : memref<128x128xbf16, #tpu.memory_space<vmem>>, vector<128x128xbf16>
    %cst_9 = arith.constant dense<0.000000e+00> : vector<4x128xf32>
    %86 = tpu.matmul %84, %85, %cst_9 {dimension_numbers = #tpu.dot_dimension_numbers<[1], [0], [0], [1], [0, 0, 1, 1], [], []>} : vector<4x128xbf16>, vector<128x128xbf16>, vector<4x128xf32> -> vector<4x128xf32>
    %c0_10 = arith.constant 0 : index
    %c0_11 = arith.constant 0 : index
    %87 = vector.load %arg5[%c0_10, %c0_11] : memref<1x128xf32, #tpu.memory_space<vmem>>, vector<1x128xf32>
    %88 = vector.broadcast %87 : vector<1x128xf32> to vector<4x128xf32>
    %89 = arith.addf %86, %88 : vector<4x128xf32>
    %cst_12 = arith.constant 0.000000e+00 : f32
    %90 = vector.broadcast %cst_12 : f32 to vector<4x128xf32>
    %91 = arith.cmpf ogt, %89, %90 : vector<4x128xf32>
    %cst_13 = arith.constant 1.000000e-01 : f32
    %92 = vector.broadcast %cst_13 : f32 to vector<4x128xf32>
    %93 = arith.mulf %92, %89 : vector<4x128xf32>
    %94 = arith.select %91, %89, %93 : vector<4x128xi1>, vector<4x128xf32>
    %95 = vector.shape_cast %94 : vector<4x128xf32> to vector<1x2x2x128xf32>
    %96 = arith.truncf %95 : vector<1x2x2x128xf32> to vector<1x2x2x128xbf16>
    %c0_14 = arith.constant 0 : index
    %c0_15 = arith.constant 0 : index
    %c0_16 = arith.constant 0 : index
    %c0_17 = arith.constant 0 : index
    %97 = vector.load %arg6[%c0_14, %c0_15, %c0_16, %c0_17] : memref<1x2x2x128xbf16, #tpu.memory_space<vmem>>, vector<1x2x2x128xbf16>
    tpu.vector_store %arg6[%c0_14, %c0_15, %c0_16, %c0_17], %96 {strides = array<i32>} : memref<1x2x2x128xbf16, #tpu.memory_space<vmem>>, vector<1x2x2x128xbf16>,
    return
  }
  func.func @transform_0(%arg0: i32) -> (i32, i32, i32, i32) {
    %c0_i32 = arith.constant 0 : i32
    %c0_i32_0 = arith.constant 0 : i32
    %c0_i32_1 = arith.constant 0 : i32
    %c0_i32_2 = arith.constant 0 : i32
    return %arg0, %c0_i32, %c0_i32_0, %c0_i32_1 : i32, i32, i32, i32
  }
  func.func @transform_1(%arg0: i32) -> (i32, i32) {
    %c0_i32 = arith.constant 0 : i32
    %c0_i32_0 = arith.constant 0 : i32
    %c0_i32_1 = arith.constant 0 : i32
    return %c0_i32, %c0_i32_0 : i32, i32
  }
  func.func @transform_2(%arg0: i32) -> (i32, i32) {
    %c0_i32 = arith.constant 0 : i32
    %c0_i32_0 = arith.constant 0 : i32
    %c0_i32_1 = arith.constant 0 : i32
    return %c0_i32, %c0_i32_0 : i32, i32
  }
  func.func @transform_3(%arg0: i32) -> (i32, i32) {
    %c0_i32 = arith.constant 0 : i32
    %c0_i32_0 = arith.constant 0 : i32
    %c0_i32_1 = arith.constant 0 : i32
    return %c0_i32, %c0_i32_0 : i32, i32
  }
  func.func @transform_4(%arg0: i32) -> (i32, i32) {
    %c0_i32 = arith.constant 0 : i32
    %c0_i32_0 = arith.constant 0 : i32
    %c0_i32_1 = arith.constant 0 : i32
    return %c0_i32, %c0_i32_0 : i32, i32
  }
  func.func @transform_5(%arg0: i32) -> (i32, i32, i32, i32) {
    %c0_i32 = arith.constant 0 : i32
    %c0_i32_0 = arith.constant 0 : i32
    %c0_i32_1 = arith.constant 0 : i32
    %c0_i32_2 = arith.constant 0 : i32
    return %arg0, %c0_i32, %c0_i32_0, %c0_i32_1 : i32, i32, i32, i32
  }
}

module attributes {stable_mosaic.version = 11 : i64} {
  func.func @_matmul_bias_act_kernel(%arg0: i32, %arg1: memref<16x640xbf16, #tpu.memory_space<vmem>>, %arg2: memref<640x128xbf16, #tpu.memory_space<vmem>>, %arg3: memref<1x128xf32, #tpu.memory_space<vmem>>, %arg4: memref<16x128xbf16, #tpu.memory_space<vmem>>) attributes {dimension_semantics = [#tpu.dimension_semantics<parallel>], iteration_bounds = array<i64: 1>, scalar_prefetch = 0 : i64, scratch_operands = 0 : i64, tpu.core_type = #tpu.core_type<tc>, window_params = [{transform_indices = @transform_0, window_bounds = array<i64: 16, 640>}, {pipeline_mode = #tpu.pipeline_mode<synchronous>, transform_indices = @transform_1, window_bounds = array<i64: 640, 128>}, {pipeline_mode = #tpu.pipeline_mode<synchronous>, transform_indices = @transform_2, window_bounds = array<i64: 1, 128>}, {transform_indices = @transform_3, window_bounds = array<i64: 16, 128>}]} {
    %c0 = arith.constant 0 : index
    %c0_0 = arith.constant 0 : index
    %0 = vector.load %arg1[%c0, %c0_0] : memref<16x640xbf16, #tpu.memory_space<vmem>>, vector<16x640xbf16>
    %c0_1 = arith.constant 0 : index
    %c0_2 = arith.constant 0 : index
    %1 = vector.load %arg2[%c0_1, %c0_2] : memref<640x128xbf16, #tpu.memory_space<vmem>>, vector<640x128xbf16>
    %cst = arith.constant dense<0.000000e+00> : vector<16x128xf32>
    %2 = tpu.matmul %0, %1, %cst {dimension_numbers = #tpu.dot_dimension_numbers<[1], [0], [0], [1], [0, 0, 1, 1], [], []>} : vector<16x640xbf16>, vector<640x128xbf16>, vector<16x128xf32> -> vector<16x128xf32>
    %c0_3 = arith.constant 0 : index
    %c0_4 = arith.constant 0 : index
    %3 = vector.load %arg3[%c0_3, %c0_4] : memref<1x128xf32, #tpu.memory_space<vmem>>, vector<1x128xf32>
    %4 = vector.broadcast %3 : vector<1x128xf32> to vector<16x128xf32>
    %5 = arith.addf %2, %4 : vector<16x128xf32>
    %cst_5 = arith.constant 0.000000e+00 : f32
    %6 = vector.broadcast %cst_5 : f32 to vector<16x128xf32>
    %7 = arith.cmpf ogt, %5, %6 : vector<16x128xf32>
    %cst_6 = arith.constant 1.000000e-01 : f32
    %8 = vector.broadcast %cst_6 : f32 to vector<16x128xf32>
    %9 = arith.mulf %8, %5 : vector<16x128xf32>
    %10 = arith.select %7, %5, %9 : vector<16x128xi1>, vector<16x128xf32>
    %11 = arith.truncf %10 : vector<16x128xf32> to vector<16x128xbf16>
    %c0_7 = arith.constant 0 : index
    %c0_8 = arith.constant 0 : index
    %12 = vector.load %arg4[%c0_7, %c0_8] : memref<16x128xbf16, #tpu.memory_space<vmem>>, vector<16x128xbf16>
    tpu.vector_store %arg4[%c0_7, %c0_8], %11 {strides = array<i32>} : memref<16x128xbf16, #tpu.memory_space<vmem>>, vector<16x128xbf16>,
    return
  }
  func.func @transform_0(%arg0: i32) -> (i32, i32) {
    %c0_i32 = arith.constant 0 : i32
    %c0_i32_0 = arith.constant 0 : i32
    return %arg0, %c0_i32 : i32, i32
  }
  func.func @transform_1(%arg0: i32) -> (i32, i32) {
    %c0_i32 = arith.constant 0 : i32
    %c0_i32_0 = arith.constant 0 : i32
    %c0_i32_1 = arith.constant 0 : i32
    return %c0_i32, %c0_i32_0 : i32, i32
  }
  func.func @transform_2(%arg0: i32) -> (i32, i32) {
    %c0_i32 = arith.constant 0 : i32
    %c0_i32_0 = arith.constant 0 : i32
    %c0_i32_1 = arith.constant 0 : i32
    return %c0_i32, %c0_i32_0 : i32, i32
  }
  func.func @transform_3(%arg0: i32) -> (i32, i32) {
    %c0_i32 = arith.constant 0 : i32
    %c0_i32_0 = arith.constant 0 : i32
    return %arg0, %c0_i32 : i32, i32
  }
}

module attributes {stable_mosaic.version = 11 : i64} {
  func.func @_matmul_bias_act_kernel(%arg0: i32, %arg1: memref<16x1024xbf16, #tpu.memory_space<vmem>>, %arg2: memref<1024x256xbf16, #tpu.memory_space<vmem>>, %arg3: memref<1x256xf32, #tpu.memory_space<vmem>>, %arg4: memref<16x256xbf16, #tpu.memory_space<vmem>>) attributes {dimension_semantics = [#tpu.dimension_semantics<parallel>], iteration_bounds = array<i64: 1>, scalar_prefetch = 0 : i64, scratch_operands = 0 : i64, tpu.core_type = #tpu.core_type<tc>, window_params = [{transform_indices = @transform_0, window_bounds = array<i64: 16, 1024>}, {pipeline_mode = #tpu.pipeline_mode<synchronous>, transform_indices = @transform_1, window_bounds = array<i64: 1024, 256>}, {pipeline_mode = #tpu.pipeline_mode<synchronous>, transform_indices = @transform_2, window_bounds = array<i64: 1, 256>}, {transform_indices = @transform_3, window_bounds = array<i64: 16, 256>}]} {
    %c0 = arith.constant 0 : index
    %c0_0 = arith.constant 0 : index
    %0 = vector.load %arg1[%c0, %c0_0] : memref<16x1024xbf16, #tpu.memory_space<vmem>>, vector<16x1024xbf16>
    %c0_1 = arith.constant 0 : index
    %c0_2 = arith.constant 0 : index
    %1 = vector.load %arg2[%c0_1, %c0_2] : memref<1024x256xbf16, #tpu.memory_space<vmem>>, vector<1024x256xbf16>
    %cst = arith.constant dense<0.000000e+00> : vector<16x256xf32>
    %2 = tpu.matmul %0, %1, %cst {dimension_numbers = #tpu.dot_dimension_numbers<[1], [0], [0], [1], [0, 0, 1, 1], [], []>} : vector<16x1024xbf16>, vector<1024x256xbf16>, vector<16x256xf32> -> vector<16x256xf32>
    %c0_3 = arith.constant 0 : index
    %c0_4 = arith.constant 0 : index
    %3 = vector.load %arg3[%c0_3, %c0_4] : memref<1x256xf32, #tpu.memory_space<vmem>>, vector<1x256xf32>
    %4 = vector.broadcast %3 : vector<1x256xf32> to vector<16x256xf32>
    %5 = arith.addf %2, %4 : vector<16x256xf32>
    %cst_5 = arith.constant 0.000000e+00 : f32
    %6 = vector.broadcast %cst_5 : f32 to vector<16x256xf32>
    %7 = arith.cmpf ogt, %5, %6 : vector<16x256xf32>
    %cst_6 = arith.constant 1.000000e-01 : f32
    %8 = vector.broadcast %cst_6 : f32 to vector<16x256xf32>
    %9 = arith.mulf %8, %5 : vector<16x256xf32>
    %10 = arith.select %7, %5, %9 : vector<16x256xi1>, vector<16x256xf32>
    %11 = arith.truncf %10 : vector<16x256xf32> to vector<16x256xbf16>
    %c0_7 = arith.constant 0 : index
    %c0_8 = arith.constant 0 : index
    %12 = vector.load %arg4[%c0_7, %c0_8] : memref<16x256xbf16, #tpu.memory_space<vmem>>, vector<16x256xbf16>
    tpu.vector_store %arg4[%c0_7, %c0_8], %11 {strides = array<i32>} : memref<16x256xbf16, #tpu.memory_space<vmem>>, vector<16x256xbf16>,
    return
  }
  func.func @transform_0(%arg0: i32) -> (i32, i32) {
    %c0_i32 = arith.constant 0 : i32
    %c0_i32_0 = arith.constant 0 : i32
    return %arg0, %c0_i32 : i32, i32
  }
  func.func @transform_1(%arg0: i32) -> (i32, i32) {
    %c0_i32 = arith.constant 0 : i32
    %c0_i32_0 = arith.constant 0 : i32
    %c0_i32_1 = arith.constant 0 : i32
    return %c0_i32, %c0_i32_0 : i32, i32
  }
  func.func @transform_2(%arg0: i32) -> (i32, i32) {
    %c0_i32 = arith.constant 0 : i32
    %c0_i32_0 = arith.constant 0 : i32
    %c0_i32_1 = arith.constant 0 : i32
    return %c0_i32, %c0_i32_0 : i32, i32
  }
  func.func @transform_3(%arg0: i32) -> (i32, i32) {
    %c0_i32 = arith.constant 0 : i32
    %c0_i32_0 = arith.constant 0 : i32
    return %arg0, %c0_i32 : i32, i32
  }
}

module attributes {stable_mosaic.version = 11 : i64} {
  func.func @_separable_kernel(%arg0: i32, %arg1: memref<1x6x6x64xbf16, #tpu.memory_space<vmem>>, %arg2: memref<9x64xf32, #tpu.memory_space<vmem>>, %arg3: memref<1x64xf32, #tpu.memory_space<vmem>>, %arg4: memref<64x64xbf16, #tpu.memory_space<vmem>>, %arg5: memref<1x64xf32, #tpu.memory_space<vmem>>, %arg6: memref<1x4x4x64xbf16, #tpu.memory_space<vmem>>) attributes {dimension_semantics = [#tpu.dimension_semantics<parallel>], iteration_bounds = array<i64: 2>, scalar_prefetch = 0 : i64, scratch_operands = 0 : i64, tpu.core_type = #tpu.core_type<tc>, window_params = [{transform_indices = @transform_0, window_bounds = array<i64: 1, 6, 6, 64>}, {pipeline_mode = #tpu.pipeline_mode<synchronous>, transform_indices = @transform_1, window_bounds = array<i64: 9, 64>}, {pipeline_mode = #tpu.pipeline_mode<synchronous>, transform_indices = @transform_2, window_bounds = array<i64: 1, 64>}, {pipeline_mode = #tpu.pipeline_mode<synchronous>, transform_indices = @transform_3, window_bounds = array<i64: 64, 64>}, {pipeline_mode = #tpu.pipeline_mode<synchronous>, transform_indices = @transform_4, window_bounds = array<i64: 1, 64>}, {transform_indices = @transform_5, window_bounds = array<i64: 1, 4, 4, 64>}]} {
    %c0 = arith.constant 0 : index
    %c0_0 = arith.constant 0 : index
    %c0_1 = arith.constant 0 : index
    %c0_2 = arith.constant 0 : index
    %0 = vector.load %arg1[%c0, %c0_0, %c0_1, %c0_2] : memref<1x6x6x64xbf16, #tpu.memory_space<vmem>>, vector<1x6x6x64xbf16>
    %c0_3 = arith.constant 0 : index
    %c0_4 = arith.constant 0 : index
    %1 = vector.load %arg2[%c0_3, %c0_4] : memref<9x64xf32, #tpu.memory_space<vmem>>, vector<9x64xf32>
    %2 = vector.extract_strided_slice %0 {offsets = [0, 0, 0, 0], sizes = [1, 6, 4, 64], strides = [1, 1, 1, 1]} : vector<1x6x6x64xbf16> to vector<1x6x4x64xbf16>
    %3 = vector.extract_strided_slice %0 {offsets = [0, 0, 1, 0], sizes = [1, 6, 4, 64], strides = [1, 1, 1, 1]} : vector<1x6x6x64xbf16> to vector<1x6x4x64xbf16>
    %4 = vector.extract_strided_slice %0 {offsets = [0, 0, 2, 0], sizes = [1, 6, 4, 64], strides = [1, 1, 1, 1]} : vector<1x6x6x64xbf16> to vector<1x6x4x64xbf16>
    %cst = arith.constant 0.000000e+00 : f32
    %5 = vector.broadcast %cst : f32 to vector<1x4x4x64xf32>
    %6 = vector.extract_strided_slice %2 {offsets = [0, 0, 0, 0], sizes = [1, 4, 4, 64], strides = [1, 1, 1, 1]} : vector<1x6x4x64xbf16> to vector<1x4x4x64xbf16>
    %7 = arith.extf %6 : vector<1x4x4x64xbf16> to vector<1x4x4x64xf32>
    %8 = vector.extract_strided_slice %1 {offsets = [0, 0], sizes = [1, 64], strides = [1, 1]} : vector<9x64xf32> to vector<1x64xf32>
    %9 = vector.shape_cast %8 : vector<1x64xf32> to vector<64xf32>
    %10 = vector.shape_cast %9 : vector<64xf32> to vector<1x1x1x64xf32>
    %11 = vector.broadcast %10 : vector<1x1x1x64xf32> to vector<1x4x4x64xf32>
    %12 = arith.mulf %7, %11 : vector<1x4x4x64xf32>
    %13 = arith.addf %5, %12 : vector<1x4x4x64xf32>
    %14 = vector.extract_strided_slice %3 {offsets = [0, 0, 0, 0], sizes = [1, 4, 4, 64], strides = [1, 1, 1, 1]} : vector<1x6x4x64xbf16> to vector<1x4x4x64xbf16>
    %15 = arith.extf %14 : vector<1x4x4x64xbf16> to vector<1x4x4x64xf32>
    %16 = vector.extract_strided_slice %1 {offsets = [1, 0], sizes = [1, 64], strides = [1, 1]} : vector<9x64xf32> to vector<1x64xf32>
    %17 = vector.shape_cast %16 : vector<1x64xf32> to vector<64xf32>
    %18 = vector.shape_cast %17 : vector<64xf32> to vector<1x1x1x64xf32>
    %19 = vector.broadcast %18 : vector<1x1x1x64xf32> to vector<1x4x4x64xf32>
    %20 = arith.mulf %15, %19 : vector<1x4x4x64xf32>
    %21 = arith.addf %13, %20 : vector<1x4x4x64xf32>
    %22 = vector.extract_strided_slice %4 {offsets = [0, 0, 0, 0], sizes = [1, 4, 4, 64], strides = [1, 1, 1, 1]} : vector<1x6x4x64xbf16> to vector<1x4x4x64xbf16>
    %23 = arith.extf %22 : vector<1x4x4x64xbf16> to vector<1x4x4x64xf32>
    %24 = vector.extract_strided_slice %1 {offsets = [2, 0], sizes = [1, 64], strides = [1, 1]} : vector<9x64xf32> to vector<1x64xf32>
    %25 = vector.shape_cast %24 : vector<1x64xf32> to vector<64xf32>
    %26 = vector.shape_cast %25 : vector<64xf32> to vector<1x1x1x64xf32>
    %27 = vector.broadcast %26 : vector<1x1x1x64xf32> to vector<1x4x4x64xf32>
    %28 = arith.mulf %23, %27 : vector<1x4x4x64xf32>
    %29 = arith.addf %21, %28 : vector<1x4x4x64xf32>
    %30 = vector.extract_strided_slice %2 {offsets = [0, 1, 0, 0], sizes = [1, 4, 4, 64], strides = [1, 1, 1, 1]} : vector<1x6x4x64xbf16> to vector<1x4x4x64xbf16>
    %31 = arith.extf %30 : vector<1x4x4x64xbf16> to vector<1x4x4x64xf32>
    %32 = vector.extract_strided_slice %1 {offsets = [3, 0], sizes = [1, 64], strides = [1, 1]} : vector<9x64xf32> to vector<1x64xf32>
    %33 = vector.shape_cast %32 : vector<1x64xf32> to vector<64xf32>
    %34 = vector.shape_cast %33 : vector<64xf32> to vector<1x1x1x64xf32>
    %35 = vector.broadcast %34 : vector<1x1x1x64xf32> to vector<1x4x4x64xf32>
    %36 = arith.mulf %31, %35 : vector<1x4x4x64xf32>
    %37 = arith.addf %29, %36 : vector<1x4x4x64xf32>
    %38 = vector.extract_strided_slice %3 {offsets = [0, 1, 0, 0], sizes = [1, 4, 4, 64], strides = [1, 1, 1, 1]} : vector<1x6x4x64xbf16> to vector<1x4x4x64xbf16>
    %39 = arith.extf %38 : vector<1x4x4x64xbf16> to vector<1x4x4x64xf32>
    %40 = vector.extract_strided_slice %1 {offsets = [4, 0], sizes = [1, 64], strides = [1, 1]} : vector<9x64xf32> to vector<1x64xf32>
    %41 = vector.shape_cast %40 : vector<1x64xf32> to vector<64xf32>
    %42 = vector.shape_cast %41 : vector<64xf32> to vector<1x1x1x64xf32>
    %43 = vector.broadcast %42 : vector<1x1x1x64xf32> to vector<1x4x4x64xf32>
    %44 = arith.mulf %39, %43 : vector<1x4x4x64xf32>
    %45 = arith.addf %37, %44 : vector<1x4x4x64xf32>
    %46 = vector.extract_strided_slice %4 {offsets = [0, 1, 0, 0], sizes = [1, 4, 4, 64], strides = [1, 1, 1, 1]} : vector<1x6x4x64xbf16> to vector<1x4x4x64xbf16>
    %47 = arith.extf %46 : vector<1x4x4x64xbf16> to vector<1x4x4x64xf32>
    %48 = vector.extract_strided_slice %1 {offsets = [5, 0], sizes = [1, 64], strides = [1, 1]} : vector<9x64xf32> to vector<1x64xf32>
    %49 = vector.shape_cast %48 : vector<1x64xf32> to vector<64xf32>
    %50 = vector.shape_cast %49 : vector<64xf32> to vector<1x1x1x64xf32>
    %51 = vector.broadcast %50 : vector<1x1x1x64xf32> to vector<1x4x4x64xf32>
    %52 = arith.mulf %47, %51 : vector<1x4x4x64xf32>
    %53 = arith.addf %45, %52 : vector<1x4x4x64xf32>
    %54 = vector.extract_strided_slice %2 {offsets = [0, 2, 0, 0], sizes = [1, 4, 4, 64], strides = [1, 1, 1, 1]} : vector<1x6x4x64xbf16> to vector<1x4x4x64xbf16>
    %55 = arith.extf %54 : vector<1x4x4x64xbf16> to vector<1x4x4x64xf32>
    %56 = vector.extract_strided_slice %1 {offsets = [6, 0], sizes = [1, 64], strides = [1, 1]} : vector<9x64xf32> to vector<1x64xf32>
    %57 = vector.shape_cast %56 : vector<1x64xf32> to vector<64xf32>
    %58 = vector.shape_cast %57 : vector<64xf32> to vector<1x1x1x64xf32>
    %59 = vector.broadcast %58 : vector<1x1x1x64xf32> to vector<1x4x4x64xf32>
    %60 = arith.mulf %55, %59 : vector<1x4x4x64xf32>
    %61 = arith.addf %53, %60 : vector<1x4x4x64xf32>
    %62 = vector.extract_strided_slice %3 {offsets = [0, 2, 0, 0], sizes = [1, 4, 4, 64], strides = [1, 1, 1, 1]} : vector<1x6x4x64xbf16> to vector<1x4x4x64xbf16>
    %63 = arith.extf %62 : vector<1x4x4x64xbf16> to vector<1x4x4x64xf32>
    %64 = vector.extract_strided_slice %1 {offsets = [7, 0], sizes = [1, 64], strides = [1, 1]} : vector<9x64xf32> to vector<1x64xf32>
    %65 = vector.shape_cast %64 : vector<1x64xf32> to vector<64xf32>
    %66 = vector.shape_cast %65 : vector<64xf32> to vector<1x1x1x64xf32>
    %67 = vector.broadcast %66 : vector<1x1x1x64xf32> to vector<1x4x4x64xf32>
    %68 = arith.mulf %63, %67 : vector<1x4x4x64xf32>
    %69 = arith.addf %61, %68 : vector<1x4x4x64xf32>
    %70 = vector.extract_strided_slice %4 {offsets = [0, 2, 0, 0], sizes = [1, 4, 4, 64], strides = [1, 1, 1, 1]} : vector<1x6x4x64xbf16> to vector<1x4x4x64xbf16>
    %71 = arith.extf %70 : vector<1x4x4x64xbf16> to vector<1x4x4x64xf32>
    %72 = vector.extract_strided_slice %1 {offsets = [8, 0], sizes = [1, 64], strides = [1, 1]} : vector<9x64xf32> to vector<1x64xf32>
    %73 = vector.shape_cast %72 : vector<1x64xf32> to vector<64xf32>
    %74 = vector.shape_cast %73 : vector<64xf32> to vector<1x1x1x64xf32>
    %75 = vector.broadcast %74 : vector<1x1x1x64xf32> to vector<1x4x4x64xf32>
    %76 = arith.mulf %71, %75 : vector<1x4x4x64xf32>
    %77 = arith.addf %69, %76 : vector<1x4x4x64xf32>
    %c0_5 = arith.constant 0 : index
    %c0_6 = arith.constant 0 : index
    %78 = vector.load %arg3[%c0_5, %c0_6] : memref<1x64xf32, #tpu.memory_space<vmem>>, vector<1x64xf32>
    %79 = vector.shape_cast %78 : vector<1x64xf32> to vector<64xf32>
    %80 = vector.shape_cast %79 : vector<64xf32> to vector<1x1x1x64xf32>
    %81 = vector.broadcast %80 : vector<1x1x1x64xf32> to vector<1x4x4x64xf32>
    %82 = arith.addf %77, %81 : vector<1x4x4x64xf32>
    %83 = vector.shape_cast %82 : vector<1x4x4x64xf32> to vector<16x64xf32>
    %84 = arith.truncf %83 : vector<16x64xf32> to vector<16x64xbf16>
    %c0_7 = arith.constant 0 : index
    %c0_8 = arith.constant 0 : index
    %85 = vector.load %arg4[%c0_7, %c0_8] : memref<64x64xbf16, #tpu.memory_space<vmem>>, vector<64x64xbf16>
    %cst_9 = arith.constant dense<0.000000e+00> : vector<16x64xf32>
    %86 = tpu.matmul %84, %85, %cst_9 {dimension_numbers = #tpu.dot_dimension_numbers<[1], [0], [0], [1], [0, 0, 1, 1], [], []>} : vector<16x64xbf16>, vector<64x64xbf16>, vector<16x64xf32> -> vector<16x64xf32>
    %c0_10 = arith.constant 0 : index
    %c0_11 = arith.constant 0 : index
    %87 = vector.load %arg5[%c0_10, %c0_11] : memref<1x64xf32, #tpu.memory_space<vmem>>, vector<1x64xf32>
    %88 = vector.broadcast %87 : vector<1x64xf32> to vector<16x64xf32>
    %89 = arith.addf %86, %88 : vector<16x64xf32>
    %cst_12 = arith.constant 0.000000e+00 : f32
    %90 = vector.broadcast %cst_12 : f32 to vector<16x64xf32>
    %91 = arith.cmpf ogt, %89, %90 : vector<16x64xf32>
    %cst_13 = arith.constant 1.000000e-01 : f32
    %92 = vector.broadcast %cst_13 : f32 to vector<16x64xf32>
    %93 = arith.mulf %92, %89 : vector<16x64xf32>
    %94 = arith.select %91, %89, %93 : vector<16x64xi1>, vector<16x64xf32>
    %95 = vector.shape_cast %94 : vector<16x64xf32> to vector<1x4x4x64xf32>
    %96 = arith.truncf %95 : vector<1x4x4x64xf32> to vector<1x4x4x64xbf16>
    %c0_14 = arith.constant 0 : index
    %c0_15 = arith.constant 0 : index
    %c0_16 = arith.constant 0 : index
    %c0_17 = arith.constant 0 : index
    %97 = vector.load %arg6[%c0_14, %c0_15, %c0_16, %c0_17] : memref<1x4x4x64xbf16, #tpu.memory_space<vmem>>, vector<1x4x4x64xbf16>
    tpu.vector_store %arg6[%c0_14, %c0_15, %c0_16, %c0_17], %96 {strides = array<i32>} : memref<1x4x4x64xbf16, #tpu.memory_space<vmem>>, vector<1x4x4x64xbf16>,
    return
  }
  func.func @transform_0(%arg0: i32) -> (i32, i32, i32, i32) {
    %c0_i32 = arith.constant 0 : i32
    %c0_i32_0 = arith.constant 0 : i32
    %c0_i32_1 = arith.constant 0 : i32
    %c0_i32_2 = arith.constant 0 : i32
    return %arg0, %c0_i32, %c0_i32_0, %c0_i32_1 : i32, i32, i32, i32
  }
  func.func @transform_1(%arg0: i32) -> (i32, i32) {
    %c0_i32 = arith.constant 0 : i32
    %c0_i32_0 = arith.constant 0 : i32
    %c0_i32_1 = arith.constant 0 : i32
    return %c0_i32, %c0_i32_0 : i32, i32
  }
  func.func @transform_2(%arg0: i32) -> (i32, i32) {
    %c0_i32 = arith.constant 0 : i32
    %c0_i32_0 = arith.constant 0 : i32
    %c0_i32_1 = arith.constant 0 : i32
    return %c0_i32, %c0_i32_0 : i32, i32
  }
  func.func @transform_3(%arg0: i32) -> (i32, i32) {
    %c0_i32 = arith.constant 0 : i32
    %c0_i32_0 = arith.constant 0 : i32
    %c0_i32_1 = arith.constant 0 : i32
    return %c0_i32, %c0_i32_0 : i32, i32
  }
  func.func @transform_4(%arg0: i32) -> (i32, i32) {
    %c0_i32 = arith.constant 0 : i32
    %c0_i32_0 = arith.constant 0 : i32
    %c0_i32_1 = arith.constant 0 : i32
    return %c0_i32, %c0_i32_0 : i32, i32
  }
  func.func @transform_5(%arg0: i32) -> (i32, i32, i32, i32) {
    %c0_i32 = arith.constant 0 : i32
    %c0_i32_0 = arith.constant 0 : i32
    %c0_i32_1 = arith.constant 0 : i32
    %c0_i32_2 = arith.constant 0 : i32
    return %arg0, %c0_i32, %c0_i32_0, %c0_i32_1 : i32, i32, i32, i32
  }
}

module attributes {stable_mosaic.version = 11 : i64} {
  func.func @_matmul_bias_act_kernel(%arg0: i32, %arg1: memref<16x512xbf16, #tpu.memory_space<vmem>>, %arg2: memref<512x128xbf16, #tpu.memory_space<vmem>>, %arg3: memref<1x128xf32, #tpu.memory_space<vmem>>, %arg4: memref<16x128xbf16, #tpu.memory_space<vmem>>) attributes {dimension_semantics = [#tpu.dimension_semantics<parallel>], iteration_bounds = array<i64: 2>, scalar_prefetch = 0 : i64, scratch_operands = 0 : i64, tpu.core_type = #tpu.core_type<tc>, window_params = [{transform_indices = @transform_0, window_bounds = array<i64: 16, 512>}, {pipeline_mode = #tpu.pipeline_mode<synchronous>, transform_indices = @transform_1, window_bounds = array<i64: 512, 128>}, {pipeline_mode = #tpu.pipeline_mode<synchronous>, transform_indices = @transform_2, window_bounds = array<i64: 1, 128>}, {transform_indices = @transform_3, window_bounds = array<i64: 16, 128>}]} {
    %c0 = arith.constant 0 : index
    %c0_0 = arith.constant 0 : index
    %0 = vector.load %arg1[%c0, %c0_0] : memref<16x512xbf16, #tpu.memory_space<vmem>>, vector<16x512xbf16>
    %c0_1 = arith.constant 0 : index
    %c0_2 = arith.constant 0 : index
    %1 = vector.load %arg2[%c0_1, %c0_2] : memref<512x128xbf16, #tpu.memory_space<vmem>>, vector<512x128xbf16>
    %cst = arith.constant dense<0.000000e+00> : vector<16x128xf32>
    %2 = tpu.matmul %0, %1, %cst {dimension_numbers = #tpu.dot_dimension_numbers<[1], [0], [0], [1], [0, 0, 1, 1], [], []>} : vector<16x512xbf16>, vector<512x128xbf16>, vector<16x128xf32> -> vector<16x128xf32>
    %c0_3 = arith.constant 0 : index
    %c0_4 = arith.constant 0 : index
    %3 = vector.load %arg3[%c0_3, %c0_4] : memref<1x128xf32, #tpu.memory_space<vmem>>, vector<1x128xf32>
    %4 = vector.broadcast %3 : vector<1x128xf32> to vector<16x128xf32>
    %5 = arith.addf %2, %4 : vector<16x128xf32>
    %cst_5 = arith.constant 0.000000e+00 : f32
    %6 = vector.broadcast %cst_5 : f32 to vector<16x128xf32>
    %7 = arith.cmpf ogt, %5, %6 : vector<16x128xf32>
    %cst_6 = arith.constant 1.000000e-01 : f32
    %8 = vector.broadcast %cst_6 : f32 to vector<16x128xf32>
    %9 = arith.mulf %8, %5 : vector<16x128xf32>
    %10 = arith.select %7, %5, %9 : vector<16x128xi1>, vector<16x128xf32>
    %11 = arith.truncf %10 : vector<16x128xf32> to vector<16x128xbf16>
    %c0_7 = arith.constant 0 : index
    %c0_8 = arith.constant 0 : index
    %12 = vector.load %arg4[%c0_7, %c0_8] : memref<16x128xbf16, #tpu.memory_space<vmem>>, vector<16x128xbf16>
    tpu.vector_store %arg4[%c0_7, %c0_8], %11 {strides = array<i32>} : memref<16x128xbf16, #tpu.memory_space<vmem>>, vector<16x128xbf16>,
    return
  }
  func.func @transform_0(%arg0: i32) -> (i32, i32) {
    %c0_i32 = arith.constant 0 : i32
    %c0_i32_0 = arith.constant 0 : i32
    return %arg0, %c0_i32 : i32, i32
  }
  func.func @transform_1(%arg0: i32) -> (i32, i32) {
    %c0_i32 = arith.constant 0 : i32
    %c0_i32_0 = arith.constant 0 : i32
    %c0_i32_1 = arith.constant 0 : i32
    return %c0_i32, %c0_i32_0 : i32, i32
  }
  func.func @transform_2(%arg0: i32) -> (i32, i32) {
    %c0_i32 = arith.constant 0 : i32
    %c0_i32_0 = arith.constant 0 : i32
    %c0_i32_1 = arith.constant 0 : i32
    return %c0_i32, %c0_i32_0 : i32, i32
  }
  func.func @transform_3(%arg0: i32) -> (i32, i32) {
    %c0_i32 = arith.constant 0 : i32
    %c0_i32_0 = arith.constant 0 : i32
    return %arg0, %c0_i32 : i32, i32
  }
}

module attributes {stable_mosaic.version = 11 : i64} {
  func.func @_separable_kernel(%arg0: i32, %arg1: memref<1x10x10x32xbf16, #tpu.memory_space<vmem>>, %arg2: memref<9x32xf32, #tpu.memory_space<vmem>>, %arg3: memref<1x32xf32, #tpu.memory_space<vmem>>, %arg4: memref<32x32xbf16, #tpu.memory_space<vmem>>, %arg5: memref<1x32xf32, #tpu.memory_space<vmem>>, %arg6: memref<1x8x8x32xbf16, #tpu.memory_space<vmem>>) attributes {dimension_semantics = [#tpu.dimension_semantics<parallel>], iteration_bounds = array<i64: 2>, scalar_prefetch = 0 : i64, scratch_operands = 0 : i64, tpu.core_type = #tpu.core_type<tc>, window_params = [{transform_indices = @transform_0, window_bounds = array<i64: 1, 10, 10, 32>}, {pipeline_mode = #tpu.pipeline_mode<synchronous>, transform_indices = @transform_1, window_bounds = array<i64: 9, 32>}, {pipeline_mode = #tpu.pipeline_mode<synchronous>, transform_indices = @transform_2, window_bounds = array<i64: 1, 32>}, {pipeline_mode = #tpu.pipeline_mode<synchronous>, transform_indices = @transform_3, window_bounds = array<i64: 32, 32>}, {pipeline_mode = #tpu.pipeline_mode<synchronous>, transform_indices = @transform_4, window_bounds = array<i64: 1, 32>}, {transform_indices = @transform_5, window_bounds = array<i64: 1, 8, 8, 32>}]} {
    %c0 = arith.constant 0 : index
    %c0_0 = arith.constant 0 : index
    %c0_1 = arith.constant 0 : index
    %c0_2 = arith.constant 0 : index
    %0 = vector.load %arg1[%c0, %c0_0, %c0_1, %c0_2] : memref<1x10x10x32xbf16, #tpu.memory_space<vmem>>, vector<1x10x10x32xbf16>
    %c0_3 = arith.constant 0 : index
    %c0_4 = arith.constant 0 : index
    %1 = vector.load %arg2[%c0_3, %c0_4] : memref<9x32xf32, #tpu.memory_space<vmem>>, vector<9x32xf32>
    %2 = vector.extract_strided_slice %0 {offsets = [0, 0, 0, 0], sizes = [1, 10, 8, 32], strides = [1, 1, 1, 1]} : vector<1x10x10x32xbf16> to vector<1x10x8x32xbf16>
    %3 = vector.extract_strided_slice %0 {offsets = [0, 0, 1, 0], sizes = [1, 10, 8, 32], strides = [1, 1, 1, 1]} : vector<1x10x10x32xbf16> to vector<1x10x8x32xbf16>
    %4 = vector.extract_strided_slice %0 {offsets = [0, 0, 2, 0], sizes = [1, 10, 8, 32], strides = [1, 1, 1, 1]} : vector<1x10x10x32xbf16> to vector<1x10x8x32xbf16>
    %cst = arith.constant 0.000000e+00 : f32
    %5 = vector.broadcast %cst : f32 to vector<1x8x8x32xf32>
    %6 = vector.extract_strided_slice %2 {offsets = [0, 0, 0, 0], sizes = [1, 8, 8, 32], strides = [1, 1, 1, 1]} : vector<1x10x8x32xbf16> to vector<1x8x8x32xbf16>
    %7 = arith.extf %6 : vector<1x8x8x32xbf16> to vector<1x8x8x32xf32>
    %8 = vector.extract_strided_slice %1 {offsets = [0, 0], sizes = [1, 32], strides = [1, 1]} : vector<9x32xf32> to vector<1x32xf32>
    %9 = vector.shape_cast %8 : vector<1x32xf32> to vector<32xf32>
    %10 = vector.shape_cast %9 : vector<32xf32> to vector<1x1x1x32xf32>
    %11 = vector.broadcast %10 : vector<1x1x1x32xf32> to vector<1x8x8x32xf32>
    %12 = arith.mulf %7, %11 : vector<1x8x8x32xf32>
    %13 = arith.addf %5, %12 : vector<1x8x8x32xf32>
    %14 = vector.extract_strided_slice %3 {offsets = [0, 0, 0, 0], sizes = [1, 8, 8, 32], strides = [1, 1, 1, 1]} : vector<1x10x8x32xbf16> to vector<1x8x8x32xbf16>
    %15 = arith.extf %14 : vector<1x8x8x32xbf16> to vector<1x8x8x32xf32>
    %16 = vector.extract_strided_slice %1 {offsets = [1, 0], sizes = [1, 32], strides = [1, 1]} : vector<9x32xf32> to vector<1x32xf32>
    %17 = vector.shape_cast %16 : vector<1x32xf32> to vector<32xf32>
    %18 = vector.shape_cast %17 : vector<32xf32> to vector<1x1x1x32xf32>
    %19 = vector.broadcast %18 : vector<1x1x1x32xf32> to vector<1x8x8x32xf32>
    %20 = arith.mulf %15, %19 : vector<1x8x8x32xf32>
    %21 = arith.addf %13, %20 : vector<1x8x8x32xf32>
    %22 = vector.extract_strided_slice %4 {offsets = [0, 0, 0, 0], sizes = [1, 8, 8, 32], strides = [1, 1, 1, 1]} : vector<1x10x8x32xbf16> to vector<1x8x8x32xbf16>
    %23 = arith.extf %22 : vector<1x8x8x32xbf16> to vector<1x8x8x32xf32>
    %24 = vector.extract_strided_slice %1 {offsets = [2, 0], sizes = [1, 32], strides = [1, 1]} : vector<9x32xf32> to vector<1x32xf32>
    %25 = vector.shape_cast %24 : vector<1x32xf32> to vector<32xf32>
    %26 = vector.shape_cast %25 : vector<32xf32> to vector<1x1x1x32xf32>
    %27 = vector.broadcast %26 : vector<1x1x1x32xf32> to vector<1x8x8x32xf32>
    %28 = arith.mulf %23, %27 : vector<1x8x8x32xf32>
    %29 = arith.addf %21, %28 : vector<1x8x8x32xf32>
    %30 = vector.extract_strided_slice %2 {offsets = [0, 1, 0, 0], sizes = [1, 8, 8, 32], strides = [1, 1, 1, 1]} : vector<1x10x8x32xbf16> to vector<1x8x8x32xbf16>
    %31 = arith.extf %30 : vector<1x8x8x32xbf16> to vector<1x8x8x32xf32>
    %32 = vector.extract_strided_slice %1 {offsets = [3, 0], sizes = [1, 32], strides = [1, 1]} : vector<9x32xf32> to vector<1x32xf32>
    %33 = vector.shape_cast %32 : vector<1x32xf32> to vector<32xf32>
    %34 = vector.shape_cast %33 : vector<32xf32> to vector<1x1x1x32xf32>
    %35 = vector.broadcast %34 : vector<1x1x1x32xf32> to vector<1x8x8x32xf32>
    %36 = arith.mulf %31, %35 : vector<1x8x8x32xf32>
    %37 = arith.addf %29, %36 : vector<1x8x8x32xf32>
    %38 = vector.extract_strided_slice %3 {offsets = [0, 1, 0, 0], sizes = [1, 8, 8, 32], strides = [1, 1, 1, 1]} : vector<1x10x8x32xbf16> to vector<1x8x8x32xbf16>
    %39 = arith.extf %38 : vector<1x8x8x32xbf16> to vector<1x8x8x32xf32>
    %40 = vector.extract_strided_slice %1 {offsets = [4, 0], sizes = [1, 32], strides = [1, 1]} : vector<9x32xf32> to vector<1x32xf32>
    %41 = vector.shape_cast %40 : vector<1x32xf32> to vector<32xf32>
    %42 = vector.shape_cast %41 : vector<32xf32> to vector<1x1x1x32xf32>
    %43 = vector.broadcast %42 : vector<1x1x1x32xf32> to vector<1x8x8x32xf32>
    %44 = arith.mulf %39, %43 : vector<1x8x8x32xf32>
    %45 = arith.addf %37, %44 : vector<1x8x8x32xf32>
    %46 = vector.extract_strided_slice %4 {offsets = [0, 1, 0, 0], sizes = [1, 8, 8, 32], strides = [1, 1, 1, 1]} : vector<1x10x8x32xbf16> to vector<1x8x8x32xbf16>
    %47 = arith.extf %46 : vector<1x8x8x32xbf16> to vector<1x8x8x32xf32>
    %48 = vector.extract_strided_slice %1 {offsets = [5, 0], sizes = [1, 32], strides = [1, 1]} : vector<9x32xf32> to vector<1x32xf32>
    %49 = vector.shape_cast %48 : vector<1x32xf32> to vector<32xf32>
    %50 = vector.shape_cast %49 : vector<32xf32> to vector<1x1x1x32xf32>
    %51 = vector.broadcast %50 : vector<1x1x1x32xf32> to vector<1x8x8x32xf32>
    %52 = arith.mulf %47, %51 : vector<1x8x8x32xf32>
    %53 = arith.addf %45, %52 : vector<1x8x8x32xf32>
    %54 = vector.extract_strided_slice %2 {offsets = [0, 2, 0, 0], sizes = [1, 8, 8, 32], strides = [1, 1, 1, 1]} : vector<1x10x8x32xbf16> to vector<1x8x8x32xbf16>
    %55 = arith.extf %54 : vector<1x8x8x32xbf16> to vector<1x8x8x32xf32>
    %56 = vector.extract_strided_slice %1 {offsets = [6, 0], sizes = [1, 32], strides = [1, 1]} : vector<9x32xf32> to vector<1x32xf32>
    %57 = vector.shape_cast %56 : vector<1x32xf32> to vector<32xf32>
    %58 = vector.shape_cast %57 : vector<32xf32> to vector<1x1x1x32xf32>
    %59 = vector.broadcast %58 : vector<1x1x1x32xf32> to vector<1x8x8x32xf32>
    %60 = arith.mulf %55, %59 : vector<1x8x8x32xf32>
    %61 = arith.addf %53, %60 : vector<1x8x8x32xf32>
    %62 = vector.extract_strided_slice %3 {offsets = [0, 2, 0, 0], sizes = [1, 8, 8, 32], strides = [1, 1, 1, 1]} : vector<1x10x8x32xbf16> to vector<1x8x8x32xbf16>
    %63 = arith.extf %62 : vector<1x8x8x32xbf16> to vector<1x8x8x32xf32>
    %64 = vector.extract_strided_slice %1 {offsets = [7, 0], sizes = [1, 32], strides = [1, 1]} : vector<9x32xf32> to vector<1x32xf32>
    %65 = vector.shape_cast %64 : vector<1x32xf32> to vector<32xf32>
    %66 = vector.shape_cast %65 : vector<32xf32> to vector<1x1x1x32xf32>
    %67 = vector.broadcast %66 : vector<1x1x1x32xf32> to vector<1x8x8x32xf32>
    %68 = arith.mulf %63, %67 : vector<1x8x8x32xf32>
    %69 = arith.addf %61, %68 : vector<1x8x8x32xf32>
    %70 = vector.extract_strided_slice %4 {offsets = [0, 2, 0, 0], sizes = [1, 8, 8, 32], strides = [1, 1, 1, 1]} : vector<1x10x8x32xbf16> to vector<1x8x8x32xbf16>
    %71 = arith.extf %70 : vector<1x8x8x32xbf16> to vector<1x8x8x32xf32>
    %72 = vector.extract_strided_slice %1 {offsets = [8, 0], sizes = [1, 32], strides = [1, 1]} : vector<9x32xf32> to vector<1x32xf32>
    %73 = vector.shape_cast %72 : vector<1x32xf32> to vector<32xf32>
    %74 = vector.shape_cast %73 : vector<32xf32> to vector<1x1x1x32xf32>
    %75 = vector.broadcast %74 : vector<1x1x1x32xf32> to vector<1x8x8x32xf32>
    %76 = arith.mulf %71, %75 : vector<1x8x8x32xf32>
    %77 = arith.addf %69, %76 : vector<1x8x8x32xf32>
    %c0_5 = arith.constant 0 : index
    %c0_6 = arith.constant 0 : index
    %78 = vector.load %arg3[%c0_5, %c0_6] : memref<1x32xf32, #tpu.memory_space<vmem>>, vector<1x32xf32>
    %79 = vector.shape_cast %78 : vector<1x32xf32> to vector<32xf32>
    %80 = vector.shape_cast %79 : vector<32xf32> to vector<1x1x1x32xf32>
    %81 = vector.broadcast %80 : vector<1x1x1x32xf32> to vector<1x8x8x32xf32>
    %82 = arith.addf %77, %81 : vector<1x8x8x32xf32>
    %83 = vector.shape_cast %82 : vector<1x8x8x32xf32> to vector<64x32xf32>
    %84 = arith.truncf %83 : vector<64x32xf32> to vector<64x32xbf16>
    %c0_7 = arith.constant 0 : index
    %c0_8 = arith.constant 0 : index
    %85 = vector.load %arg4[%c0_7, %c0_8] : memref<32x32xbf16, #tpu.memory_space<vmem>>, vector<32x32xbf16>
    %cst_9 = arith.constant dense<0.000000e+00> : vector<64x32xf32>
    %86 = tpu.matmul %84, %85, %cst_9 {dimension_numbers = #tpu.dot_dimension_numbers<[1], [0], [0], [1], [0, 0, 1, 1], [], []>} : vector<64x32xbf16>, vector<32x32xbf16>, vector<64x32xf32> -> vector<64x32xf32>
    %c0_10 = arith.constant 0 : index
    %c0_11 = arith.constant 0 : index
    %87 = vector.load %arg5[%c0_10, %c0_11] : memref<1x32xf32, #tpu.memory_space<vmem>>, vector<1x32xf32>
    %88 = vector.broadcast %87 : vector<1x32xf32> to vector<64x32xf32>
    %89 = arith.addf %86, %88 : vector<64x32xf32>
    %cst_12 = arith.constant 0.000000e+00 : f32
    %90 = vector.broadcast %cst_12 : f32 to vector<64x32xf32>
    %91 = arith.cmpf ogt, %89, %90 : vector<64x32xf32>
    %cst_13 = arith.constant 1.000000e-01 : f32
    %92 = vector.broadcast %cst_13 : f32 to vector<64x32xf32>
    %93 = arith.mulf %92, %89 : vector<64x32xf32>
    %94 = arith.select %91, %89, %93 : vector<64x32xi1>, vector<64x32xf32>
    %95 = vector.shape_cast %94 : vector<64x32xf32> to vector<1x8x8x32xf32>
    %96 = arith.truncf %95 : vector<1x8x8x32xf32> to vector<1x8x8x32xbf16>
    %c0_14 = arith.constant 0 : index
    %c0_15 = arith.constant 0 : index
    %c0_16 = arith.constant 0 : index
    %c0_17 = arith.constant 0 : index
    %97 = vector.load %arg6[%c0_14, %c0_15, %c0_16, %c0_17] : memref<1x8x8x32xbf16, #tpu.memory_space<vmem>>, vector<1x8x8x32xbf16>
    tpu.vector_store %arg6[%c0_14, %c0_15, %c0_16, %c0_17], %96 {strides = array<i32>} : memref<1x8x8x32xbf16, #tpu.memory_space<vmem>>, vector<1x8x8x32xbf16>,
    return
  }
  func.func @transform_0(%arg0: i32) -> (i32, i32, i32, i32) {
    %c0_i32 = arith.constant 0 : i32
    %c0_i32_0 = arith.constant 0 : i32
    %c0_i32_1 = arith.constant 0 : i32
    %c0_i32_2 = arith.constant 0 : i32
    return %arg0, %c0_i32, %c0_i32_0, %c0_i32_1 : i32, i32, i32, i32
  }
  func.func @transform_1(%arg0: i32) -> (i32, i32) {
    %c0_i32 = arith.constant 0 : i32
    %c0_i32_0 = arith.constant 0 : i32
    %c0_i32_1 = arith.constant 0 : i32
    return %c0_i32, %c0_i32_0 : i32, i32
  }
  func.func @transform_2(%arg0: i32) -> (i32, i32) {
    %c0_i32 = arith.constant 0 : i32
    %c0_i32_0 = arith.constant 0 : i32
    %c0_i32_1 = arith.constant 0 : i32
    return %c0_i32, %c0_i32_0 : i32, i32
  }
  func.func @transform_3(%arg0: i32) -> (i32, i32) {
    %c0_i32 = arith.constant 0 : i32
    %c0_i32_0 = arith.constant 0 : i32
    %c0_i32_1 = arith.constant 0 : i32
    return %c0_i32, %c0_i32_0 : i32, i32
  }
  func.func @transform_4(%arg0: i32) -> (i32, i32) {
    %c0_i32 = arith.constant 0 : i32
    %c0_i32_0 = arith.constant 0 : i32
    %c0_i32_1 = arith.constant 0 : i32
    return %c0_i32, %c0_i32_0 : i32, i32
  }
  func.func @transform_5(%arg0: i32) -> (i32, i32, i32, i32) {
    %c0_i32 = arith.constant 0 : i32
    %c0_i32_0 = arith.constant 0 : i32
    %c0_i32_1 = arith.constant 0 : i32
    %c0_i32_2 = arith.constant 0 : i32
    return %arg0, %c0_i32, %c0_i32_0, %c0_i32_1 : i32, i32, i32, i32
  }
}

module attributes {stable_mosaic.version = 11 : i64} {
  func.func @_matmul_bias_act_kernel(%arg0: i32, %arg1: memref<256x128xbf16, #tpu.memory_space<vmem>>, %arg2: memref<128x128xbf16, #tpu.memory_space<vmem>>, %arg3: memref<1x128xf32, #tpu.memory_space<vmem>>, %arg4: memref<256x128xf32, #tpu.memory_space<vmem>>) attributes {dimension_semantics = [#tpu.dimension_semantics<parallel>], iteration_bounds = array<i64: 2>, scalar_prefetch = 0 : i64, scratch_operands = 0 : i64, tpu.core_type = #tpu.core_type<tc>, window_params = [{transform_indices = @transform_0, window_bounds = array<i64: 256, 128>}, {pipeline_mode = #tpu.pipeline_mode<synchronous>, transform_indices = @transform_1, window_bounds = array<i64: 128, 128>}, {pipeline_mode = #tpu.pipeline_mode<synchronous>, transform_indices = @transform_2, window_bounds = array<i64: 1, 128>}, {transform_indices = @transform_3, window_bounds = array<i64: 256, 128>}]} {
    %c0 = arith.constant 0 : index
    %c0_0 = arith.constant 0 : index
    %0 = vector.load %arg1[%c0, %c0_0] : memref<256x128xbf16, #tpu.memory_space<vmem>>, vector<256x128xbf16>
    %c0_1 = arith.constant 0 : index
    %c0_2 = arith.constant 0 : index
    %1 = vector.load %arg2[%c0_1, %c0_2] : memref<128x128xbf16, #tpu.memory_space<vmem>>, vector<128x128xbf16>
    %cst = arith.constant dense<0.000000e+00> : vector<256x128xf32>
    %2 = tpu.matmul %0, %1, %cst {dimension_numbers = #tpu.dot_dimension_numbers<[1], [0], [0], [1], [0, 0, 1, 1], [], []>} : vector<256x128xbf16>, vector<128x128xbf16>, vector<256x128xf32> -> vector<256x128xf32>
    %c0_3 = arith.constant 0 : index
    %c0_4 = arith.constant 0 : index
    %3 = vector.load %arg3[%c0_3, %c0_4] : memref<1x128xf32, #tpu.memory_space<vmem>>, vector<1x128xf32>
    %4 = vector.broadcast %3 : vector<1x128xf32> to vector<256x128xf32>
    %5 = arith.addf %2, %4 : vector<256x128xf32>
    %6 = arith.negf %5 : vector<256x128xf32>
    %7 = math.exp %6 : vector<256x128xf32>
    %cst_5 = arith.constant 1.000000e+00 : f32
    %8 = vector.broadcast %cst_5 : f32 to vector<256x128xf32>
    %9 = arith.addf %8, %7 : vector<256x128xf32>
    %10 = arith.divf %8, %9 : vector<256x128xf32>
    %c0_6 = arith.constant 0 : index
    %c0_7 = arith.constant 0 : index
    %11 = vector.load %arg4[%c0_6, %c0_7] : memref<256x128xf32, #tpu.memory_space<vmem>>, vector<256x128xf32>
    tpu.vector_store %arg4[%c0_6, %c0_7], %10 {strides = array<i32>} : memref<256x128xf32, #tpu.memory_space<vmem>>, vector<256x128xf32>,
    return
  }
  func.func @transform_0(%arg0: i32) -> (i32, i32) {
    %c0_i32 = arith.constant 0 : i32
    %c0_i32_0 = arith.constant 0 : i32
    return %arg0, %c0_i32 : i32, i32
  }
  func.func @transform_1(%arg0: i32) -> (i32, i32) {
    %c0_i32 = arith.constant 0 : i32
    %c0_i32_0 = arith.constant 0 : i32
    %c0_i32_1 = arith.constant 0 : i32
    return %c0_i32, %c0_i32_0 : i32, i32
  }
  func.func @transform_2(%arg0: i32) -> (i32, i32) {
    %c0_i32 = arith.constant 0 : i32
    %c0_i32_0 = arith.constant 0 : i32
    %c0_i32_1 = arith.constant 0 : i32
    return %c0_i32, %c0_i32_0 : i32, i32
  }
  func.func @transform_3(%arg0: i32) -> (i32, i32) {
    %c0_i32 = arith.constant 0 : i32
    %c0_i32_0 = arith.constant 0 : i32
    return %arg0, %c0_i32 : i32, i32
  }
}

</mosaic_0001>

<bundles_post_ra>
// kernel: style_network_forward.11
= control target key start
LH: loop header
LB: loop body
LE: loop exit
PB: predicated region body
PF: predicated region fallthrough
CT: control target
= control target key end

     0   :  { %s1296_s12 = smov 0   ;;  %s1486_s0 = inlined_call_operand.vmem [shape: bf16[512,256], index: 0, kind: input, shape index: {}]   ;;  %s1487_s1 = inlined_call_operand.vmem [shape: bf16[256,128], index: 1, kind: input, shape index: {}]   ;;  %s1488_s2 = inlined_call_operand.vmem [shape: f32[1,128], index: 2, kind: input, shape index: {}]   ;;  %s1489_s3 = inlined_call_operand.vmem [shape: bf16[512,128], index: 3, kind: output, shape index: {}]  }
   0x1 LB: > { %s895_s13 = sadd.s32 4294967295, %s1274_s12   ;;  %p899_p0 = scmp.ge.s32.totalorder %s1274_s12, 1  ;;  %s1274_s12 = sphi %s1296_s12, %s13_s12  }
   0x2   : > { %p139_p1 = scmp.lt.s32.totalorder %s1274_s12, 3 }
   0x4   : > { %p140_p2 = pnand %p899_p0, %p139_p1 }
   0x5   : > { %s900_s26 = sshll.u32 (!%p140_p2), %s895_s13, 5 }
   0x6   : > { %143 = sbr.rel (%p140_p2) target bundleno = 305 (0x131), region = 32  ;;  %p165_p3 = scmp.lt.s32.totalorder (!%p140_p2), %s900_s26, 63 }
   0xb   : > { %v1139_v0 = vld [vmem:[%s1487_s1 + $0x38] sm:$0xff]  ;;  %v1138_v2 = vld [vmem:[%s1487_s1 + $0x30] sm:$0xff]  ;;  %v1137_v4 = vld [vmem:[%s1487_s1 + $0x28] sm:$0xff]  ;;  %s1491_s26 = smov (!%p165_p3, %s900_s26), 63 }
   0xc   : > { %v1147_v1 = vld [vmem:[%s1487_s1 + $0x78] sm:$0xff]  ;;  %501 = vmatpush.bf16.msra.mxu0 %v1139_v0  ;;  %1243 = vmatpush.bf16.msra.mxu2 %v1139_v0  ;;  %v1146_v3 = vld [vmem:[%s1487_s1 + $0x70] sm:$0xff]  ;;  %v1145_v5 = vld [vmem:[%s1487_s1 + $0x68] sm:$0xff]  ;;  %s1099_s13 = sshll.u32 %s1491_s26, 3  ;;  %s904_s28 = sshll.u32 %s1491_s26, 2 }
   0xd   : > { %590 = vmatpush.bf16.msra.mxu1 %v1147_v1  ;;  %1251 = vmatpush.bf16.msra.mxu3 %v1147_v1  ;;  %v1136_v6 = vld [vmem:[%s1487_s1 + $0x20] sm:$0xff]  ;;  %v1135_v8 = vld [vmem:[%s1487_s1 + $0x18] sm:$0xff]  ;;  %v1134_v10 = vld [vmem:[%s1487_s1 + $0x10] sm:$0xff]  ;;  %s1349_s18 = scalar_lea.vmem %s1486_s0, %s1099_s13  ;;  %s1436_s4 = scalar_lea.vmem %s1489_s3, %s904_s28 }
   0xe   : > { %v1144_v7 = vld [vmem:[%s1487_s1 + $0x60] sm:$0xff]  ;;  %v1143_v9 = vld [vmem:[%s1487_s1 + $0x58] sm:$0xff]  ;;  %v1142_v11 = vld [vmem:[%s1487_s1 + $0x50] sm:$0xff] }
   0xf   : > { %v1133_v12 = vld [vmem:[%s1487_s1 + $0x8] sm:$0xff]  ;;  %v1132_v14 = vld [vmem:[%s1487_s1] sm:$0xff]  ;;  %v915_v28 = vld [vmem:[%s1349_s18 + $0x10] sm:$0xf] }
  0x10   : > { %502 = vmatpush.bf16.msra.mxu0 %v1138_v2  ;;  %1244 = vmatpush.bf16.msra.mxu2 %v1138_v2  ;;  %v1141_v13 = vld [vmem:[%s1487_s1 + $0x48] sm:$0xff]  ;;  %v1140_v15 = vld [vmem:[%s1487_s1 + $0x40] sm:$0xff]  ;;  %v1103_v29 = vld [vmem:[%s1349_s18 + $0x14] sm:$0xf0] }
  0x11   : > { %591 = vmatpush.bf16.msra.mxu1 %v1146_v3  ;;  %1252 = vmatpush.bf16.msra.mxu3 %v1146_v3  ;;  %v907_v16 = vld [vmem:[%s1349_s18] sm:$0xf]  ;;  %v1101_v17 = vld [vmem:[%s1349_s18 + $0x4] sm:$0xf0]  ;;  %v1100_v20 = vld [vmem:[%s1349_s18 + $0x4] sm:$0xf]  ;;  %v916_v36 = vor.u32 %v1103_v29, %v915_v28 }
  0x12   : > { %v971_v18 = vld [vmem:[%s1349_s18 + $0x80] sm:$0xf]  ;;  %v1117_v19 = vld [vmem:[%s1349_s18 + $0x84] sm:$0xf0]  ;;  %v909_v21 = vld [vmem:[%s1349_s18 + $0x8] sm:$0xf0]  ;;  %v908_v24 = vor.u32 %v1101_v17, %v907_v16 }
  0x13   : > { %v1116_v22 = vld [vmem:[%s1349_s18 + $0x84] sm:$0xf]  ;;  %v973_v23 = vld [vmem:[%s1349_s18 + $0x88] sm:$0xf0]  ;;  %v972_v25 = vor.u32 %v1117_v19, %v971_v18  ;;  %v912_v26 = vor.u32 %v1100_v20, %v909_v21  ;;  %v979_v30 = vld [vmem:[%s1349_s18 + $0x90] sm:$0xf] }
  0x14   : > { %503 = vmatpush.bf16.msra.mxu0 %v1137_v4  ;;  %1245 = vmatpush.bf16.msra.mxu2 %v1137_v4  ;;  %v976_v27 = vor.u32 %v1116_v22, %v973_v23  ;;  %v1119_v31 = vld [vmem:[%s1349_s18 + $0x94] sm:$0xf0]  ;;  %v1102_v32 = vld [vmem:[%s1349_s18 + $0x14] sm:$0xf]  ;;  %v917_v33 = vld [vmem:[%s1349_s18 + $0x18] sm:$0xf0] }
  0x15   : > { %592 = vmatpush.bf16.msra.mxu1 %v1145_v5  ;;  %1253 = vmatpush.bf16.msra.mxu3 %v1145_v5  ;;  %v1118_v34 = vld [vmem:[%s1349_s18 + $0x94] sm:$0xf]  ;;  %v981_v35 = vld [vmem:[%s1349_s18 + $0x98] sm:$0xf0]  ;;  %v980_v37 = vor.u32 %v1119_v31, %v979_v30  ;;  %v920_v38 = vor.u32 %v1102_v32, %v917_v33  ;;  %v923_v40 = vld [vmem:[%s1349_s18 + $0x20] sm:$0xf] }
  0x16   : > { %v984_v39 = vor.u32 %v1118_v34, %v981_v35  ;;  %v1105_v41 = vld [vmem:[%s1349_s18 + $0x24] sm:$0xf0]  ;;  %v987_v42 = vld [vmem:[%s1349_s18 + $0xa0] sm:$0xf]  ;;  %v1104_v44 = vld [vmem:[%s1349_s18 + $0x24] sm:$0xf] }
  0x17   : > { %v1121_v43 = vld [vmem:[%s1349_s18 + $0xa4] sm:$0xf0]  ;;  %v925_v45 = vld [vmem:[%s1349_s18 + $0x28] sm:$0xf0]  ;;  %v1120_v46 = vld [vmem:[%s1349_s18 + $0xa4] sm:$0xf]  ;;  %v924_v48 = vor.u32 %v1105_v41, %v923_v40 }
  0x18   : > { %504 = vmatpush.bf16.msra.mxu0 %v1136_v6  ;;  %1246 = vmatpush.bf16.msra.mxu2 %v1136_v6  ;;  %v989_v47 = vld [vmem:[%s1349_s18 + $0xa8] sm:$0xf0]  ;;  %v988_v49 = vor.u32 %v1121_v43, %v987_v42  ;;  %v928_v50 = vor.u32 %v1104_v44, %v925_v45  ;;  %v931_v52 = vld [vmem:[%s1349_s18 + $0x30] sm:$0xf]  ;;  %v1107_v53 = vld [vmem:[%s1349_s18 + $0x34] sm:$0xf0] }
  0x19   : > { %593 = vmatpush.bf16.msra.mxu1 %v1144_v7  ;;  %1254 = vmatpush.bf16.msra.mxu3 %v1144_v7  ;;  %v992_v51 = vor.u32 %v1120_v46, %v989_v47  ;;  %v995_v54 = vld [vmem:[%s1349_s18 + $0xb0] sm:$0xf]  ;;  %v1123_v55 = vld [vmem:[%s1349_s18 + $0xb4] sm:$0xf0]  ;;  %v1106_v56 = vld [vmem:[%s1349_s18 + $0x34] sm:$0xf]  ;;  %v932_v60 = vor.u32 %v1107_v53, %v931_v52 }
  0x1a   : > { %v933_v57 = vld [vmem:[%s1349_s18 + $0x38] sm:$0xf0]  ;;  %v1122_v58 = vld [vmem:[%s1349_s18 + $0xb4] sm:$0xf]  ;;  %v996_v61 = vor.u32 %v1123_v55, %v995_v54  ;;  %v939_v0 = vld [vmem:[%s1349_s18 + $0x40] sm:$0xf] }
  0x1b   : > { %v997_v59 = vld [vmem:[%s1349_s18 + $0xb8] sm:$0xf0]  ;;  %v936_v62 = vor.u32 %v1106_v56, %v933_v57  ;;  %v1109_v1 = vld [vmem:[%s1349_s18 + $0x44] sm:$0xf0]  ;;  %v1003_v2 = vld [vmem:[%s1349_s18 + $0xc0] sm:$0xf] }
  0x1c   : > { %505 = vmatpush.bf16.msra.mxu0 %v1135_v8  ;;  %1247 = vmatpush.bf16.msra.mxu2 %v1135_v8  ;;  %v1000_v63 = vor.u32 %v1122_v58, %v997_v59  ;;  %v1125_v3 = vld [vmem:[%s1349_s18 + $0xc4] sm:$0xf0]  ;;  %v1108_v4 = vld [vmem:[%s1349_s18 + $0x44] sm:$0xf]  ;;  %v941_v5 = vld [vmem:[%s1349_s18 + $0x48] sm:$0xf0]  ;;  %v940_v8 = vor.u32 %v1109_v1, %v939_v0 }
  0x1d   : > { %594 = vmatpush.bf16.msra.mxu1 %v1143_v9  ;;  %1255 = vmatpush.bf16.msra.mxu3 %v1143_v9  ;;  %v1124_v6 = vld [vmem:[%s1349_s18 + $0xc4] sm:$0xf]  ;;  %v1005_v7 = vld [vmem:[%s1349_s18 + $0xc8] sm:$0xf0]  ;;  %v1004_v9 = vor.u32 %v1125_v3, %v1003_v2  ;;  %v1110_v16 = vld [vmem:[%s1349_s18 + $0x54] sm:$0xf] }
  0x1e   : > { %v949_v17 = vld [vmem:[%s1349_s18 + $0x58] sm:$0xf0]  ;;  %v1126_v18 = vld [vmem:[%s1349_s18 + $0xd4] sm:$0xf]  ;;  %v1112_v28 = vld [vmem:[%s1349_s18 + $0x64] sm:$0xf] }
  0x1f   : > { %v1013_v19 = vld [vmem:[%s1349_s18 + $0xd8] sm:$0xf0]  ;;  %v952_v22 = vor.u32 %v1110_v16, %v949_v17  ;;  %v957_v29 = vld [vmem:[%s1349_s18 + $0x68] sm:$0xf0]  ;;  %v1128_v30 = vld [vmem:[%s1349_s18 + $0xe4] sm:$0xf] }
  0x20   : > { %506 = vmatpush.bf16.msra.mxu0 %v1134_v10  ;;  %1248 = vmatpush.bf16.msra.mxu2 %v1134_v10  ;;  %v944_v10 = vor.u32 %v1108_v4, %v941_v5  ;;  %v1016_v23 = vor.u32 %v1126_v18, %v1013_v19  ;;  %v1021_v31 = vld [vmem:[%s1349_s18 + $0xe8] sm:$0xf0]  ;;  %v960_v34 = vor.u32 %v1112_v28, %v957_v29  ;;  %v1114_v40 = vld [vmem:[%s1349_s18 + $0x74] sm:$0xf]  ;;  %v965_v41 = vld [vmem:[%s1349_s18 + $0x78] sm:$0xf0] }
  0x21   : > { %595 = vmatpush.bf16.msra.mxu1 %v1142_v11  ;;  %1256 = vmatpush.bf16.msra.mxu3 %v1142_v11  ;;  %v1008_v11 = vor.u32 %v1124_v6, %v1005_v7  ;;  %v1024_v35 = vor.u32 %v1128_v30, %v1021_v31  ;;  %v1130_v42 = vld [vmem:[%s1349_s18 + $0xf4] sm:$0xf]  ;;  %v1029_v43 = vld [vmem:[%s1349_s18 + $0xf8] sm:$0xf0]  ;;  %v968_v46 = vor.u32 %v1114_v40, %v965_v41 }
  0x22   : > { %v1032_v47 = vor.u32 %v1130_v42, %v1029_v43 }
  0x24   : > { %507 = vmatpush.bf16.msra.mxu0 %v1133_v12  ;;  %1249 = vmatpush.bf16.msra.mxu2 %v1133_v12  ;;  %v947_v12 = vld [vmem:[%s1349_s18 + $0x50] sm:$0xf] }
  0x25   : > { %596 = vmatpush.bf16.msra.mxu1 %v1141_v13  ;;  %1257 = vmatpush.bf16.msra.mxu3 %v1141_v13  ;;  %v1111_v13 = vld [vmem:[%s1349_s18 + $0x54] sm:$0xf0] }
  0x26   : > { %v948_v20 = vor.u32 %v1111_v13, %v947_v12 }
  0x28   : > { %508 = vmatpush.bf16.msra.mxu0 %v1132_v14  ;;  %1250 = vmatpush.bf16.msra.mxu2 %v1132_v14  ;;  %v1011_v14 = vld [vmem:[%s1349_s18 + $0xd0] sm:$0xf] }
  0x29   : > { %597 = vmatpush.bf16.msra.mxu1 %v1140_v15  ;;  %1258 = vmatpush.bf16.msra.mxu3 %v1140_v15  ;;  %v1127_v15 = vld [vmem:[%s1349_s18 + $0xd4] sm:$0xf0] }
  0x2a   : > { %v1012_v21 = vor.u32 %v1127_v15, %v1011_v14 }
  0x2b   : > { %509 = vmatmul.bf16.vlgmr.msra.gmra.mxu0 %v908_v24  ;;  %549 = vmatmul.bf16.vlgmr.msra.gmra.mxu2 %v972_v25  ;;  %v955_v24 = vld [vmem:[%s1349_s18 + $0x60] sm:$0xf]  ;;  %v1113_v25 = vld [vmem:[%s1349_s18 + $0x64] sm:$0xf0] }
  0x2c   : > { %598 = vmatmul.bf16.vlgmr.msra.gmra.mxu1 %v912_v26  ;;  %638 = vmatmul.bf16.vlgmr.msra.gmra.mxu3 %v976_v27  ;;  %v1019_v26 = vld [vmem:[%s1349_s18 + $0xe0] sm:$0xf]  ;;  %v1129_v27 = vld [vmem:[%s1349_s18 + $0xe4] sm:$0xf0]  ;;  %v956_v32 = vor.u32 %v1113_v25, %v955_v24 }
  0x2d   : > { %v1020_v33 = vor.u32 %v1129_v27, %v1019_v26 }
  0x3b   : > { %514 = vmatmul.bf16.gmra.mxu0 %v916_v36  ;;  %554 = vmatmul.bf16.gmra.mxu2 %v980_v37  ;;  %v963_v36 = vld [vmem:[%s1349_s18 + $0x70] sm:$0xf]  ;;  %v1115_v37 = vld [vmem:[%s1349_s18 + $0x74] sm:$0xf0] }
  0x3c   : > { %603 = vmatmul.bf16.gmra.mxu1 %v920_v38  ;;  %643 = vmatmul.bf16.gmra.mxu3 %v984_v39  ;;  %v1027_v38 = vld [vmem:[%s1349_s18 + $0xf0] sm:$0xf]  ;;  %v1131_v39 = vld [vmem:[%s1349_s18 + $0xf4] sm:$0xf0]  ;;  %v964_v44 = vor.u32 %v1115_v37, %v963_v36 }
  0x3d   : > { %v1028_v45 = vor.u32 %v1131_v39, %v1027_v38 }
  0x4b   : > { %519 = vmatmul.bf16.gmra.mxu0 %v924_v48  ;;  %559 = vmatmul.bf16.gmra.mxu2 %v988_v49  ;;  %v1427_v48 = vld [vmem:[%s1488_s2] ss:$0 sm:$0xff] }
  0x4c   : > { %608 = vmatmul.bf16.gmra.mxu1 %v928_v50  ;;  %648 = vmatmul.bf16.gmra.mxu3 %v992_v51 }
  0x5b   : > { %524 = vmatmul.bf16.gmra.mxu0 %v932_v60  ;;  %564 = vmatmul.bf16.gmra.mxu2 %v996_v61 }
  0x5c   : > { %613 = vmatmul.bf16.gmra.mxu1 %v936_v62  ;;  %653 = vmatmul.bf16.gmra.mxu3 %v1000_v63 }
  0x6b   : > { %529 = vmatmul.bf16.gmra.mxu0 %v940_v8  ;;  %569 = vmatmul.bf16.gmra.mxu2 %v1004_v9 }
  0x6c   : > { %618 = vmatmul.bf16.gmra.mxu1 %v944_v10  ;;  %658 = vmatmul.bf16.gmra.mxu3 %v1008_v11 }
  0x7b   : > { %534 = vmatmul.bf16.gmra.mxu0 %v948_v20  ;;  %574 = vmatmul.bf16.gmra.mxu2 %v1012_v21 }
  0x7c   : > { %623 = vmatmul.bf16.gmra.mxu1 %v952_v22  ;;  %663 = vmatmul.bf16.gmra.mxu3 %v1016_v23 }
  0x8b   : > { %539 = vmatmul.bf16.gmra.mxu0 %v956_v32  ;;  %579 = vmatmul.bf16.gmra.mxu2 %v1020_v33 }
  0x8c   : > { %628 = vmatmul.bf16.gmra.mxu1 %v960_v34  ;;  %668 = vmatmul.bf16.gmra.mxu3 %v1024_v35 }
  0x9b   : > { %544 = vmatmul.bf16.gmra.mxu0 %v964_v44  ;;  %584 = vmatmul.bf16.gmra.mxu2 %v1028_v45 }
  0x9c   : > { %633 = vmatmul.bf16.gmra.mxu1 %v968_v46  ;;  %673 = vmatmul.bf16.gmra.mxu3 %v1032_v47 }
  0xa8   : > { %v510_v49 = vpop.f32.mrf.mxu0 }
  0xa9   : > { %v599_v50 = vpop.f32.mrf.mxu1  ;;  %v511_v51 = vadd.f32 %v1427_v48, %v510_v49 }
  0xab   : > { %v600_v53 = vadd.f32 %v599_v50, %v511_v51 }
  0xad   : > { %v711_v59 = vmul.f32 0.1, %v600_v53  ;;  %vm679_vm0 = vcmp.gt.f32.partialorder %v600_v53, 0.0 }
  0xae   : > { %v550_v52 = vpop.f32.mrf.mxu2 }
  0xaf   : > { %v639_v54 = vpop.f32.mrf.mxu3  ;;  %v551_v56 = vadd.f32 %v1427_v48, %v550_v52  ;;  %v743_v0 = vsel %vm679_vm0, %v600_v53, %v711_v59 }
  0xb0   : > { %v512_v55 = vpop.f32.mrf.mxu0 }
  0xb1   : > { %v513_v57 = vadd.f32 %v1427_v48, %v512_v55  ;;  %v601_v58 = vpop.f32.mrf.mxu1  ;;  %v640_v61 = vadd.f32 %v639_v54, %v551_v56 }
  0xb3   : > { %v602_v60 = vadd.f32 %v601_v58, %v513_v57  ;;  %v727_v6 = vmul.f32 0.1, %v640_v61  ;;  %vm695_vm2 = vcmp.gt.f32.partialorder %v640_v61, 0.0 }
  0xb5   : > { %vm680_vm1 = vcmp.gt.f32.partialorder %v602_v60, 0.0  ;;  %v712_v62 = vmul.f32 0.1, %v602_v60  ;;  %v759_v11 = vsel %vm695_vm2, %v640_v61, %v727_v6 }
  0xb6   : > { %v552_v63 = vpop.f32.mrf.mxu2 }
  0xb7   : > { %v744_v1 = vsel %vm680_vm1, %v602_v60, %v712_v62  ;;  %v553_v2 = vadd.f32 %v1427_v48, %v552_v63  ;;  %v641_v3 = vpop.f32.mrf.mxu3 }
  0xb8   : > { %v1151_v4 = vpack.c.bf16 %v744_v1, %v743_v0  ;;  %v515_v5 = vpop.f32.mrf.mxu0 }
  0xb9   : > { %v642_v7 = vadd.f32 %v641_v3, %v553_v2  ;;  %v604_v8 = vpop.f32.mrf.mxu1  ;;  %v516_v10 = vadd.f32 %v1427_v48, %v515_v5 }
  0xba   : > { %1152 = vst [vmem:[%s1436_s4] sm:$0xff] %v1151_v4  }
  0xbb   : > { %vm696_vm3 = vcmp.gt.f32.partialorder %v642_v7, 0.0  ;;  %v728_v9 = vmul.f32 0.1, %v642_v7  ;;  %v605_v15 = vadd.f32 %v604_v8, %v516_v10 }
  0xbd   : > { %v760_v12 = vsel %vm696_vm3, %v642_v7, %v728_v9  ;;  %v713_v21 = vmul.f32 0.1, %v605_v15  ;;  %vm681_vm4 = vcmp.gt.f32.partialorder %v605_v15, 0.0 }
  0xbe   : > { %v1191_v13 = vpack.c.bf16 %v760_v12, %v759_v11  ;;  %v555_v14 = vpop.f32.mrf.mxu2 }
  0xbf   : > { %v644_v16 = vpop.f32.mrf.mxu3  ;;  %v556_v18 = vadd.f32 %v1427_v48, %v555_v14  ;;  %v745_v26 = vsel %vm681_vm4, %v605_v15, %v713_v21 }
  0xc0   : > { %1235 = vst [vmem:[%s1436_s4 + $0x40] sm:$0xff] %v1191_v13   ;;  %v517_v17 = vpop.f32.mrf.mxu0 }
  0xc1   : > { %v518_v19 = vadd.f32 %v1427_v48, %v517_v17  ;;  %v606_v20 = vpop.f32.mrf.mxu1  ;;  %v645_v23 = vadd.f32 %v644_v16, %v556_v18 }
  0xc3   : > { %v607_v22 = vadd.f32 %v606_v20, %v518_v19  ;;  %v729_v32 = vmul.f32 0.1, %v645_v23  ;;  %vm697_vm6 = vcmp.gt.f32.partialorder %v645_v23, 0.0 }
  0xc5   : > { %vm682_vm5 = vcmp.gt.f32.partialorder %v607_v22, 0.0  ;;  %v714_v24 = vmul.f32 0.1, %v607_v22  ;;  %v761_v37 = vsel %vm697_vm6, %v645_v23, %v729_v32 }
  0xc6   : > { %v557_v25 = vpop.f32.mrf.mxu2 }
  0xc7   : > { %v746_v27 = vsel %vm682_vm5, %v607_v22, %v714_v24  ;;  %v558_v28 = vadd.f32 %v1427_v48, %v557_v25  ;;  %v646_v29 = vpop.f32.mrf.mxu3 }
  0xc8   : > { %v1156_v30 = vpack.c.bf16 %v746_v27, %v745_v26  ;;  %v520_v31 = vpop.f32.mrf.mxu0 }
  0xc9   : > { %v647_v33 = vadd.f32 %v646_v29, %v558_v28  ;;  %v609_v34 = vpop.f32.mrf.mxu1  ;;  %v521_v36 = vadd.f32 %v1427_v48, %v520_v31 }
  0xca   : > { %1228 = vst [vmem:[%s1436_s4 + $0x8] sm:$0xff] %v1156_v30  }
  0xcb   : > { %vm698_vm7 = vcmp.gt.f32.partialorder %v647_v33, 0.0  ;;  %v730_v35 = vmul.f32 0.1, %v647_v33  ;;  %v610_v41 = vadd.f32 %v609_v34, %v521_v36 }
  0xcd   : > { %v762_v38 = vsel %vm698_vm7, %v647_v33, %v730_v35  ;;  %v715_v47 = vmul.f32 0.1, %v610_v41  ;;  %vm683_vm8 = vcmp.gt.f32.partialorder %v610_v41, 0.0 }
  0xce   : > { %v1196_v39 = vpack.c.bf16 %v762_v38, %v761_v37  ;;  %v560_v40 = vpop.f32.mrf.mxu2 }
  0xcf   : > { %v649_v42 = vpop.f32.mrf.mxu3  ;;  %v561_v44 = vadd.f32 %v1427_v48, %v560_v40  ;;  %v747_v53 = vsel %vm683_vm8, %v610_v41, %v715_v47 }
  0xd0   : > { %1236 = vst [vmem:[%s1436_s4 + $0x48] sm:$0xff] %v1196_v39   ;;  %v522_v43 = vpop.f32.mrf.mxu0 }
  0xd1   : > { %v523_v45 = vadd.f32 %v1427_v48, %v522_v43  ;;  %v611_v46 = vpop.f32.mrf.mxu1  ;;  %v650_v50 = vadd.f32 %v649_v42, %v561_v44 }
  0xd3   : > { %v612_v49 = vadd.f32 %v611_v46, %v523_v45  ;;  %v731_v59 = vmul.f32 0.1, %v650_v50  ;;  %vm699_vm10 = vcmp.gt.f32.partialorder %v650_v50, 0.0 }
  0xd5   : > { %vm684_vm9 = vcmp.gt.f32.partialorder %v612_v49, 0.0  ;;  %v716_v51 = vmul.f32 0.1, %v612_v49  ;;  %v763_v0 = vsel %vm699_vm10, %v650_v50, %v731_v59 }
  0xd6   : > { %v562_v52 = vpop.f32.mrf.mxu2 }
  0xd7   : > { %v748_v54 = vsel %vm684_vm9, %v612_v49, %v716_v51  ;;  %v563_v55 = vadd.f32 %v1427_v48, %v562_v52  ;;  %v651_v56 = vpop.f32.mrf.mxu3 }
  0xd8   : > { %v1161_v57 = vpack.c.bf16 %v748_v54, %v747_v53  ;;  %v525_v58 = vpop.f32.mrf.mxu0 }
  0xd9   : > { %v652_v60 = vadd.f32 %v651_v56, %v563_v55  ;;  %v614_v61 = vpop.f32.mrf.mxu1  ;;  %v526_v63 = vadd.f32 %v1427_v48, %v525_v58 }
  0xda   : > { %1229 = vst [vmem:[%s1436_s4 + $0x10] sm:$0xff] %v1161_v57  }
  0xdb   : > { %vm700_vm11 = vcmp.gt.f32.partialorder %v652_v60, 0.0  ;;  %v732_v62 = vmul.f32 0.1, %v652_v60  ;;  %v615_v4 = vadd.f32 %v614_v61, %v526_v63 }
  0xdd   : > { %v764_v1 = vsel %vm700_vm11, %v652_v60, %v732_v62  ;;  %v717_v10 = vmul.f32 0.1, %v615_v4  ;;  %vm685_vm12 = vcmp.gt.f32.partialorder %v615_v4, 0.0 }
  0xde   : > { %v1201_v2 = vpack.c.bf16 %v764_v1, %v763_v0  ;;  %v565_v3 = vpop.f32.mrf.mxu2 }
  0xdf   : > { %v654_v5 = vpop.f32.mrf.mxu3  ;;  %v566_v7 = vadd.f32 %v1427_v48, %v565_v3  ;;  %v749_v15 = vsel %vm685_vm12, %v615_v4, %v717_v10 }
  0xe0   : > { %1237 = vst [vmem:[%s1436_s4 + $0x50] sm:$0xff] %v1201_v2   ;;  %v527_v6 = vpop.f32.mrf.mxu0 }
  0xe1   : > { %v528_v8 = vadd.f32 %v1427_v48, %v527_v6  ;;  %v616_v9 = vpop.f32.mrf.mxu1  ;;  %v655_v12 = vadd.f32 %v654_v5, %v566_v7 }
  0xe3   : > { %v617_v11 = vadd.f32 %v616_v9, %v528_v8  ;;  %v733_v21 = vmul.f32 0.1, %v655_v12  ;;  %vm701_vm14 = vcmp.gt.f32.partialorder %v655_v12, 0.0 }
  0xe5   : > { %vm686_vm13 = vcmp.gt.f32.partialorder %v617_v11, 0.0  ;;  %v718_v13 = vmul.f32 0.1, %v617_v11  ;;  %v765_v26 = vsel %vm701_vm14, %v655_v12, %v733_v21 }
  0xe6   : > { %v567_v14 = vpop.f32.mrf.mxu2 }
  0xe7   : > { %v750_v16 = vsel %vm686_vm13, %v617_v11, %v718_v13  ;;  %v568_v17 = vadd.f32 %v1427_v48, %v567_v14  ;;  %v656_v18 = vpop.f32.mrf.mxu3 }
  0xe8   : > { %v1166_v19 = vpack.c.bf16 %v750_v16, %v749_v15  ;;  %v530_v20 = vpop.f32.mrf.mxu0 }
  0xe9   : > { %v657_v22 = vadd.f32 %v656_v18, %v568_v17  ;;  %v619_v23 = vpop.f32.mrf.mxu1  ;;  %v531_v25 = vadd.f32 %v1427_v48, %v530_v20 }
  0xea   : > { %1230 = vst [vmem:[%s1436_s4 + $0x18] sm:$0xff] %v1166_v19  }
  0xeb   : > { %vm702_vm15 = vcmp.gt.f32.partialorder %v657_v22, 0.0  ;;  %v734_v24 = vmul.f32 0.1, %v657_v22  ;;  %v620_v30 = vadd.f32 %v619_v23, %v531_v25 }
  0xed   : > { %v766_v27 = vsel %vm702_vm15, %v657_v22, %v734_v24  ;;  %v719_v36 = vmul.f32 0.1, %v620_v30  ;;  %vm687_vm0 = vcmp.gt.f32.partialorder %v620_v30, 0.0 }
  0xee   : > { %v1206_v28 = vpack.c.bf16 %v766_v27, %v765_v26  ;;  %v570_v29 = vpop.f32.mrf.mxu2 }
  0xef   : > { %v659_v31 = vpop.f32.mrf.mxu3  ;;  %v571_v33 = vadd.f32 %v1427_v48, %v570_v29  ;;  %v751_v41 = vsel %vm687_vm0, %v620_v30, %v719_v36 }
  0xf0   : > { %1238 = vst [vmem:[%s1436_s4 + $0x58] sm:$0xff] %v1206_v28   ;;  %v532_v32 = vpop.f32.mrf.mxu0 }
  0xf1   : > { %v533_v34 = vadd.f32 %v1427_v48, %v532_v32  ;;  %v621_v35 = vpop.f32.mrf.mxu1  ;;  %v660_v38 = vadd.f32 %v659_v31, %v571_v33 }
  0xf3   : > { %v622_v37 = vadd.f32 %v621_v35, %v533_v34  ;;  %v735_v47 = vmul.f32 0.1, %v660_v38  ;;  %vm703_vm2 = vcmp.gt.f32.partialorder %v660_v38, 0.0 }
  0xf5   : > { %vm688_vm1 = vcmp.gt.f32.partialorder %v622_v37, 0.0  ;;  %v720_v39 = vmul.f32 0.1, %v622_v37  ;;  %v767_v53 = vsel %vm703_vm2, %v660_v38, %v735_v47 }
  0xf6   : > { %v572_v40 = vpop.f32.mrf.mxu2 }
  0xf7   : > { %v752_v42 = vsel %vm688_vm1, %v622_v37, %v720_v39  ;;  %v573_v43 = vadd.f32 %v1427_v48, %v572_v40  ;;  %v661_v44 = vpop.f32.mrf.mxu3 }
  0xf8   : > { %v1171_v45 = vpack.c.bf16 %v752_v42, %v751_v41  ;;  %v535_v46 = vpop.f32.mrf.mxu0 }
  0xf9   : > { %v662_v49 = vadd.f32 %v661_v44, %v573_v43  ;;  %v624_v50 = vpop.f32.mrf.mxu1  ;;  %v536_v52 = vadd.f32 %v1427_v48, %v535_v46 }
  0xfa   : > { %1231 = vst [vmem:[%s1436_s4 + $0x20] sm:$0xff] %v1171_v45  }
  0xfb   : > { %vm704_vm3 = vcmp.gt.f32.partialorder %v662_v49, 0.0  ;;  %v736_v51 = vmul.f32 0.1, %v662_v49  ;;  %v625_v57 = vadd.f32 %v624_v50, %v536_v52 }
  0xfd   : > { %v768_v54 = vsel %vm704_vm3, %v662_v49, %v736_v51  ;;  %v721_v63 = vmul.f32 0.1, %v625_v57  ;;  %vm689_vm4 = vcmp.gt.f32.partialorder %v625_v57, 0.0 }
  0xfe   : > { %v1211_v55 = vpack.c.bf16 %v768_v54, %v767_v53  ;;  %v575_v56 = vpop.f32.mrf.mxu2 }
  0xff   : > { %v664_v58 = vpop.f32.mrf.mxu3  ;;  %v576_v60 = vadd.f32 %v1427_v48, %v575_v56  ;;  %v753_v4 = vsel %vm689_vm4, %v625_v57, %v721_v63 }
 0x100   : > { %1239 = vst [vmem:[%s1436_s4 + $0x60] sm:$0xff] %v1211_v55   ;;  %v537_v59 = vpop.f32.mrf.mxu0 }
 0x101   : > { %v538_v61 = vadd.f32 %v1427_v48, %v537_v59  ;;  %v626_v62 = vpop.f32.mrf.mxu1  ;;  %v665_v1 = vadd.f32 %v664_v58, %v576_v60 }
 0x103   : > { %v627_v0 = vadd.f32 %v626_v62, %v538_v61  ;;  %v737_v10 = vmul.f32 0.1, %v665_v1  ;;  %vm705_vm6 = vcmp.gt.f32.partialorder %v665_v1, 0.0 }
 0x105   : > { %vm690_vm5 = vcmp.gt.f32.partialorder %v627_v0, 0.0  ;;  %v722_v2 = vmul.f32 0.1, %v627_v0  ;;  %v769_v15 = vsel %vm705_vm6, %v665_v1, %v737_v10 }
 0x106   : > { %v577_v3 = vpop.f32.mrf.mxu2 }
 0x107   : > { %v754_v5 = vsel %vm690_vm5, %v627_v0, %v722_v2  ;;  %v578_v6 = vadd.f32 %v1427_v48, %v577_v3  ;;  %v666_v7 = vpop.f32.mrf.mxu3 }
 0x108   : > { %v1176_v8 = vpack.c.bf16 %v754_v5, %v753_v4  ;;  %v540_v9 = vpop.f32.mrf.mxu0 }
 0x109   : > { %v667_v11 = vadd.f32 %v666_v7, %v578_v6  ;;  %v629_v12 = vpop.f32.mrf.mxu1  ;;  %v541_v14 = vadd.f32 %v1427_v48, %v540_v9 }
 0x10a   : > { %1232 = vst [vmem:[%s1436_s4 + $0x28] sm:$0xff] %v1176_v8  }
 0x10b   : > { %vm706_vm7 = vcmp.gt.f32.partialorder %v667_v11, 0.0  ;;  %v738_v13 = vmul.f32 0.1, %v667_v11  ;;  %v630_v19 = vadd.f32 %v629_v12, %v541_v14 }
 0x10d   : > { %v770_v16 = vsel %vm706_vm7, %v667_v11, %v738_v13  ;;  %v723_v25 = vmul.f32 0.1, %v630_v19  ;;  %vm691_vm8 = vcmp.gt.f32.partialorder %v630_v19, 0.0 }
 0x10e   : > { %v1216_v17 = vpack.c.bf16 %v770_v16, %v769_v15  ;;  %v580_v18 = vpop.f32.mrf.mxu2 }
 0x10f   : > { %v669_v20 = vpop.f32.mrf.mxu3  ;;  %v581_v22 = vadd.f32 %v1427_v48, %v580_v18  ;;  %v755_v30 = vsel %vm691_vm8, %v630_v19, %v723_v25 }
 0x110   : > { %1240 = vst [vmem:[%s1436_s4 + $0x68] sm:$0xff] %v1216_v17   ;;  %v542_v21 = vpop.f32.mrf.mxu0 }
 0x111   : > { %v543_v23 = vadd.f32 %v1427_v48, %v542_v21  ;;  %v631_v24 = vpop.f32.mrf.mxu1  ;;  %v670_v27 = vadd.f32 %v669_v20, %v581_v22 }
 0x113   : > { %v632_v26 = vadd.f32 %v631_v24, %v543_v23  ;;  %v739_v36 = vmul.f32 0.1, %v670_v27  ;;  %vm707_vm10 = vcmp.gt.f32.partialorder %v670_v27, 0.0 }
 0x115   : > { %vm692_vm9 = vcmp.gt.f32.partialorder %v632_v26, 0.0  ;;  %v724_v28 = vmul.f32 0.1, %v632_v26  ;;  %v771_v41 = vsel %vm707_vm10, %v670_v27, %v739_v36 }
 0x116   : > { %v582_v29 = vpop.f32.mrf.mxu2 }
 0x117   : > { %v756_v31 = vsel %vm692_vm9, %v632_v26, %v724_v28  ;;  %v583_v32 = vadd.f32 %v1427_v48, %v582_v29  ;;  %v671_v33 = vpop.f32.mrf.mxu3 }
 0x118   : > { %v1181_v34 = vpack.c.bf16 %v756_v31, %v755_v30  ;;  %v545_v35 = vpop.f32.mrf.mxu0 }
 0x119   : > { %v672_v37 = vadd.f32 %v671_v33, %v583_v32  ;;  %v634_v38 = vpop.f32.mrf.mxu1  ;;  %v546_v40 = vadd.f32 %v1427_v48, %v545_v35 }
 0x11a   : > { %1233 = vst [vmem:[%s1436_s4 + $0x30] sm:$0xff] %v1181_v34  }
 0x11b   : > { %vm708_vm11 = vcmp.gt.f32.partialorder %v672_v37, 0.0  ;;  %v740_v39 = vmul.f32 0.1, %v672_v37  ;;  %v635_v45 = vadd.f32 %v634_v38, %v546_v40 }
 0x11d   : > { %v772_v42 = vsel %vm708_vm11, %v672_v37, %v740_v39  ;;  %v725_v52 = vmul.f32 0.1, %v635_v45  ;;  %vm693_vm12 = vcmp.gt.f32.partialorder %v635_v45, 0.0 }
 0x11e   : > { %v1221_v43 = vpack.c.bf16 %v772_v42, %v771_v41  ;;  %v585_v44 = vpop.f32.mrf.mxu2 }
 0x11f   : > { %v674_v46 = vpop.f32.mrf.mxu3  ;;  %v586_v49 = vadd.f32 %v1427_v48, %v585_v44  ;;  %v757_v57 = vsel %vm693_vm12, %v635_v45, %v725_v52 }
 0x120   : > { %1241 = vst [vmem:[%s1436_s4 + $0x70] sm:$0xff] %v1221_v43   ;;  %v547_v47 = vpop.f32.mrf.mxu0 }
 0x121   : > { %v548_v50 = vadd.f32 %v1427_v48, %v547_v47  ;;  %v636_v51 = vpop.f32.mrf.mxu1  ;;  %v675_v54 = vadd.f32 %v674_v46, %v586_v49 }
 0x123   : > { %v637_v53 = vadd.f32 %v636_v51, %v548_v50  ;;  %v741_v62 = vmul.f32 0.1, %v675_v54  ;;  %vm709_vm14 = vcmp.gt.f32.partialorder %v675_v54, 0.0 }
 0x125   : > { %vm694_vm13 = vcmp.gt.f32.partialorder %v637_v53, 0.0  ;;  %v726_v55 = vmul.f32 0.1, %v637_v53  ;;  %v773_v1 = vsel %vm709_vm14, %v675_v54, %v741_v62 }
 0x126   : > { %v587_v56 = vpop.f32.mrf.mxu2 }
 0x127   : > { %v758_v58 = vsel %vm694_vm13, %v637_v53, %v726_v55  ;;  %v588_v59 = vadd.f32 %v1427_v48, %v587_v56  ;;  %v676_v61 = vpop.f32.mrf.mxu3 }
 0x128   : > { %v1186_v60 = vpack.c.bf16 %v758_v58, %v757_v57 }
 0x129   : > { %v677_v63 = vadd.f32 %v676_v61, %v588_v59 }
 0x12a   : > { %1234 = vst [vmem:[%s1436_s4 + $0x38] sm:$0xff] %v1186_v60  }
 0x12b   : > { %vm710_vm15 = vcmp.gt.f32.partialorder %v677_v63, 0.0  ;;  %v742_v0 = vmul.f32 0.1, %v677_v63 }
 0x12d   : > { %v774_v2 = vsel %vm710_vm15, %v677_v63, %v742_v0 }
 0x12e   : > { %v1226_v3 = vpack.c.bf16 %v774_v2, %v773_v1 }
 0x130   : > { %1242 = vst [vmem:[%s1436_s4 + $0x78] sm:$0xff] %v1226_v3  }
 0x131 PF: > { %s13_s12 = sadd.s32 1, %s1274_s12  }
 0x132   : > { %p10_p4 = scmp.ge.s32.totalorder %s13_s12, 4  }
 0x134   :  { %12 = sbr.rel (!%p10_p4) target bundleno = 1 (0x1), region = 62 }

// kernel: style_network_forward.12
= control target key start
LH: loop header
LB: loop body
LE: loop exit
PB: predicated region body
PF: predicated region fallthrough
CT: control target
= control target key end

     0   :  { %s720_s12 = smov 0   ;;  %s816_s0 = inlined_call_operand.vmem [shape: bf16[128,256], index: 0, kind: input, shape index: {}]   ;;  %s817_s1 = inlined_call_operand.vmem [shape: bf16[256,128], index: 1, kind: input, shape index: {}]   ;;  %s818_s2 = inlined_call_operand.vmem [shape: f32[1,128], index: 2, kind: input, shape index: {}]   ;;  %s819_s3 = inlined_call_operand.vmem [shape: bf16[128,128], index: 3, kind: output, shape index: {}]  }
   0x1 LB: > { %s511_s13 = sadd.s32 4294967295, %s698_s12   ;;  %p515_p0 = scmp.ge.s32.totalorder %s698_s12, 1  ;;  %s698_s12 = sphi %s720_s12, %s13_s12  }
   0x2   : > { %p139_p1 = scmp.lt.s32.totalorder %s698_s12, 3 }
   0x4   : > { %p140_p2 = pnand %p515_p0, %p139_p1 }
   0x5   : > { %s516_s26 = sshll.u32 (!%p140_p2), %s511_s13, 3 }
   0x6   : > { %143 = sbr.rel (%p140_p2) target bundleno = 209 (0xd1), region = 32  ;;  %p165_p3 = scmp.lt.s32.totalorder (!%p140_p2), %s516_s26, 15 }
   0xb   : > { %v635_v0 = vld [vmem:[%s817_s1 + $0x38] sm:$0xff]  ;;  %v634_v2 = vld [vmem:[%s817_s1 + $0x30] sm:$0xff]  ;;  %v633_v4 = vld [vmem:[%s817_s1 + $0x28] sm:$0xff]  ;;  %s821_s26 = smov (!%p165_p3, %s516_s26), 15 }
   0xc   : > { %v643_v1 = vld [vmem:[%s817_s1 + $0x78] sm:$0xff]  ;;  %357 = vmatpush.bf16.msra.mxu0 %v635_v0  ;;  %667 = vmatpush.bf16.msra.mxu2 %v635_v0  ;;  %v642_v3 = vld [vmem:[%s817_s1 + $0x70] sm:$0xff]  ;;  %v641_v5 = vld [vmem:[%s817_s1 + $0x68] sm:$0xff]  ;;  %s619_s13 = sshll.u32 %s821_s26, 3  ;;  %s520_s28 = sshll.u32 %s821_s26, 2 }
   0xd   : > { %386 = vmatpush.bf16.msra.mxu1 %v643_v1  ;;  %675 = vmatpush.bf16.msra.mxu3 %v643_v1  ;;  %v632_v6 = vld [vmem:[%s817_s1 + $0x20] sm:$0xff]  ;;  %v631_v8 = vld [vmem:[%s817_s1 + $0x18] sm:$0xff]  ;;  %v630_v10 = vld [vmem:[%s817_s1 + $0x10] sm:$0xff]  ;;  %s773_s18 = scalar_lea.vmem %s816_s0, %s619_s13  ;;  %s807_s4 = scalar_lea.vmem %s819_s3, %s520_s28 }
   0xe   : > { %v640_v7 = vld [vmem:[%s817_s1 + $0x60] sm:$0xff]  ;;  %v639_v9 = vld [vmem:[%s817_s1 + $0x58] sm:$0xff]  ;;  %v638_v11 = vld [vmem:[%s817_s1 + $0x50] sm:$0xff] }
   0xf   : > { %v629_v12 = vld [vmem:[%s817_s1 + $0x8] sm:$0xff]  ;;  %v628_v14 = vld [vmem:[%s817_s1] sm:$0xff]  ;;  %v531_v28 = vld [vmem:[%s773_s18 + $0x10] sm:$0xf] }
  0x10   : > { %358 = vmatpush.bf16.msra.mxu0 %v634_v2  ;;  %668 = vmatpush.bf16.msra.mxu2 %v634_v2  ;;  %v637_v13 = vld [vmem:[%s817_s1 + $0x48] sm:$0xff]  ;;  %v636_v15 = vld [vmem:[%s817_s1 + $0x40] sm:$0xff]  ;;  %v623_v29 = vld [vmem:[%s773_s18 + $0x14] sm:$0xf0] }
  0x11   : > { %387 = vmatpush.bf16.msra.mxu1 %v642_v3  ;;  %676 = vmatpush.bf16.msra.mxu3 %v642_v3  ;;  %v523_v16 = vld [vmem:[%s773_s18] sm:$0xf]  ;;  %v621_v17 = vld [vmem:[%s773_s18 + $0x4] sm:$0xf0]  ;;  %v620_v20 = vld [vmem:[%s773_s18 + $0x4] sm:$0xf]  ;;  %v532_v36 = vor.u32 %v623_v29, %v531_v28 }
  0x12   : > { %v539_v18 = vld [vmem:[%s773_s18 + $0x20] sm:$0xf]  ;;  %v625_v19 = vld [vmem:[%s773_s18 + $0x24] sm:$0xf0]  ;;  %v525_v21 = vld [vmem:[%s773_s18 + $0x8] sm:$0xf0]  ;;  %v524_v24 = vor.u32 %v621_v17, %v523_v16 }
  0x13   : > { %v624_v22 = vld [vmem:[%s773_s18 + $0x24] sm:$0xf]  ;;  %v541_v23 = vld [vmem:[%s773_s18 + $0x28] sm:$0xf0]  ;;  %v540_v25 = vor.u32 %v625_v19, %v539_v18  ;;  %v528_v26 = vor.u32 %v620_v20, %v525_v21  ;;  %v547_v30 = vld [vmem:[%s773_s18 + $0x30] sm:$0xf] }
  0x14   : > { %359 = vmatpush.bf16.msra.mxu0 %v633_v4  ;;  %669 = vmatpush.bf16.msra.mxu2 %v633_v4  ;;  %v544_v27 = vor.u32 %v624_v22, %v541_v23  ;;  %v627_v31 = vld [vmem:[%s773_s18 + $0x34] sm:$0xf0]  ;;  %v622_v32 = vld [vmem:[%s773_s18 + $0x14] sm:$0xf]  ;;  %v533_v33 = vld [vmem:[%s773_s18 + $0x18] sm:$0xf0] }
  0x15   : > { %388 = vmatpush.bf16.msra.mxu1 %v641_v5  ;;  %677 = vmatpush.bf16.msra.mxu3 %v641_v5  ;;  %v626_v34 = vld [vmem:[%s773_s18 + $0x34] sm:$0xf]  ;;  %v549_v35 = vld [vmem:[%s773_s18 + $0x38] sm:$0xf0]  ;;  %v548_v37 = vor.u32 %v627_v31, %v547_v30  ;;  %v536_v38 = vor.u32 %v622_v32, %v533_v33  ;;  %v691_v40 = vld [vmem:[%s818_s2] ss:$0 sm:$0xff] }
  0x16   : > { %v552_v39 = vor.u32 %v626_v34, %v549_v35 }
  0x18   : > { %360 = vmatpush.bf16.msra.mxu0 %v632_v6  ;;  %670 = vmatpush.bf16.msra.mxu2 %v632_v6 }
  0x19   : > { %389 = vmatpush.bf16.msra.mxu1 %v640_v7  ;;  %678 = vmatpush.bf16.msra.mxu3 %v640_v7 }
  0x1c   : > { %361 = vmatpush.bf16.msra.mxu0 %v631_v8  ;;  %671 = vmatpush.bf16.msra.mxu2 %v631_v8 }
  0x1d   : > { %390 = vmatpush.bf16.msra.mxu1 %v639_v9  ;;  %679 = vmatpush.bf16.msra.mxu3 %v639_v9 }
  0x20   : > { %362 = vmatpush.bf16.msra.mxu0 %v630_v10  ;;  %672 = vmatpush.bf16.msra.mxu2 %v630_v10 }
  0x21   : > { %391 = vmatpush.bf16.msra.mxu1 %v638_v11  ;;  %680 = vmatpush.bf16.msra.mxu3 %v638_v11 }
  0x24   : > { %363 = vmatpush.bf16.msra.mxu0 %v629_v12  ;;  %673 = vmatpush.bf16.msra.mxu2 %v629_v12 }
  0x25   : > { %392 = vmatpush.bf16.msra.mxu1 %v637_v13  ;;  %681 = vmatpush.bf16.msra.mxu3 %v637_v13 }
  0x28   : > { %364 = vmatpush.bf16.msra.mxu0 %v628_v14  ;;  %674 = vmatpush.bf16.msra.mxu2 %v628_v14 }
  0x29   : > { %393 = vmatpush.bf16.msra.mxu1 %v636_v15  ;;  %682 = vmatpush.bf16.msra.mxu3 %v636_v15 }
  0x2b   : > { %365 = vmatmul.bf16.vlgmr.msra.gmra.mxu0 %v524_v24  ;;  %375 = vmatmul.bf16.vlgmr.msra.gmra.mxu2 %v540_v25 }
  0x2c   : > { %394 = vmatmul.bf16.vlgmr.msra.gmra.mxu1 %v528_v26  ;;  %404 = vmatmul.bf16.vlgmr.msra.gmra.mxu3 %v544_v27 }
  0x3b   : > { %370 = vmatmul.bf16.gmra.mxu0 %v532_v36  ;;  %380 = vmatmul.bf16.gmra.mxu2 %v548_v37 }
  0x3c   : > { %399 = vmatmul.bf16.gmra.mxu1 %v536_v38  ;;  %409 = vmatmul.bf16.gmra.mxu3 %v552_v39 }
  0xa8   : > { %v366_v41 = vpop.f32.mrf.mxu0 }
  0xa9   : > { %v395_v42 = vpop.f32.mrf.mxu1  ;;  %v367_v43 = vadd.f32 %v691_v40, %v366_v41 }
  0xab   : > { %v396_v45 = vadd.f32 %v395_v42, %v367_v43 }
  0xad   : > { %v423_v51 = vmul.f32 0.1, %v396_v45  ;;  %vm415_vm0 = vcmp.gt.f32.partialorder %v396_v45, 0.0 }
  0xae   : > { %v376_v44 = vpop.f32.mrf.mxu2 }
  0xaf   : > { %v405_v46 = vpop.f32.mrf.mxu3  ;;  %v377_v48 = vadd.f32 %v691_v40, %v376_v44  ;;  %v431_v56 = vsel %vm415_vm0, %v396_v45, %v423_v51 }
  0xb0   : > { %v368_v47 = vpop.f32.mrf.mxu0 }
  0xb1   : > { %v369_v49 = vadd.f32 %v691_v40, %v368_v47  ;;  %v397_v50 = vpop.f32.mrf.mxu1  ;;  %v406_v53 = vadd.f32 %v405_v46, %v377_v48 }
  0xb3   : > { %v398_v52 = vadd.f32 %v397_v50, %v369_v49  ;;  %v427_v62 = vmul.f32 0.1, %v406_v53  ;;  %vm419_vm2 = vcmp.gt.f32.partialorder %v406_v53, 0.0 }
  0xb5   : > { %vm416_vm1 = vcmp.gt.f32.partialorder %v398_v52, 0.0  ;;  %v424_v54 = vmul.f32 0.1, %v398_v52  ;;  %v435_v3 = vsel %vm419_vm2, %v406_v53, %v427_v62 }
  0xb6   : > { %v378_v55 = vpop.f32.mrf.mxu2 }
  0xb7   : > { %v432_v57 = vsel %vm416_vm1, %v398_v52, %v424_v54  ;;  %v379_v58 = vadd.f32 %v691_v40, %v378_v55  ;;  %v407_v59 = vpop.f32.mrf.mxu3 }
  0xb8   : > { %v647_v60 = vpack.c.bf16 %v432_v57, %v431_v56  ;;  %v371_v61 = vpop.f32.mrf.mxu0 }
  0xb9   : > { %v408_v63 = vadd.f32 %v407_v59, %v379_v58  ;;  %v400_v0 = vpop.f32.mrf.mxu1  ;;  %v372_v2 = vadd.f32 %v691_v40, %v371_v61 }
  0xba   : > { %648 = vst [vmem:[%s807_s4] sm:$0xff] %v647_v60  }
  0xbb   : > { %vm420_vm3 = vcmp.gt.f32.partialorder %v408_v63, 0.0  ;;  %v428_v1 = vmul.f32 0.1, %v408_v63  ;;  %v401_v7 = vadd.f32 %v400_v0, %v372_v2 }
  0xbd   : > { %v436_v4 = vsel %vm420_vm3, %v408_v63, %v428_v1  ;;  %v425_v13 = vmul.f32 0.1, %v401_v7  ;;  %vm417_vm4 = vcmp.gt.f32.partialorder %v401_v7, 0.0 }
  0xbe   : > { %v657_v5 = vpack.c.bf16 %v436_v4, %v435_v3  ;;  %v381_v6 = vpop.f32.mrf.mxu2 }
  0xbf   : > { %v410_v8 = vpop.f32.mrf.mxu3  ;;  %v382_v10 = vadd.f32 %v691_v40, %v381_v6  ;;  %v433_v18 = vsel %vm417_vm4, %v401_v7, %v425_v13 }
  0xc0   : > { %665 = vst [vmem:[%s807_s4 + $0x10] sm:$0xff] %v657_v5   ;;  %v373_v9 = vpop.f32.mrf.mxu0 }
  0xc1   : > { %v374_v11 = vadd.f32 %v691_v40, %v373_v9  ;;  %v402_v12 = vpop.f32.mrf.mxu1  ;;  %v411_v15 = vadd.f32 %v410_v8, %v382_v10 }
  0xc3   : > { %v403_v14 = vadd.f32 %v402_v12, %v374_v11  ;;  %v429_v23 = vmul.f32 0.1, %v411_v15  ;;  %vm421_vm6 = vcmp.gt.f32.partialorder %v411_v15, 0.0 }
  0xc5   : > { %vm418_vm5 = vcmp.gt.f32.partialorder %v403_v14, 0.0  ;;  %v426_v16 = vmul.f32 0.1, %v403_v14  ;;  %v437_v26 = vsel %vm421_vm6, %v411_v15, %v429_v23 }
  0xc6   : > { %v383_v17 = vpop.f32.mrf.mxu2 }
  0xc7   : > { %v434_v19 = vsel %vm418_vm5, %v403_v14, %v426_v16  ;;  %v384_v20 = vadd.f32 %v691_v40, %v383_v17  ;;  %v412_v22 = vpop.f32.mrf.mxu3 }
  0xc8   : > { %v652_v21 = vpack.c.bf16 %v434_v19, %v433_v18 }
  0xc9   : > { %v413_v24 = vadd.f32 %v412_v22, %v384_v20 }
  0xca   : > { %664 = vst [vmem:[%s807_s4 + $0x8] sm:$0xff] %v652_v21  }
  0xcb   : > { %vm422_vm7 = vcmp.gt.f32.partialorder %v413_v24, 0.0  ;;  %v430_v25 = vmul.f32 0.1, %v413_v24 }
  0xcd   : > { %v438_v27 = vsel %vm422_vm7, %v413_v24, %v430_v25 }
  0xce   : > { %v662_v28 = vpack.c.bf16 %v438_v27, %v437_v26 }
  0xd0   : > { %666 = vst [vmem:[%s807_s4 + $0x18] sm:$0xff] %v662_v28  }
  0xd1 PF: > { %s13_s12 = sadd.s32 1, %s698_s12  }
  0xd2   : > { %p10_p4 = scmp.ge.s32.totalorder %s13_s12, 4  }
  0xd4   :  { %12 = sbr.rel (!%p10_p4) target bundleno = 1 (0x1), region = 62 }

// kernel: style_network_forward.13
= control target key start
LH: loop header
LB: loop body
LE: loop exit
PB: predicated region body
PF: predicated region fallthrough
CT: control target
= control target key end

     0   :  { %s690_s12 = smov 0   ;;  %s786_s0 = inlined_call_operand.vmem [shape: bf16[32,384], index: 0, kind: input, shape index: {}]   ;;  %s787_s1 = inlined_call_operand.vmem [shape: bf16[384,128], index: 1, kind: input, shape index: {}]   ;;  %s788_s2 = inlined_call_operand.vmem [shape: f32[1,128], index: 2, kind: input, shape index: {}]   ;;  %s789_s3 = inlined_call_operand.vmem [shape: bf16[32,128], index: 3, kind: output, shape index: {}]  }
   0x1 LB: > { %s501_s13 = sadd.s32 4294967295, %s668_s12   ;;  %p505_p0 = scmp.ge.s32.totalorder %s668_s12, 1  ;;  %s668_s12 = sphi %s690_s12, %s13_s12  }
   0x2   : > { %p139_p1 = scmp.lt.s32.totalorder %s668_s12, 3 }
   0x4   : > { %p140_p2 = pnand %p505_p0, %p139_p1 }
   0x5   : > { %s506_s5 = sshll.u32 (!%p140_p2), %s501_s13, 1 }
   0x6   : > { %143 = sbr.rel (%p140_p2) target bundleno = 193 (0xc1), region = 32  ;;  %p165_p3 = scmp.lt.s32.totalorder (!%p140_p2), %s506_s5, 3 }
   0xb   : > { %v630_v0 = vld [vmem:[%s787_s1 + $0x38] sm:$0xff]  ;;  %v629_v3 = vld [vmem:[%s787_s1 + $0x30] sm:$0xff]  ;;  %v628_v6 = vld [vmem:[%s787_s1 + $0x28] sm:$0xff]  ;;  %s791_s5 = smov (!%p165_p3, %s506_s5), 3 }
   0xc   : > { %v638_v1 = vld [vmem:[%s787_s1 + $0x78] sm:$0xff]  ;;  %393 = vmatpush.bf16.msra.mxu0 %v630_v0  ;;  %v637_v4 = vld [vmem:[%s787_s1 + $0x70] sm:$0xff]  ;;  %v636_v7 = vld [vmem:[%s787_s1 + $0x68] sm:$0xff]  ;;  %s652_s23 = smul.u32 12, %s791_s5  ;;  %s509_s18 = sshll.u32 %s791_s5, 2 }
   0xd   : > { %v646_v2 = vld [vmem:[%s787_s1 + $0xb8] sm:$0xff]  ;;  %407 = vmatpush.bf16.msra.mxu1 %v638_v1  ;;  %v645_v5 = vld [vmem:[%s787_s1 + $0xb0] sm:$0xff]  ;;  %v644_v8 = vld [vmem:[%s787_s1 + $0xa8] sm:$0xff]  ;;  %s175_s21 = scalar_lea.vmem %s789_s3, %s509_s18 }
   0xe   : > { %421 = vmatpush.bf16.msra.mxu2 %v646_v2  ;;  %v627_v9 = vld [vmem:[%s787_s1 + $0x20] sm:$0xff]  ;;  %v626_v12 = vld [vmem:[%s787_s1 + $0x18] sm:$0xff]  ;;  %v625_v15 = vld [vmem:[%s787_s1 + $0x10] sm:$0xff]  ;;  %s169_s6 = scalar_lea.vmem %s786_s0, %s652_s23 }
   0xf   : > { %v635_v10 = vld [vmem:[%s787_s1 + $0x60] sm:$0xff]  ;;  %v634_v13 = vld [vmem:[%s787_s1 + $0x58] sm:$0xff]  ;;  %v633_v16 = vld [vmem:[%s787_s1 + $0x50] sm:$0xff] }
  0x10   : > { %394 = vmatpush.bf16.msra.mxu0 %v629_v3  ;;  %v643_v11 = vld [vmem:[%s787_s1 + $0xa0] sm:$0xff]  ;;  %v642_v14 = vld [vmem:[%s787_s1 + $0x98] sm:$0xff]  ;;  %v641_v17 = vld [vmem:[%s787_s1 + $0x90] sm:$0xff] }
  0x11   : > { %408 = vmatpush.bf16.msra.mxu1 %v637_v4  ;;  %v624_v18 = vld [vmem:[%s787_s1 + $0x8] sm:$0xff]  ;;  %v623_v21 = vld [vmem:[%s787_s1] sm:$0xff]  ;;  %v514_v26 = vld [vmem:[%s169_s6 + $0xc] sm:$0xf0] }
  0x12   : > { %422 = vmatpush.bf16.msra.mxu2 %v645_v5  ;;  %v632_v19 = vld [vmem:[%s787_s1 + $0x48] sm:$0xff]  ;;  %v631_v22 = vld [vmem:[%s787_s1 + $0x40] sm:$0xff]  ;;  %v622_v29 = vld [vmem:[%s169_s6 + $0x10] sm:$0xf0] }
  0x13   : > { %v640_v20 = vld [vmem:[%s787_s1 + $0x88] sm:$0xff]  ;;  %v512_v23 = vld [vmem:[%s169_s6] sm:$0xf]  ;;  %v620_v25 = vld [vmem:[%s169_s6 + $0x4] sm:$0xf] }
  0x14   : > { %395 = vmatpush.bf16.msra.mxu0 %v628_v6  ;;  %v621_v24 = vld [vmem:[%s169_s6 + $0x8] sm:$0xf0]  ;;  %v639_v27 = vld [vmem:[%s787_s1 + $0x80] sm:$0xff]  ;;  %v520_v28 = vld [vmem:[%s169_s6 + $0x8] sm:$0xf]  ;;  %v517_v31 = vor.u32 %v620_v25, %v514_v26 }
  0x15   : > { %409 = vmatpush.bf16.msra.mxu1 %v636_v7  ;;  %v513_v30 = vor.u32 %v621_v24, %v512_v23  ;;  %v521_v32 = vor.u32 %v622_v29, %v520_v28  ;;  %v661_v33 = vld [vmem:[%s788_s2] ss:$0 sm:$0xff] }
  0x16   : > { %423 = vmatpush.bf16.msra.mxu2 %v644_v8 }
  0x18   : > { %396 = vmatpush.bf16.msra.mxu0 %v627_v9 }
  0x19   : > { %410 = vmatpush.bf16.msra.mxu1 %v635_v10 }
  0x1a   : > { %424 = vmatpush.bf16.msra.mxu2 %v643_v11 }
  0x1c   : > { %397 = vmatpush.bf16.msra.mxu0 %v626_v12 }
  0x1d   : > { %411 = vmatpush.bf16.msra.mxu1 %v634_v13 }
  0x1e   : > { %425 = vmatpush.bf16.msra.mxu2 %v642_v14 }
  0x20   : > { %398 = vmatpush.bf16.msra.mxu0 %v625_v15 }
  0x21   : > { %412 = vmatpush.bf16.msra.mxu1 %v633_v16 }
  0x22   : > { %426 = vmatpush.bf16.msra.mxu2 %v641_v17 }
  0x24   : > { %399 = vmatpush.bf16.msra.mxu0 %v624_v18 }
  0x25   : > { %413 = vmatpush.bf16.msra.mxu1 %v632_v19 }
  0x26   : > { %427 = vmatpush.bf16.msra.mxu2 %v640_v20 }
  0x28   : > { %400 = vmatpush.bf16.msra.mxu0 %v623_v21 }
  0x29   : > { %414 = vmatpush.bf16.msra.mxu1 %v631_v22 }
  0x2a   : > { %428 = vmatpush.bf16.msra.mxu2 %v639_v27 }
  0x2b   : > { %401 = vmatmul.bf16.vlgmr.msra.gmra.mxu0 %v513_v30 }
  0x2c   : > { %415 = vmatmul.bf16.vlgmr.msra.gmra.mxu1 %v517_v31 }
  0x2d   : > { %429 = vmatmul.bf16.vlgmr.msra.gmra.mxu2 %v521_v32 }
  0xa8   : > { %v402_v34 = vpop.f32.mrf.mxu0 }
  0xa9   : > { %v416_v35 = vpop.f32.mrf.mxu1  ;;  %v403_v36 = vadd.f32 %v661_v33, %v402_v34 }
  0xab   : > { %v417_v38 = vadd.f32 %v416_v35, %v403_v36 }
  0xb0   : > { %v430_v37 = vpop.f32.mrf.mxu2  ;;  %v404_v39 = vpop.f32.mrf.mxu0 }
  0xb1   : > { %v405_v40 = vadd.f32 %v661_v33, %v404_v39  ;;  %v431_v41 = vadd.f32 %v430_v37, %v417_v38  ;;  %v418_v42 = vpop.f32.mrf.mxu1 }
  0xb3   : > { %v419_v43 = vadd.f32 %v418_v42, %v405_v40  ;;  %v437_v45 = vmul.f32 0.1, %v431_v41  ;;  %vm435_vm0 = vcmp.gt.f32.partialorder %v431_v41, 0.0 }
  0xb5   : > { %v439_v48 = vsel %vm435_vm0, %v431_v41, %v437_v45 }
  0xb8   : > { %v432_v44 = vpop.f32.mrf.mxu2 }
  0xb9   : > { %v433_v46 = vadd.f32 %v432_v44, %v419_v43 }
  0xbb   : > { %vm436_vm1 = vcmp.gt.f32.partialorder %v433_v46, 0.0  ;;  %v438_v47 = vmul.f32 0.1, %v433_v46 }
  0xbd   : > { %v440_v49 = vsel %vm436_vm1, %v433_v46, %v438_v47 }
  0xbe   : > { %v650_v50 = vpack.c.bf16 %v440_v49, %v439_v48 }
  0xc0   : > { %651 = vst [vmem:[%s175_s21] sm:$0xff] %v650_v50  }
  0xc1 PF: > { %s13_s12 = sadd.s32 1, %s668_s12  }
  0xc2   : > { %p10_p4 = scmp.ge.s32.totalorder %s13_s12, 4  }
  0xc4   :  { %12 = sbr.rel (!%p10_p4) target bundleno = 1 (0x1), region = 62 }

// kernel: style_network_forward.15
= control target key start
LH: loop header
LB: loop body
LE: loop exit
PB: predicated region body
PF: predicated region fallthrough
CT: control target
= control target key end

     0   :  { %s596_s18 = smov 0   ;;  %s653_s0 = inlined_call_operand.vmem [shape: bf16[2,4,4,128], index: 0, kind: input, shape index: {}]   ;;  %s654_s1 = inlined_call_operand.vmem [shape: f32[9,128], index: 1, kind: input, shape index: {}]   ;;  %s655_s2 = inlined_call_operand.vmem [shape: f32[1,128], index: 2, kind: input, shape index: {}]   ;;  %s656_s3 = inlined_call_operand.vmem [shape: bf16[128,128], index: 3, kind: input, shape index: {}]   ;;  %s657_s4 = inlined_call_operand.vmem [shape: f32[1,128], index: 4, kind: input, shape index: {}]   ;;  %s658_s5 = inlined_call_operand.vmem [shape: bf16[2,2,2,128], index: 5, kind: output, shape index: {}]  }
   0x1 LB: > { %s484_s19 = sadd.s32 4294967295, %s564_s18   ;;  %p488_p0 = scmp.ge.s32.totalorder %s564_s18, 1  ;;  %s564_s18 = sphi %s596_s18, %s15_s18  }
   0x2   : > { %p187_p1 = scmp.lt.s32.totalorder %s564_s18, 3 }
   0x4   : > { %p188_p2 = pnand %p488_p0, %p187_p1 }
   0x5   : > { %p214_p3 = scmp.lt.s32.totalorder (!%p188_p2), %s484_s19, 1 }
   0x6   : > { %191 = sbr.rel (%p188_p2) target bundleno = 186 (0xba), region = 40 }
   0xb   : > { %v546_v0 = vld [vmem:[%s656_s3 + $0x38] sm:$0xff]  ;;  %v545_v1 = vld [vmem:[%s656_s3 + $0x30] sm:$0xff]  ;;  %s660_s19 = smov (!%p214_p3, %s484_s19), 1  ;;  %v227_v2 = vld [vmem:[%s654_s1] sm:$0xff] }
   0xc   : > { %408 = vmatpush.bf16.msra.mxu0 %v546_v0  ;;  %s538_s26 = sshll.u32 %s660_s19, 3  ;;  %v544_v3 = vld [vmem:[%s656_s3 + $0x28] sm:$0xff]  ;;  %v231_v4 = vperm.slane %v227_v2, 0  ;;  %v236_v5 = vperm.slane %v227_v2, 1  ;;  %v249_v6 = vperm.slane %v227_v2, 2  ;;  %v268_v14 = vperm.slane %v227_v2, 4 }
   0xd   : > { %s218_s6 = scalar_lea.vmem %s653_s0, %s538_s26  ;;  %v263_v15 = vperm.slane %v227_v2, 3  ;;  %v281_v16 = vperm.slane %v227_v2, 5  ;;  %v543_v21 = vld [vmem:[%s656_s3 + $0x20] sm:$0xff]  ;;  %v300_v25 = vperm.slane %v227_v2, 7  ;;  %v542_v38 = vld [vmem:[%s656_s3 + $0x18] sm:$0xff]  ;;  %v295_v39 = vperm.slane %v227_v2, 6 }
   0xe   : > { %v223_v7 = vld [vmem:[%s218_s6] sm:$0x3]  ;;  %v224_v8 = vld [vmem:[%s218_s6 + $0x2] sm:$0x3]  ;;  %v225_v9 = vld [vmem:[%s218_s6 + $0x4] sm:$0x3] }
   0xf   : > { %v226_v10 = vld [vmem:[%s218_s6 + $0x6] sm:$0x3]  ;;  %v229_v11 = vunpack.c.l.bf16 %v223_v7  ;;  %v230_v12 = vunpack.c.l.bf16 %v224_v8  ;;  %v262_v13 = vunpack.c.l.bf16 %v225_v9  ;;  %v555_v44 = vld [vmem:[%s654_s1 + $0x8] ss:$0 sm:$0xff]  ;;  %v541_v51 = vld [vmem:[%s656_s3 + $0x10] sm:$0xff]  ;;  %s491_s25 = sshll.u32 %s660_s19, 1 }
  0x10   : > { %409 = vmatpush.bf16.msra.mxu0 %v545_v1  ;;  %v294_v24 = vunpack.c.l.bf16 %v226_v10  ;;  %v540_v62 = vld [vmem:[%s656_s3 + $0x8] sm:$0xff]  ;;  %s222_s28 = scalar_lea.vmem %s658_s5, %s491_s25 }
  0x11   : > { %v232_v17 = vmul.f32 %v231_v4, %v229_v11  ;;  %v233_v18 = vmul.f32 %v231_v4, %v230_v12  ;;  %v237_v19 = vmul.f32 %v236_v5, %v229_v11  ;;  %v238_v20 = vmul.f32 %v236_v5, %v230_v12  ;;  %v556_v5 = vld [vmem:[%s655_s2] ss:$0 sm:$0xff] }
  0x12   : > { %v250_v22 = vmul.f32 %v249_v6, %v229_v11  ;;  %v251_v23 = vmul.f32 %v249_v6, %v230_v12  ;;  %v269_v28 = vmul.f32 %v268_v14, %v230_v12  ;;  %v270_v29 = vmul.f32 %v268_v14, %v262_v13  ;;  %v539_v6 = vld [vmem:[%s656_s3] sm:$0xff] }
  0x13   : > { %v492_v26 = vrot.slane %v237_v19, 9  ;;  %v493_v27 = vrot.slane %v238_v20, 9  ;;  %v282_v32 = vmul.f32 %v281_v16, %v230_v12  ;;  %v283_v33 = vmul.f32 %v281_v16, %v262_v13 }
  0x14   : > { %410 = vmatpush.bf16.msra.mxu0 %v544_v3  ;;  %v494_v30 = vrot.slane %v250_v22, 10  ;;  %v495_v31 = vrot.slane %v251_v23, 10  ;;  %v264_v36 = vmul.f32 %v263_v15, %v230_v12  ;;  %v265_v37 = vmul.f32 %v263_v15, %v262_v13 }
  0x15   : > { %v247_v34 = vadd.f32 %v492_v26, %v232_v17  ;;  %v248_v35 = vadd.f32 %v493_v27, %v233_v18  ;;  %v496_v42 = vrot.slane %v269_v28, 9  ;;  %v497_v43 = vrot.slane %v270_v29, 9 }
  0x16   : > { %v498_v45 = vrot.slane %v282_v32, 10  ;;  %v499_v46 = vrot.slane %v283_v33, 10  ;;  %v301_v49 = vmul.f32 %v300_v25, %v262_v13  ;;  %v302_v50 = vmul.f32 %v300_v25, %v294_v24 }
  0x17   : > { %v260_v40 = vadd.f32 %v494_v30, %v247_v34  ;;  %v261_v41 = vadd.f32 %v495_v31, %v248_v35  ;;  %v296_v52 = vmul.f32 %v295_v39, %v262_v13  ;;  %v297_v53 = vmul.f32 %v295_v39, %v294_v24 }
  0x18   : > { %411 = vmatpush.bf16.msra.mxu0 %v543_v21  ;;  %v314_v56 = vmul.f32 %v555_v44, %v262_v13  ;;  %v315_v57 = vmul.f32 %v555_v44, %v294_v24  ;;  %v500_v60 = vrot.slane %v301_v49, 9  ;;  %v501_v61 = vrot.slane %v302_v50, 9  ;;  %v557_v13 = vld [vmem:[%s657_s4] ss:$0 sm:$0xff] }
  0x19   : > { %v266_v47 = vadd.f32 %v264_v36, %v260_v40  ;;  %v267_v48 = vadd.f32 %v265_v37, %v261_v41 }
  0x1a   : > { %v502_v1 = vrot.slane %v314_v56, 10  ;;  %v503_v2 = vrot.slane %v315_v57, 10 }
  0x1b   : > { %v279_v54 = vadd.f32 %v496_v42, %v266_v47  ;;  %v280_v55 = vadd.f32 %v497_v43, %v267_v48 }
  0x1c   : > { %412 = vmatpush.bf16.msra.mxu0 %v542_v38 }
  0x1d   : > { %v292_v58 = vadd.f32 %v498_v45, %v279_v54  ;;  %v293_v59 = vadd.f32 %v499_v46, %v280_v55 }
  0x1f   : > { %v298_v63 = vadd.f32 %v296_v52, %v292_v58  ;;  %v299_v0 = vadd.f32 %v297_v53, %v293_v59 }
  0x20   : > { %413 = vmatpush.bf16.msra.mxu0 %v541_v51 }
  0x21   : > { %v311_v3 = vadd.f32 %v500_v60, %v298_v63  ;;  %v312_v4 = vadd.f32 %v501_v61, %v299_v0 }
  0x23   : > { %v324_v7 = vadd.f32 %v502_v1, %v311_v3  ;;  %v325_v8 = vadd.f32 %v503_v2, %v312_v4 }
  0x24   : > { %414 = vmatpush.bf16.msra.mxu0 %v540_v62 }
  0x25   : > { %v330_v9 = vadd.f32 %v556_v5, %v324_v7  ;;  %v331_v10 = vadd.f32 %v556_v5, %v325_v8 }
  0x27   : > { %334 = vst [vmem:[#allocation1] ss:$4 sm:$0xff] %v330_v9 }
  0x28   : > { %415 = vmatpush.bf16.msra.mxu0 %v539_v6  ;;  %336 = vst [vmem:[#allocation1 + $0x1] ss:$4 sm:$0xff] %v331_v10 }
  0x2f   : > { %v337_v11 = vld.sshfl [vmem:[#allocation1] sm:$0xff pattern:$0x73625140] }
  0x30   : > { %v339_v12 = vpack.c.bf16 %v337_v11, %v337_v11 }
  0x32   : > { %416 = vmatmul.bf16.vlgmr.msra.gmra.mxu0 %v339_v12 }
  0xaf   : > { %v417_v14 = vpop.f32.mrf.mxu0 }
  0xb0   : > { %v418_v15 = vadd.f32 %v557_v13, %v417_v14 }
  0xb2   : > { %vm421_vm0 = vcmp.gt.f32.partialorder %v418_v15, 0.0  ;;  %v422_v16 = vmul.f32 0.1, %v418_v15 }
  0xb4   : > { %v423_v17 = vsel %vm421_vm0, %v418_v15, %v422_v16 }
  0xb5   : > { %v425_v18 = vrot.slane %v423_v17, 2  ;;  %v427_v19 = vpack.c.bf16 %v423_v17, %v423_v17 }
  0xb7   : > { %v428_v20 = vpack.c.bf16 %v425_v18, %v425_v18  ;;  %429 = vst [vmem:[%s222_s28] sm:$0x1] %v427_v19  ;;  %v419_v21 = vpop.f32.mrf.mxu0 }
  0xb9   : > { %430 = vst [vmem:[%s222_s28 + $0x1] sm:$0x1] %v428_v20 }
  0xba PF: > { %s15_s18 = sadd.s32 1, %s564_s18  }
  0xbb   : > { %p12_p4 = scmp.ge.s32.totalorder %s15_s18, 4  }
  0xbd   :  { %14 = sbr.rel (!%p12_p4) target bundleno = 1 (0x1), region = 71 }

// kernel: style_network_forward.14
= control target key start
LH: loop header
LB: loop body
LE: loop exit
PB: predicated region body
PF: predicated region fallthrough
CT: control target
= control target key end

     0   :  { %s861_s1 = inlined_call_operand.vmem [shape: bf16[640,128], index: 1, kind: input, shape index: {}]   ;;  %s862_s2 = inlined_call_operand.vmem [shape: f32[1,128], index: 2, kind: input, shape index: {}]   ;;  %s863_s0 = inlined_call_operand.vmem [shape: bf16[16,640], index: 0, kind: input, shape index: {}]   ;;  %s864_s3 = inlined_call_operand.vmem [shape: bf16[16,128], index: 3, kind: output, shape index: {}]  }
   0x1   :  { %v646_v0 = vld [vmem:[%s861_s1 + $0x38] sm:$0xff]  ;;  %v645_v4 = vld [vmem:[%s861_s1 + $0x30] sm:$0xff]  ;;  %v644_v8 = vld [vmem:[%s861_s1 + $0x28] sm:$0xff] }
   0x2   :  { %v662_v1 = vld [vmem:[%s861_s1 + $0xb8] sm:$0xff]  ;;  %370 = vmatpush.bf16.msra.mxu0 %v646_v0  ;;  %v661_v5 = vld [vmem:[%s861_s1 + $0xb0] sm:$0xff]  ;;  %v660_v9 = vld [vmem:[%s861_s1 + $0xa8] sm:$0xff] }
   0x3   :  { %v670_v2 = vld [vmem:[%s861_s1 + $0xf8] sm:$0xff]  ;;  %398 = vmatpush.bf16.msra.mxu2 %v662_v1  ;;  %v669_v6 = vld [vmem:[%s861_s1 + $0xf0] sm:$0xff]  ;;  %v668_v10 = vld [vmem:[%s861_s1 + $0xe8] sm:$0xff] }
   0x4   :  { %v654_v3 = vld [vmem:[%s861_s1 + $0x78] sm:$0xff]  ;;  %412 = vmatpush.bf16.msra.mxu3 %v670_v2  ;;  %v653_v7 = vld [vmem:[%s861_s1 + $0x70] sm:$0xff]  ;;  %v652_v11 = vld [vmem:[%s861_s1 + $0x68] sm:$0xff] }
   0x5   :  { %384 = vmatpush.bf16.msra.mxu1 %v654_v3  ;;  %v643_v12 = vld [vmem:[%s861_s1 + $0x20] sm:$0xff]  ;;  %v642_v16 = vld [vmem:[%s861_s1 + $0x18] sm:$0xff]  ;;  %v641_v20 = vld [vmem:[%s861_s1 + $0x10] sm:$0xff] }
   0x6   :  { %371 = vmatpush.bf16.msra.mxu0 %v645_v4  ;;  %v659_v13 = vld [vmem:[%s861_s1 + $0xa0] sm:$0xff]  ;;  %v658_v17 = vld [vmem:[%s861_s1 + $0x98] sm:$0xff]  ;;  %v657_v21 = vld [vmem:[%s861_s1 + $0x90] sm:$0xff] }
   0x7   :  { %399 = vmatpush.bf16.msra.mxu2 %v661_v5  ;;  %v667_v14 = vld [vmem:[%s861_s1 + $0xe0] sm:$0xff]  ;;  %v666_v18 = vld [vmem:[%s861_s1 + $0xd8] sm:$0xff]  ;;  %v665_v22 = vld [vmem:[%s861_s1 + $0xd0] sm:$0xff] }
   0x8   :  { %413 = vmatpush.bf16.msra.mxu3 %v669_v6  ;;  %v651_v15 = vld [vmem:[%s861_s1 + $0x60] sm:$0xff]  ;;  %v650_v19 = vld [vmem:[%s861_s1 + $0x58] sm:$0xff]  ;;  %v649_v23 = vld [vmem:[%s861_s1 + $0x50] sm:$0xff] }
   0x9   :  { %385 = vmatpush.bf16.msra.mxu1 %v653_v7  ;;  %v640_v24 = vld [vmem:[%s861_s1 + $0x8] sm:$0xff]  ;;  %v639_v28 = vld [vmem:[%s861_s1] sm:$0xff]  ;;  %v678_v29 = vld [vmem:[%s861_s1 + $0x138] sm:$0xff] }
   0xa   :  { %372 = vmatpush.bf16.msra.mxu0 %v644_v8  ;;  %v656_v25 = vld [vmem:[%s861_s1 + $0x88] sm:$0xff]  ;;  %v655_v30 = vld [vmem:[%s861_s1 + $0x80] sm:$0xff]  ;;  %v637_v32 = vld [vmem:[%s863_s0 + $0x18] sm:$0xf0] }
   0xb   :  { %400 = vmatpush.bf16.msra.mxu2 %v660_v9  ;;  %v664_v26 = vld [vmem:[%s861_s1 + $0xc8] sm:$0xff]  ;;  %v456_v33 = vld [vmem:[%s863_s0] sm:$0xf]  ;;  %v636_v34 = vld [vmem:[%s863_s0 + $0x10] sm:$0xf0] }
   0xc   :  { %414 = vmatpush.bf16.msra.mxu3 %v668_v10  ;;  %v648_v27 = vld [vmem:[%s861_s1 + $0x48] sm:$0xff]  ;;  %v663_v35 = vld [vmem:[%s861_s1 + $0xc0] sm:$0xff]  ;;  %v458_v40 = vld [vmem:[%s863_s0 + $0x14] sm:$0xf0]  ;;  %v457_v42 = vor.u32 %v636_v34, %v456_v33 }
   0xd   :  { %386 = vmatpush.bf16.msra.mxu1 %v652_v11  ;;  %v464_v31 = vld [vmem:[%s863_s0 + $0x8] sm:$0xf]  ;;  %v635_v36 = vld [vmem:[%s863_s0 + $0xc] sm:$0xf]  ;;  %v466_v37 = vld [vmem:[%s863_s0 + $0x1c] sm:$0xf0] }
   0xe   :  { %373 = vmatpush.bf16.msra.mxu0 %v643_v12  ;;  %v647_v38 = vld [vmem:[%s861_s1 + $0x40] sm:$0xff]  ;;  %v465_v41 = vor.u32 %v637_v32, %v464_v31  ;;  %v469_v43 = vor.u32 %v635_v36, %v466_v37  ;;  %v677_v44 = vld [vmem:[%s861_s1 + $0x130] sm:$0xff]  ;;  %v676_v46 = vld [vmem:[%s861_s1 + $0x128] sm:$0xff] }
   0xf   :  { %401 = vmatpush.bf16.msra.mxu2 %v659_v13  ;;  %v634_v39 = vld [vmem:[%s863_s0 + $0x4] sm:$0xf]  ;;  %v674_v48 = vld [vmem:[%s861_s1 + $0x118] sm:$0xff]  ;;  %v673_v49 = vld [vmem:[%s861_s1 + $0x110] sm:$0xff] }
  0x10   :  { %415 = vmatpush.bf16.msra.mxu3 %v667_v14  ;;  %v461_v45 = vor.u32 %v634_v39, %v458_v40  ;;  %v675_v47 = vld [vmem:[%s861_s1 + $0x120] sm:$0xff]  ;;  %v672_v50 = vld [vmem:[%s861_s1 + $0x108] sm:$0xff]  ;;  %v472_v52 = vld [vmem:[%s863_s0 + $0x10] sm:$0xf] }
  0x11   :  { %387 = vmatpush.bf16.msra.mxu1 %v651_v15  ;;  %v671_v51 = vld [vmem:[%s861_s1 + $0x100] sm:$0xff] }
  0x12   :  { %374 = vmatpush.bf16.msra.mxu0 %v642_v16  ;;  %v638_v53 = vld [vmem:[%s863_s0 + $0x20] sm:$0xf0]  ;;  %v684_v57 = vld [vmem:[%s862_s2] ss:$0 sm:$0xff] }
  0x13   :  { %402 = vmatpush.bf16.msra.mxu2 %v658_v17  ;;  %v473_v54 = vor.u32 %v638_v53, %v472_v52 }
  0x14   :  { %416 = vmatpush.bf16.msra.mxu3 %v666_v18 }
  0x15   :  { %388 = vmatpush.bf16.msra.mxu1 %v650_v19 }
  0x16   :  { %375 = vmatpush.bf16.msra.mxu0 %v641_v20 }
  0x17   :  { %403 = vmatpush.bf16.msra.mxu2 %v657_v21 }
  0x18   :  { %417 = vmatpush.bf16.msra.mxu3 %v665_v22 }
  0x19   :  { %389 = vmatpush.bf16.msra.mxu1 %v649_v23 }
  0x1a   :  { %376 = vmatpush.bf16.msra.mxu0 %v640_v24 }
  0x1b   :  { %404 = vmatpush.bf16.msra.mxu2 %v656_v25 }
  0x1c   :  { %418 = vmatpush.bf16.msra.mxu3 %v664_v26 }
  0x1d   :  { %390 = vmatpush.bf16.msra.mxu1 %v648_v27 }
  0x1e   :  { %377 = vmatpush.bf16.msra.mxu0 %v639_v28 }
  0x1f   :  { %405 = vmatpush.bf16.msra.mxu2 %v655_v30 }
  0x20   :  { %419 = vmatpush.bf16.msra.mxu3 %v663_v35 }
  0x21   :  { %391 = vmatpush.bf16.msra.mxu1 %v647_v38  ;;  %378 = vmatmul.bf16.vlgmr.msra.gmra.mxu0 %v457_v42 }
  0x22   :  { %426 = vmatpush.bf16.msrb.mxu0 %v678_v29  ;;  %406 = vmatmul.bf16.vlgmr.msra.gmra.mxu2 %v465_v41 }
  0x23   :  { %420 = vmatmul.bf16.vlgmr.msra.gmra.mxu3 %v469_v43 }
  0x24   :  { %392 = vmatmul.bf16.vlgmr.msra.gmra.mxu1 %v461_v45 }
  0x26   :  { %427 = vmatpush.bf16.msrb.mxu0 %v677_v44 }
  0x2a   :  { %428 = vmatpush.bf16.msrb.mxu0 %v676_v46 }
  0x2e   :  { %429 = vmatpush.bf16.msrb.mxu0 %v675_v47 }
  0x32   :  { %430 = vmatpush.bf16.msrb.mxu0 %v674_v48 }
  0x36   :  { %431 = vmatpush.bf16.msrb.mxu0 %v673_v49 }
  0x3a   :  { %432 = vmatpush.bf16.msrb.mxu0 %v672_v50 }
  0x3e   :  { %433 = vmatpush.bf16.msrb.mxu0 %v671_v51 }
  0x41   :  { %434 = vmatmul.bf16.vlgmr.msrb.gmra.mxu0 %v473_v54 }
  0x9e   :  { %v379_v55 = vpop.f32.mrf.mxu0 }
  0x9f   :  { %v380_v59 = vadd.f32 %v684_v57, %v379_v55 }
  0xa1   :  { %v393_v56 = vpop.f32.mrf.mxu1 }
  0xa2   :  { %v394_v62 = vadd.f32 %v393_v56, %v380_v59 }
  0xa5   :  { %v407_v58 = vpop.f32.mrf.mxu2 }
  0xa6   :  { %v381_v60 = vpop.f32.mrf.mxu0  ;;  %v421_v61 = vpop.f32.mrf.mxu3  ;;  %v408_v1 = vadd.f32 %v407_v58, %v394_v62 }
  0xa7   :  { %v382_v63 = vadd.f32 %v684_v57, %v381_v60 }
  0xa8   :  { %v422_v5 = vadd.f32 %v421_v61, %v408_v1 }
  0xa9   :  { %v395_v0 = vpop.f32.mrf.mxu1 }
  0xaa   :  { %v396_v2 = vadd.f32 %v395_v0, %v382_v63 }
  0xad   :  { %v409_v3 = vpop.f32.mrf.mxu2 }
  0xae   :  { %v410_v6 = vadd.f32 %v409_v3, %v396_v2  ;;  %v423_v7 = vpop.f32.mrf.mxu3 }
  0xb0   :  { %v424_v9 = vadd.f32 %v423_v7, %v410_v6 }
  0xbe   :  { %v435_v4 = vpop.f32.mrf.mxu0 }
  0xbf   :  { %v436_v8 = vadd.f32 %v435_v4, %v422_v5 }
  0xc1   :  { %v442_v11 = vmul.f32 0.1, %v436_v8  ;;  %vm440_vm0 = vcmp.gt.f32.partialorder %v436_v8, 0.0 }
  0xc3   :  { %v444_v14 = vsel %vm440_vm0, %v436_v8, %v442_v11 }
  0xc6   :  { %v437_v10 = vpop.f32.mrf.mxu0 }
  0xc7   :  { %v438_v12 = vadd.f32 %v437_v10, %v424_v9 }
  0xc9   :  { %vm441_vm1 = vcmp.gt.f32.partialorder %v438_v12, 0.0  ;;  %v443_v13 = vmul.f32 0.1, %v438_v12 }
  0xcb   :  { %v445_v15 = vsel %vm441_vm1, %v438_v12, %v443_v13 }
  0xcc   :  { %v682_v16 = vpack.c.bf16 %v445_v15, %v444_v14 }
  0xce   :  { %683 = vst [vmem:[%s864_s3] sm:$0xff] %v682_v16  }

// kernel: style_network_forward.16
= control target key start
LH: loop header
LB: loop body
LE: loop exit
PB: predicated region body
PF: predicated region fallthrough
CT: control target
= control target key end

     0   :  { %s629_s18 = smov 0   ;;  %s727_s0 = inlined_call_operand.vmem [shape: bf16[2,6,6,64], index: 0, kind: input, shape index: {}]   ;;  %s728_s1 = inlined_call_operand.vmem [shape: f32[9,64], index: 1, kind: input, shape index: {}]   ;;  %s729_s2 = inlined_call_operand.vmem [shape: f32[1,64], index: 2, kind: input, shape index: {}]   ;;  %s730_s3 = inlined_call_operand.vmem [shape: bf16[64,64], index: 3, kind: input, shape index: {}]   ;;  %s731_s4 = inlined_call_operand.vmem [shape: f32[1,64], index: 4, kind: input, shape index: {}]   ;;  %s732_s5 = inlined_call_operand.vmem [shape: bf16[2,4,4,64], index: 5, kind: output, shape index: {}]  }
   0x1 LB: > { %s547_s19 = sadd.s32 4294967295, %s597_s18   ;;  %p551_p0 = scmp.ge.s32.totalorder %s597_s18, 1  ;;  %s597_s18 = sphi %s629_s18, %s15_s18  }
   0x2   : > { %p187_p1 = scmp.lt.s32.totalorder %s597_s18, 3 }
   0x4   : > { %p188_p2 = pnand %p551_p0, %p187_p1 }
   0x5   : > { %p215_p3 = scmp.lt.s32.totalorder (!%p188_p2), %s547_s19, 1 }
   0x6   : > { %191 = sbr.rel (%p188_p2) target bundleno = 201 (0xc9), region = 40 }
   0xb   : > { %v578_v0 = vld [vmem:[%s730_s3 + $0x18] sm:$0xff]  ;;  %v577_v1 = vld [vmem:[%s730_s3 + $0x10] sm:$0xff]  ;;  %s734_s19 = smov (!%p215_p3, %s547_s19), 1  ;;  %v232_v2 = vld [vmem:[%s728_s1] sm:$0xff]  ;;  %vm453_vm0 = vcmask 523264   ;;  %vm487_vm2 = vcmask 517120  }
   0xc   : > { %461 = vmatpush.bf16.msra.mxu0 %v578_v0  ;;  %s579_s26 = smul.u32 24, %s734_s19  ;;  %v238_v3 = vperm.slane %v232_v2, 0  ;;  %v247_v4 = vperm.slane %v232_v2, 1  ;;  %v268_v5 = vperm.slane %v232_v2, 2  ;;  %v576_v6 = vld [vmem:[%s730_s3 + $0x8] sm:$0xff]  ;;  %v290_v7 = vperm.slane %v232_v2, 3 }
   0xd   : > { %v299_v8 = vperm.slane %v232_v2, 4  ;;  %v655_v9 = vperm.slane %v232_v2, 5  ;;  %v657_v10 = vperm.slane %v232_v2, 6  ;;  %v667_v23 = vperm.slane %v232_v2, 7  ;;  %v575_v24 = vld [vmem:[%s730_s3] sm:$0xff]  ;;  %s574_s15 = sshll.u32 %s734_s19, 3 }
   0xe   : > { %s219_s6 = scalar_lea.vmem %s727_s0, %s579_s26  ;;  %s224_s20 = scalar_lea.vmem %s732_s5, %s574_s15 }
   0xf   : > { %v226_v11 = vld [vmem:[%s219_s6] sm:$0x7]  ;;  %v227_v12 = vld [vmem:[%s219_s6 + $0x4] sm:$0x7]  ;;  %v228_v13 = vld [vmem:[%s219_s6 + $0x8] sm:$0x7] }
  0x10   : > { %462 = vmatpush.bf16.msra.mxu0 %v577_v1  ;;  %v229_v14 = vld [vmem:[%s219_s6 + $0xc] sm:$0x7]  ;;  %v230_v15 = vld [vmem:[%s219_s6 + $0x10] sm:$0x7]  ;;  %v231_v16 = vld [vmem:[%s219_s6 + $0x14] sm:$0x7]  ;;  %v234_v17 = vunpack.c.l.bf16 %v226_v11  ;;  %v235_v18 = vunpack.c.l.bf16 %v227_v12  ;;  %v659_v19 = vunpack.c.l.bf16 %v228_v13 }
  0x11   : > { %v661_v20 = vunpack.c.l.bf16 %v229_v14  ;;  %v663_v21 = vunpack.c.l.bf16 %v230_v15  ;;  %v665_v22 = vunpack.c.l.bf16 %v231_v16 }
  0x12   : > { %v239_v25 = vmul.f32 %v238_v3, %v234_v17  ;;  %v240_v26 = vmul.f32 %v238_v3, %v235_v18  ;;  %v241_v27 = vmul.f32 %v238_v3, %v659_v19  ;;  %v248_v28 = vmul.f32 %v247_v4, %v234_v17 }
  0x13   : > { %v242_v29 = vmul.f32 %v238_v3, %v661_v20  ;;  %v249_v30 = vmul.f32 %v247_v4, %v235_v18  ;;  %v250_v31 = vmul.f32 %v247_v4, %v659_v19  ;;  %v251_v32 = vmul.f32 %v247_v4, %v661_v20 }
  0x14   : > { %463 = vmatpush.bf16.msra.mxu0 %v576_v6  ;;  %v256_v33 = vrot.slane %v248_v28, 1  ;;  %v269_v34 = vmul.f32 %v268_v5, %v234_v17  ;;  %v270_v35 = vmul.f32 %v268_v5, %v235_v18  ;;  %v271_v36 = vmul.f32 %v268_v5, %v659_v19 }
  0x15   : > { %v257_v37 = vrot.slane %v249_v30, 1  ;;  %v258_v38 = vrot.slane %v250_v31, 1  ;;  %v259_v39 = vrot.slane %v251_v32, 1  ;;  %v272_v40 = vmul.f32 %v268_v5, %v661_v20 }
  0x16   : > { %v264_v41 = vadd.f32 %v256_v33, %v239_v25  ;;  %v277_v42 = vrot.slane %v269_v34, 2  ;;  %v278_v43 = vrot.slane %v270_v35, 2  ;;  %v279_v44 = vrot.slane %v271_v36, 2 }
  0x17   : > { %v265_v45 = vadd.f32 %v257_v37, %v240_v26  ;;  %v266_v46 = vadd.f32 %v258_v38, %v241_v27  ;;  %v267_v47 = vadd.f32 %v259_v39, %v242_v29  ;;  %v280_v48 = vrot.slane %v272_v40, 2 }
  0x18   : > { %464 = vmatpush.bf16.msra.mxu0 %v575_v24  ;;  %v285_v49 = vadd.f32 %v277_v42, %v264_v41  ;;  %v291_v50 = vmul.f32 %v290_v7, %v235_v18  ;;  %v292_v51 = vmul.f32 %v290_v7, %v659_v19  ;;  %v293_v52 = vmul.f32 %v290_v7, %v661_v20 }
  0x19   : > { %v286_v53 = vadd.f32 %v278_v43, %v265_v45  ;;  %v287_v54 = vadd.f32 %v279_v44, %v266_v46  ;;  %v288_v55 = vadd.f32 %v280_v48, %v267_v47  ;;  %v294_v56 = vmul.f32 %v290_v7, %v663_v21 }
  0x1a   : > { %v295_v57 = vadd.f32 %v291_v50, %v285_v49  ;;  %v300_v58 = vmul.f32 %v299_v8, %v235_v18  ;;  %v301_v59 = vmul.f32 %v299_v8, %v659_v19  ;;  %v302_v60 = vmul.f32 %v299_v8, %v661_v20 }
  0x1b   : > { %v296_v61 = vadd.f32 %v292_v51, %v286_v53  ;;  %v297_v62 = vadd.f32 %v293_v52, %v287_v54  ;;  %v298_v63 = vadd.f32 %v294_v56, %v288_v55  ;;  %v303_v0 = vmul.f32 %v299_v8, %v663_v21 }
  0x1c   : > { %v308_v1 = vrot.slane %v300_v58, 1  ;;  %v309_v2 = vrot.slane %v301_v59, 1  ;;  %v310_v3 = vrot.slane %v302_v60, 1  ;;  %v321_v4 = vmul.f32 %v655_v9, %v235_v18 }
  0x1d   : > { %v311_v5 = vrot.slane %v303_v0, 1  ;;  %v322_v6 = vmul.f32 %v655_v9, %v659_v19  ;;  %v323_v7 = vmul.f32 %v655_v9, %v661_v20  ;;  %v324_v11 = vmul.f32 %v655_v9, %v663_v21  ;;  %v588_v9 = vld [vmem:[%s728_s1 + $0x8] ss:$0 sm:$0xff] }
  0x1e   : > { %v316_v12 = vadd.f32 %v308_v1, %v295_v57  ;;  %v317_v13 = vadd.f32 %v309_v2, %v296_v61  ;;  %v318_v14 = vadd.f32 %v310_v3, %v297_v62  ;;  %v329_v15 = vrot.slane %v321_v4, 2  ;;  %v590_v62 = vld [vmem:[%s731_s4] ss:$0 sm:$0xff] }
  0x1f   : > { %v319_v8 = vadd.f32 %v311_v5, %v298_v63  ;;  %v330_v16 = vrot.slane %v322_v6, 2  ;;  %v331_v17 = vrot.slane %v323_v7, 2  ;;  %v332_v24 = vrot.slane %v324_v11, 2 }
  0x20   : > { %v337_v25 = vadd.f32 %v329_v15, %v316_v12  ;;  %v343_v18 = vmul.f32 %v657_v10, %v659_v19  ;;  %v344_v26 = vmul.f32 %v657_v10, %v661_v20  ;;  %v345_v27 = vmul.f32 %v657_v10, %v663_v21 }
  0x21   : > { %v338_v28 = vadd.f32 %v330_v16, %v317_v13  ;;  %v339_v29 = vadd.f32 %v331_v17, %v318_v14  ;;  %v340_v30 = vadd.f32 %v332_v24, %v319_v8  ;;  %v346_v31 = vmul.f32 %v657_v10, %v665_v22 }
  0x22   : > { %v347_v32 = vadd.f32 %v343_v18, %v337_v25  ;;  %v352_v33 = vmul.f32 %v667_v23, %v659_v19  ;;  %v353_v34 = vmul.f32 %v667_v23, %v661_v20  ;;  %v354_v35 = vmul.f32 %v667_v23, %v663_v21 }
  0x23   : > { %v348_v36 = vadd.f32 %v344_v26, %v338_v28  ;;  %v349_v37 = vadd.f32 %v345_v27, %v339_v29  ;;  %v350_v38 = vadd.f32 %v346_v31, %v340_v30  ;;  %v355_v39 = vmul.f32 %v667_v23, %v665_v22  ;;  %v589_v23 = vld [vmem:[%s729_s2] ss:$0 sm:$0xff] }
  0x24   : > { %v360_v40 = vrot.slane %v352_v33, 1  ;;  %v361_v41 = vrot.slane %v353_v34, 1  ;;  %v362_v42 = vrot.slane %v354_v35, 1  ;;  %v373_v10 = vmul.f32 %v588_v9, %v659_v19 }
  0x25   : > { %v363_v43 = vrot.slane %v355_v39, 1  ;;  %v374_v44 = vmul.f32 %v588_v9, %v661_v20  ;;  %v375_v45 = vmul.f32 %v588_v9, %v663_v21  ;;  %v376_v46 = vmul.f32 %v588_v9, %v665_v22 }
  0x26   : > { %v368_v47 = vadd.f32 %v360_v40, %v347_v32  ;;  %v369_v48 = vadd.f32 %v361_v41, %v348_v36  ;;  %v370_v49 = vadd.f32 %v362_v42, %v349_v37  ;;  %v381_v50 = vrot.slane %v373_v10, 2 }
  0x27   : > { %v371_v51 = vadd.f32 %v363_v43, %v350_v38  ;;  %v382_v52 = vrot.slane %v374_v44, 2  ;;  %v383_v53 = vrot.slane %v375_v45, 2  ;;  %v384_v54 = vrot.slane %v376_v46, 2 }
  0x28   : > { %v389_v19 = vadd.f32 %v381_v50, %v368_v47 }
  0x29   : > { %v390_v55 = vadd.f32 %v382_v52, %v369_v48  ;;  %v391_v56 = vadd.f32 %v383_v53, %v370_v49  ;;  %v392_v20 = vadd.f32 %v384_v54, %v371_v51 }
  0x2a   : > { %v397_v57 = vadd.f32 %v589_v23, %v389_v19 }
  0x2b   : > { %v398_v21 = vadd.f32 %v589_v23, %v390_v55  ;;  %v399_v22 = vadd.f32 %v589_v23, %v391_v56  ;;  %v400_v58 = vadd.f32 %v589_v23, %v392_v20 }
  0x2c   : > { %405 = vst [vmem:[#allocation1] ss:$2 sm:$0xff] %v397_v57 }
  0x2d   : > { %407 = vst [vmem:[#allocation1 + $0x1] ss:$2 sm:$0xff] %v398_v21 }
  0x2e   : > { %409 = vst [vmem:[#allocation1 + $0x10] ss:$2 sm:$0xff] %v399_v22 }
  0x2f   : > { %411 = vst [vmem:[#allocation1 + $0x11] ss:$2 sm:$0xff] %v400_v58 }
  0x34   : > { %v412_v59 = vld.sshfl [vmem:[#allocation1] sm:$0xff pattern:$0x75316420] }
  0x36   : > { %v413_v60 = vld.sshfl [vmem:[#allocation1 + $0x10] sm:$0xff pattern:$0x75316420] }
  0x37   : > { %v416_v61 = vpack.c.bf16 %v413_v60, %v412_v59 }
  0x39   : > { %571 = vmatmul.msk.bf16.vlgmr.msra.gmra.mxu0 %vm453_vm0, %v416_v61 }
  0xb6   : > { %v466_v63 = vpop.f32.mrf.mxu0 }
  0xb7   : > { %v467_v0 = vadd.f32 %v590_v62, %v466_v63 }
  0xb9   : > { %vm471_vm1 = vcmp.gt.f32.partialorder %v467_v0, 0.0  ;;  %v473_v1 = vmul.f32 0.1, %v467_v0 }
  0xbb   : > { %v475_v2 = vsel %vm471_vm1, %v467_v0, %v473_v1 }
  0xbc   : > { %v479_v3 = vrot.slane %v475_v2, 4  ;;  %v483_v4 = vpack.c.bf16 %v475_v2, %v475_v2 }
  0xbe   : > { %v484_v5 = vpack.c.bf16 %v479_v3, %v479_v3  ;;  %488 = vst.msk [vmem:[%s224_s20] sm:$0x3] %vm487_vm2, %v483_v4  ;;  %v468_v6 = vpop.f32.mrf.mxu0 }
  0xbf   : > { %v469_v7 = vadd.f32 %v590_v62, %v468_v6 }
  0xc0   : > { %489 = vst.msk [vmem:[%s224_s20 + $0x2] sm:$0x3] %vm487_vm2, %v484_v5 }
  0xc1   : > { %vm472_vm3 = vcmp.gt.f32.partialorder %v469_v7, 0.0  ;;  %v474_v11 = vmul.f32 0.1, %v469_v7 }
  0xc3   : > { %v476_v12 = vsel %vm472_vm3, %v469_v7, %v474_v11 }
  0xc4   : > { %v480_v13 = vrot.slane %v476_v12, 4  ;;  %v485_v14 = vpack.c.bf16 %v476_v12, %v476_v12 }
  0xc6   : > { %v486_v15 = vpack.c.bf16 %v480_v13, %v480_v13  ;;  %490 = vst.msk [vmem:[%s224_s20 + $0x4] sm:$0x3] %vm487_vm2, %v485_v14 }
  0xc8   : > { %491 = vst.msk [vmem:[%s224_s20 + $0x6] sm:$0x3] %vm487_vm2, %v486_v15 }
  0xc9 PF: > { %s15_s18 = sadd.s32 1, %s597_s18  }
  0xca   : > { %p12_p4 = scmp.ge.s32.totalorder %s15_s18, 4  }
  0xcc   :  { %14 = sbr.rel (!%p12_p4) target bundleno = 1 (0x1), region = 73 }

// kernel: style_network_forward.18
= control target key start
LH: loop header
LB: loop body
LE: loop exit
PB: predicated region body
PF: predicated region fallthrough
CT: control target
= control target key end

     0   :  { %s2637_s1 = inlined_call_operand.vmem [shape: bf16[1024,256], index: 1, kind: input, shape index: {}]   ;;  %s2638_s0 = inlined_call_operand.vmem [shape: bf16[16,1024], index: 0, kind: input, shape index: {}]   ;;  %s2639_s2 = inlined_call_operand.vmem [shape: f32[1,256], index: 2, kind: input, shape index: {}]   ;;  %s2640_s3 = inlined_call_operand.vmem [shape: bf16[16,256], index: 3, kind: output, shape index: {}]  }
   0x1   :  { %v1170_v0 = vld [vmem:[%s2637_s1 + $0x70] sm:$0xf]  ;;  %v1647_v1 = vld [vmem:[%s2637_s1 + $0x74] sm:$0xf0]  ;;  %v1162_v11 = vld [vmem:[%s2637_s1 + $0x60] sm:$0xf] }
   0x2   :  { %v1234_v2 = vld [vmem:[%s2637_s1 + $0xf0] sm:$0xf]  ;;  %v1171_v3 = vor.u32 %v1647_v1, %v1170_v0  ;;  %v1663_v4 = vld [vmem:[%s2637_s1 + $0xf4] sm:$0xf0]  ;;  %v1645_v13 = vld [vmem:[%s2637_s1 + $0x64] sm:$0xf0] }
   0x3   :  { %v1298_v5 = vld [vmem:[%s2637_s1 + $0x170] sm:$0xf]  ;;  %v1679_v6 = vld [vmem:[%s2637_s1 + $0x174] sm:$0xf0]  ;;  %v1235_v7 = vor.u32 %v1663_v4, %v1234_v2  ;;  %v1226_v14 = vld [vmem:[%s2637_s1 + $0xe0] sm:$0xf]  ;;  %v1163_v16 = vor.u32 %v1645_v13, %v1162_v11 }
   0x4   :  { %v1299_v8 = vor.u32 %v1679_v6, %v1298_v5  ;;  %v1362_v9 = vld [vmem:[%s2637_s1 + $0x1f0] sm:$0xf]  ;;  %v1695_v10 = vld [vmem:[%s2637_s1 + $0x1f4] sm:$0xf0]  ;;  %836 = vmatpush.bf16.msra.mxu0 %v1171_v3  ;;  %v1661_v15 = vld [vmem:[%s2637_s1 + $0xe4] sm:$0xf0] }
   0x5   :  { %v1363_v12 = vor.u32 %v1695_v10, %v1362_v9  ;;  %850 = vmatpush.bf16.msra.mxu1 %v1235_v7  ;;  %v1227_v17 = vor.u32 %v1661_v15, %v1226_v14  ;;  %v1290_v18 = vld [vmem:[%s2637_s1 + $0x160] sm:$0xf]  ;;  %v1677_v19 = vld [vmem:[%s2637_s1 + $0x164] sm:$0xf0]  ;;  %v1154_v23 = vld [vmem:[%s2637_s1 + $0x50] sm:$0xf] }
   0x6   :  { %864 = vmatpush.bf16.msra.mxu2 %v1299_v8  ;;  %v1354_v20 = vld [vmem:[%s2637_s1 + $0x1e0] sm:$0xf]  ;;  %v1291_v21 = vor.u32 %v1677_v19, %v1290_v18  ;;  %v1693_v22 = vld [vmem:[%s2637_s1 + $0x1e4] sm:$0xf0]  ;;  %v1643_v24 = vld [vmem:[%s2637_s1 + $0x54] sm:$0xf0] }
   0x7   :  { %878 = vmatpush.bf16.msra.mxu3 %v1363_v12  ;;  %v1355_v25 = vor.u32 %v1693_v22, %v1354_v20  ;;  %v1218_v26 = vld [vmem:[%s2637_s1 + $0xd0] sm:$0xf]  ;;  %v1659_v27 = vld [vmem:[%s2637_s1 + $0xd4] sm:$0xf0]  ;;  %v1155_v29 = vor.u32 %v1643_v24, %v1154_v23  ;;  %v1146_v35 = vld [vmem:[%s2637_s1 + $0x40] sm:$0xf] }
   0x8   :  { %v1282_v28 = vld [vmem:[%s2637_s1 + $0x150] sm:$0xf]  ;;  %837 = vmatpush.bf16.msra.mxu0 %v1163_v16  ;;  %v1675_v30 = vld [vmem:[%s2637_s1 + $0x154] sm:$0xf0]  ;;  %v1219_v33 = vor.u32 %v1659_v27, %v1218_v26  ;;  %v1641_v36 = vld [vmem:[%s2637_s1 + $0x44] sm:$0xf0] }
   0x9   :  { %v1346_v31 = vld [vmem:[%s2637_s1 + $0x1d0] sm:$0xf]  ;;  %v1691_v32 = vld [vmem:[%s2637_s1 + $0x1d4] sm:$0xf0]  ;;  %851 = vmatpush.bf16.msra.mxu1 %v1227_v17  ;;  %v1283_v34 = vor.u32 %v1675_v30, %v1282_v28  ;;  %v1210_v37 = vld [vmem:[%s2637_s1 + $0xc0] sm:$0xf]  ;;  %v1147_v44 = vor.u32 %v1641_v36, %v1146_v35 }
   0xa   :  { %865 = vmatpush.bf16.msra.mxu2 %v1291_v21  ;;  %v1347_v38 = vor.u32 %v1691_v32, %v1346_v31  ;;  %v1657_v39 = vld [vmem:[%s2637_s1 + $0xc4] sm:$0xf0]  ;;  %v1274_v40 = vld [vmem:[%s2637_s1 + $0x140] sm:$0xf]  ;;  %v1138_v47 = vld [vmem:[%s2637_s1 + $0x30] sm:$0xf] }
   0xb   :  { %879 = vmatpush.bf16.msra.mxu3 %v1355_v25  ;;  %v1673_v41 = vld [vmem:[%s2637_s1 + $0x144] sm:$0xf0]  ;;  %v1338_v42 = vld [vmem:[%s2637_s1 + $0x1c0] sm:$0xf]  ;;  %v1211_v45 = vor.u32 %v1657_v39, %v1210_v37  ;;  %v1639_v48 = vld [vmem:[%s2637_s1 + $0x34] sm:$0xf0] }
   0xc   :  { %v1689_v43 = vld [vmem:[%s2637_s1 + $0x1c4] sm:$0xf0]  ;;  %838 = vmatpush.bf16.msra.mxu0 %v1155_v29  ;;  %v1275_v46 = vor.u32 %v1673_v41, %v1274_v40  ;;  %v1202_v49 = vld [vmem:[%s2637_s1 + $0xb0] sm:$0xf]  ;;  %v1655_v51 = vld [vmem:[%s2637_s1 + $0xb4] sm:$0xf0]  ;;  %v1139_v56 = vor.u32 %v1639_v48, %v1138_v47 }
   0xd   :  { %852 = vmatpush.bf16.msra.mxu1 %v1219_v33  ;;  %v1339_v50 = vor.u32 %v1689_v43, %v1338_v42  ;;  %v1266_v52 = vld [vmem:[%s2637_s1 + $0x130] sm:$0xf]  ;;  %v1671_v53 = vld [vmem:[%s2637_s1 + $0x134] sm:$0xf0]  ;;  %v1203_v57 = vor.u32 %v1655_v51, %v1202_v49  ;;  %v1130_v59 = vld [vmem:[%s2637_s1 + $0x20] sm:$0xf] }
   0xe   :  { %866 = vmatpush.bf16.msra.mxu2 %v1283_v34  ;;  %v1330_v54 = vld [vmem:[%s2637_s1 + $0x1b0] sm:$0xf]  ;;  %v1687_v55 = vld [vmem:[%s2637_s1 + $0x1b4] sm:$0xf0]  ;;  %v1267_v58 = vor.u32 %v1671_v53, %v1266_v52  ;;  %v1637_v60 = vld [vmem:[%s2637_s1 + $0x24] sm:$0xf0] }
   0xf   :  { %880 = vmatpush.bf16.msra.mxu3 %v1347_v38  ;;  %v1194_v61 = vld [vmem:[%s2637_s1 + $0xa0] sm:$0xf]  ;;  %v1331_v62 = vor.u32 %v1687_v55, %v1330_v54  ;;  %v1653_v63 = vld [vmem:[%s2637_s1 + $0xa4] sm:$0xf0]  ;;  %v1131_v4 = vor.u32 %v1637_v60, %v1130_v59  ;;  %v1122_v7 = vld [vmem:[%s2637_s1 + $0x10] sm:$0xf] }
  0x10   :  { %839 = vmatpush.bf16.msra.mxu0 %v1147_v44  ;;  %v1258_v0 = vld [vmem:[%s2637_s1 + $0x120] sm:$0xf]  ;;  %v1669_v1 = vld [vmem:[%s2637_s1 + $0x124] sm:$0xf0]  ;;  %v1195_v5 = vor.u32 %v1653_v63, %v1194_v61  ;;  %v1635_v8 = vld [vmem:[%s2637_s1 + $0x14] sm:$0xf0] }
  0x11   :  { %853 = vmatpush.bf16.msra.mxu1 %v1211_v45  ;;  %v1322_v2 = vld [vmem:[%s2637_s1 + $0x1a0] sm:$0xf]  ;;  %v1685_v3 = vld [vmem:[%s2637_s1 + $0x1a4] sm:$0xf0]  ;;  %v1259_v6 = vor.u32 %v1669_v1, %v1258_v0  ;;  %v1186_v9 = vld [vmem:[%s2637_s1 + $0x90] sm:$0xf]  ;;  %v1123_v16 = vor.u32 %v1635_v8, %v1122_v7 }
  0x12   :  { %867 = vmatpush.bf16.msra.mxu2 %v1275_v46  ;;  %v1323_v10 = vor.u32 %v1685_v3, %v1322_v2  ;;  %v1651_v11 = vld [vmem:[%s2637_s1 + $0x94] sm:$0xf0]  ;;  %v1250_v12 = vld [vmem:[%s2637_s1 + $0x110] sm:$0xf]  ;;  %v1114_v17 = vld [vmem:[%s2637_s1] sm:$0xf] }
  0x13   :  { %881 = vmatpush.bf16.msra.mxu3 %v1339_v50  ;;  %v1667_v13 = vld [vmem:[%s2637_s1 + $0x114] sm:$0xf0]  ;;  %v1314_v14 = vld [vmem:[%s2637_s1 + $0x190] sm:$0xf]  ;;  %v1633_v18 = vld [vmem:[%s2637_s1 + $0x4] sm:$0xf0]  ;;  %v1187_v19 = vor.u32 %v1651_v11, %v1186_v9 }
  0x14   :  { %840 = vmatpush.bf16.msra.mxu0 %v1139_v56  ;;  %v1683_v15 = vld [vmem:[%s2637_s1 + $0x194] sm:$0xf0]  ;;  %v1251_v20 = vor.u32 %v1667_v13, %v1250_v12  ;;  %v1178_v21 = vld [vmem:[%s2637_s1 + $0x80] sm:$0xf]  ;;  %v1649_v22 = vld [vmem:[%s2637_s1 + $0x84] sm:$0xf0]  ;;  %v1115_v31 = vor.u32 %v1633_v18, %v1114_v17 }
  0x15   :  { %854 = vmatpush.bf16.msra.mxu1 %v1203_v57  ;;  %v1242_v23 = vld [vmem:[%s2637_s1 + $0x100] sm:$0xf]  ;;  %v1315_v24 = vor.u32 %v1683_v15, %v1314_v14  ;;  %v1665_v25 = vld [vmem:[%s2637_s1 + $0x104] sm:$0xf0]  ;;  %v1426_v28 = vld [vmem:[%s2637_s1 + $0x270] sm:$0xf]  ;;  %v1179_v35 = vor.u32 %v1649_v22, %v1178_v21 }
  0x16   :  { %868 = vmatpush.bf16.msra.mxu2 %v1267_v58  ;;  %v1306_v26 = vld [vmem:[%s2637_s1 + $0x180] sm:$0xf]  ;;  %v1681_v27 = vld [vmem:[%s2637_s1 + $0x184] sm:$0xf0]  ;;  %v1711_v29 = vld [vmem:[%s2637_s1 + $0x274] sm:$0xf0]  ;;  %v1243_v36 = vor.u32 %v1665_v25, %v1242_v23 }
  0x17   :  { %882 = vmatpush.bf16.msra.mxu3 %v1331_v62  ;;  %v1490_v30 = vld [vmem:[%s2637_s1 + $0x2f0] sm:$0xf]  ;;  %v1727_v32 = vld [vmem:[%s2637_s1 + $0x2f4] sm:$0xf0]  ;;  %v1307_v39 = vor.u32 %v1681_v27, %v1306_v26  ;;  %v1427_v40 = vor.u32 %v1711_v29, %v1426_v28  ;;  %v1418_v41 = vld [vmem:[%s2637_s1 + $0x260] sm:$0xf] }
  0x18   :  { %841 = vmatpush.bf16.msra.mxu0 %v1131_v4  ;;  %v1554_v33 = vld [vmem:[%s2637_s1 + $0x370] sm:$0xf]  ;;  %v1743_v34 = vld [vmem:[%s2637_s1 + $0x374] sm:$0xf0]  ;;  %v1709_v42 = vld [vmem:[%s2637_s1 + $0x264] sm:$0xf0]  ;;  %v1491_v43 = vor.u32 %v1727_v32, %v1490_v30 }
  0x19   :  { %855 = vmatpush.bf16.msra.mxu1 %v1195_v5  ;;  %v1618_v37 = vld [vmem:[%s2637_s1 + $0x3f0] sm:$0xf]  ;;  %v1759_v38 = vld [vmem:[%s2637_s1 + $0x3f4] sm:$0xf0]  ;;  %v1555_v44 = vor.u32 %v1743_v34, %v1554_v33  ;;  %v1482_v45 = vld [vmem:[%s2637_s1 + $0x2e0] sm:$0xf]  ;;  %v1419_v55 = vor.u32 %v1709_v42, %v1418_v41 }
  0x1a   :  { %869 = vmatpush.bf16.msra.mxu2 %v1259_v6  ;;  %v1725_v46 = vld [vmem:[%s2637_s1 + $0x2e4] sm:$0xf0]  ;;  %v1546_v47 = vld [vmem:[%s2637_s1 + $0x360] sm:$0xf]  ;;  %v1619_v48 = vor.u32 %v1759_v38, %v1618_v37  ;;  %v1410_v56 = vld [vmem:[%s2637_s1 + $0x250] sm:$0xf] }
  0x1b   :  { %883 = vmatpush.bf16.msra.mxu3 %v1323_v10  ;;  %v1741_v49 = vld [vmem:[%s2637_s1 + $0x364] sm:$0xf0]  ;;  %v1610_v50 = vld [vmem:[%s2637_s1 + $0x3e0] sm:$0xf]  ;;  %v1707_v57 = vld [vmem:[%s2637_s1 + $0x254] sm:$0xf0]  ;;  %v1483_v60 = vor.u32 %v1725_v46, %v1482_v45 }
  0x1c   :  { %842 = vmatpush.bf16.msra.mxu0 %v1123_v16  ;;  %v1757_v51 = vld [vmem:[%s2637_s1 + $0x3e4] sm:$0xf0]  ;;  %v1082_v52 = vld [vmem:[%s2638_s0] sm:$0xf]  ;;  %v1547_v61 = vor.u32 %v1741_v49, %v1546_v47  ;;  %v1474_v62 = vld [vmem:[%s2637_s1 + $0x2d0] sm:$0xf]  ;;  %v1411_v9 = vor.u32 %v1707_v57, %v1410_v56 }
  0x1d   :  { %856 = vmatpush.bf16.msra.mxu1 %v1187_v19  ;;  %v1628_v53 = vld [vmem:[%s2638_s0 + $0x1c] sm:$0xf0]  ;;  %v1090_v54 = vld [vmem:[%s2638_s0 + $0x8] sm:$0xf]  ;;  %v1723_v63 = vld [vmem:[%s2637_s1 + $0x2d4] sm:$0xf0]  ;;  %v1611_v2 = vor.u32 %v1757_v51, %v1610_v50 }
  0x1e   :  { %870 = vmatpush.bf16.msra.mxu2 %v1251_v20  ;;  %v2035_v58 = vor.u32 %v1628_v53, %v1082_v52  ;;  %v1629_v59 = vld [vmem:[%s2638_s0 + $0x24] sm:$0xf0]  ;;  %v1538_v0 = vld [vmem:[%s2637_s1 + $0x350] sm:$0xf]  ;;  %v1739_v3 = vld [vmem:[%s2637_s1 + $0x354] sm:$0xf0]  ;;  %v1475_v12 = vor.u32 %v1723_v63, %v1474_v62 }
  0x1f   :  { %884 = vmatpush.bf16.msra.mxu3 %v1315_v24  ;;  %v2049_v1 = vor.u32 %v1629_v59, %v1090_v54  ;;  %v1602_v4 = vld [vmem:[%s2637_s1 + $0x3d0] sm:$0xf]  ;;  %v1755_v5 = vld [vmem:[%s2637_s1 + $0x3d4] sm:$0xf0]  ;;  %v1624_v6 = vld [vmem:[%s2638_s0 + $0x4] sm:$0xf]  ;;  %v1539_v13 = vor.u32 %v1739_v3, %v1538_v0 }
  0x20   :  { %843 = vmatpush.bf16.msra.mxu0 %v1115_v31  ;;  %v1084_v7 = vld [vmem:[%s2638_s0 + $0x20] sm:$0xf0]  ;;  %v1625_v8 = vld [vmem:[%s2638_s0 + $0xc] sm:$0xf]  ;;  %v1402_v14 = vld [vmem:[%s2637_s1 + $0x240] sm:$0xf]  ;;  %v1603_v18 = vor.u32 %v1755_v5, %v1602_v4 }
  0x21   :  { %857 = vmatpush.bf16.msra.mxu1 %v1179_v35  ;;  %v2071_v10 = vor.u32 %v1624_v6, %v1084_v7  ;;  %v1092_v11 = vld [vmem:[%s2638_s0 + $0x28] sm:$0xf0]  ;;  %v1705_v15 = vld [vmem:[%s2637_s1 + $0x244] sm:$0xf0]  ;;  %v1466_v16 = vld [vmem:[%s2637_s1 + $0x2c0] sm:$0xf] }
  0x22   :  { %871 = vmatpush.bf16.msra.mxu2 %v1243_v36  ;;  %v2085_v17 = vor.u32 %v1625_v8, %v1092_v11  ;;  %v1721_v19 = vld [vmem:[%s2637_s1 + $0x2c4] sm:$0xf0]  ;;  %v1530_v20 = vld [vmem:[%s2637_s1 + $0x340] sm:$0xf]  ;;  %v1403_v24 = vor.u32 %v1705_v15, %v1402_v14  ;;  %v1394_v27 = vld [vmem:[%s2637_s1 + $0x230] sm:$0xf] }
  0x23   :  { %885 = vmatpush.bf16.msra.mxu3 %v1307_v39  ;;  %844 = vmatmul.bf16.vlgmr.msra.gmra.mxu0 %v2035_v58  ;;  %v1737_v21 = vld [vmem:[%s2637_s1 + $0x344] sm:$0xf0]  ;;  %v1594_v22 = vld [vmem:[%s2637_s1 + $0x3c0] sm:$0xf]  ;;  %v1467_v25 = vor.u32 %v1721_v19, %v1466_v16  ;;  %v1703_v28 = vld [vmem:[%s2637_s1 + $0x234] sm:$0xf0] }
  0x24   :  { %892 = vmatpush.bf16.msrb.mxu0 %v1427_v40  ;;  %858 = vmatmul.bf16.vlgmr.msra.gmra.mxu1 %v2071_v10  ;;  %v1753_v23 = vld [vmem:[%s2637_s1 + $0x3c4] sm:$0xf0]  ;;  %v1531_v26 = vor.u32 %v1737_v21, %v1530_v20  ;;  %v1458_v29 = vld [vmem:[%s2637_s1 + $0x2b0] sm:$0xf]  ;;  %v1719_v31 = vld [vmem:[%s2637_s1 + $0x2b4] sm:$0xf0]  ;;  %v1395_v36 = vor.u32 %v1703_v28, %v1394_v27 }
  0x25   :  { %906 = vmatpush.bf16.msrb.mxu1 %v1491_v43  ;;  %872 = vmatmul.bf16.vlgmr.msra.gmra.mxu2 %v2049_v1  ;;  %v1595_v30 = vor.u32 %v1753_v23, %v1594_v22  ;;  %v1522_v32 = vld [vmem:[%s2637_s1 + $0x330] sm:$0xf]  ;;  %v1735_v33 = vld [vmem:[%s2637_s1 + $0x334] sm:$0xf0]  ;;  %v1459_v37 = vor.u32 %v1719_v31, %v1458_v29  ;;  %v1386_v39 = vld [vmem:[%s2637_s1 + $0x220] sm:$0xf] }
  0x26   :  { %920 = vmatpush.bf16.msrb.mxu2 %v1555_v44  ;;  %886 = vmatmul.bf16.vlgmr.msra.gmra.mxu3 %v2085_v17  ;;  %v1586_v34 = vld [vmem:[%s2637_s1 + $0x3b0] sm:$0xf]  ;;  %v1751_v35 = vld [vmem:[%s2637_s1 + $0x3b4] sm:$0xf0]  ;;  %v1523_v38 = vor.u32 %v1735_v33, %v1522_v32  ;;  %v1701_v40 = vld [vmem:[%s2637_s1 + $0x224] sm:$0xf0] }
  0x27   :  { %934 = vmatpush.bf16.msrb.mxu3 %v1619_v48  ;;  %v1450_v41 = vld [vmem:[%s2637_s1 + $0x2a0] sm:$0xf]  ;;  %v1587_v42 = vor.u32 %v1751_v35, %v1586_v34  ;;  %v1717_v43 = vld [vmem:[%s2637_s1 + $0x2a4] sm:$0xf0]  ;;  %v1387_v48 = vor.u32 %v1701_v40, %v1386_v39  ;;  %v1378_v49 = vld [vmem:[%s2637_s1 + $0x210] sm:$0xf] }
  0x28   :  { %893 = vmatpush.bf16.msrb.mxu0 %v1419_v55  ;;  %v1514_v44 = vld [vmem:[%s2637_s1 + $0x320] sm:$0xf]  ;;  %v1733_v45 = vld [vmem:[%s2637_s1 + $0x324] sm:$0xf0]  ;;  %v1451_v50 = vor.u32 %v1717_v43, %v1450_v41  ;;  %v1699_v52 = vld [vmem:[%s2637_s1 + $0x214] sm:$0xf0] }
  0x29   :  { %907 = vmatpush.bf16.msrb.mxu1 %v1483_v60  ;;  %v1578_v46 = vld [vmem:[%s2637_s1 + $0x3a0] sm:$0xf]  ;;  %v1749_v47 = vld [vmem:[%s2637_s1 + $0x3a4] sm:$0xf0]  ;;  %v1515_v51 = vor.u32 %v1733_v45, %v1514_v44  ;;  %v1442_v53 = vld [vmem:[%s2637_s1 + $0x290] sm:$0xf]  ;;  %v1379_v63 = vor.u32 %v1699_v52, %v1378_v49 }
  0x2a   :  { %921 = vmatpush.bf16.msrb.mxu2 %v1547_v61  ;;  %v1715_v54 = vld [vmem:[%s2637_s1 + $0x294] sm:$0xf0]  ;;  %v1579_v55 = vor.u32 %v1749_v47, %v1578_v46  ;;  %v1506_v56 = vld [vmem:[%s2637_s1 + $0x310] sm:$0xf]  ;;  %v1370_v61 = vld [vmem:[%s2637_s1 + $0x200] sm:$0xf] }
  0x2b   :  { %935 = vmatpush.bf16.msrb.mxu3 %v1611_v2  ;;  %v1731_v57 = vld [vmem:[%s2637_s1 + $0x314] sm:$0xf0]  ;;  %v1570_v59 = vld [vmem:[%s2637_s1 + $0x390] sm:$0xf]  ;;  %v1697_v62 = vld [vmem:[%s2637_s1 + $0x204] sm:$0xf0]  ;;  %v1443_v5 = vor.u32 %v1715_v54, %v1442_v53 }
  0x2c   :  { %894 = vmatpush.bf16.msrb.mxu0 %v1411_v9  ;;  %v1747_v60 = vld [vmem:[%s2637_s1 + $0x394] sm:$0xf0]  ;;  %v1434_v0 = vld [vmem:[%s2637_s1 + $0x280] sm:$0xf]  ;;  %v1713_v2 = vld [vmem:[%s2637_s1 + $0x284] sm:$0xf0]  ;;  %v1507_v6 = vor.u32 %v1731_v57, %v1506_v56  ;;  %v1371_v19 = vor.u32 %v1697_v62, %v1370_v61 }
  0x2d   :  { %908 = vmatpush.bf16.msrb.mxu1 %v1475_v12  ;;  %v1498_v3 = vld [vmem:[%s2637_s1 + $0x300] sm:$0xf]  ;;  %v1729_v4 = vld [vmem:[%s2637_s1 + $0x304] sm:$0xf0]  ;;  %v1646_v9 = vld [vmem:[%s2637_s1 + $0x74] sm:$0xf]  ;;  %v1571_v11 = vor.u32 %v1747_v60, %v1570_v59  ;;  %v1435_v23 = vor.u32 %v1713_v2, %v1434_v0 }
  0x2e   :  { %922 = vmatpush.bf16.msrb.mxu2 %v1539_v13  ;;  %v1562_v7 = vld [vmem:[%s2637_s1 + $0x380] sm:$0xf]  ;;  %v1745_v8 = vld [vmem:[%s2637_s1 + $0x384] sm:$0xf0]  ;;  %v1172_v12 = vld [vmem:[%s2637_s1 + $0x78] sm:$0xf0] }
  0x2f   :  { %936 = vmatpush.bf16.msrb.mxu3 %v1603_v18  ;;  %v1662_v13 = vld [vmem:[%s2637_s1 + $0xf4] sm:$0xf]  ;;  %v1236_v14 = vld [vmem:[%s2637_s1 + $0xf8] sm:$0xf0]  ;;  %v1098_v21 = vld [vmem:[%s2638_s0 + $0x10] sm:$0xf]  ;;  %v1563_v28 = vor.u32 %v1745_v8, %v1562_v7  ;;  %v1175_v29 = vor.u32 %v1646_v9, %v1172_v12 }
  0x30   :  { %895 = vmatpush.bf16.msrb.mxu0 %v1403_v24  ;;  %v1678_v15 = vld [vmem:[%s2637_s1 + $0x174] sm:$0xf]  ;;  %v1300_v16 = vld [vmem:[%s2637_s1 + $0x178] sm:$0xf0]  ;;  %v1630_v22 = vld [vmem:[%s2638_s0 + $0x2c] sm:$0xf0]  ;;  %v1499_v24 = vor.u32 %v1729_v4, %v1498_v3  ;;  %v1239_v33 = vor.u32 %v1662_v13, %v1236_v14 }
  0x31   :  { %909 = vmatpush.bf16.msrb.mxu1 %v1467_v25  ;;  %v1694_v18 = vld [vmem:[%s2637_s1 + $0x1f4] sm:$0xf]  ;;  %v1364_v20 = vld [vmem:[%s2637_s1 + $0x1f8] sm:$0xf0]  ;;  %v1106_v25 = vld [vmem:[%s2638_s0 + $0x18] sm:$0xf]  ;;  %v1303_v34 = vor.u32 %v1678_v15, %v1300_v16  ;;  %v2257_v39 = vor.u32 %v1630_v22, %v1098_v21 }
  0x32   :  { %923 = vmatpush.bf16.msrb.mxu2 %v1531_v26  ;;  %v1631_v26 = vld [vmem:[%s2638_s0 + $0x34] sm:$0xf0]  ;;  %v1626_v27 = vld [vmem:[%s2638_s0 + $0x14] sm:$0xf]  ;;  %v1627_v31 = vld [vmem:[%s2638_s0 + $0x1c] sm:$0xf] }
  0x33   :  { %937 = vmatpush.bf16.msrb.mxu3 %v1595_v30  ;;  %v1100_v30 = vld [vmem:[%s2638_s0 + $0x30] sm:$0xf0]  ;;  %v1108_v32 = vld [vmem:[%s2638_s0 + $0x38] sm:$0xf0]  ;;  %v1644_v35 = vld [vmem:[%s2637_s1 + $0x64] sm:$0xf]  ;;  %v2268_v43 = vor.u32 %v1631_v26, %v1106_v25 }
  0x34   :  { %896 = vmatpush.bf16.msrb.mxu0 %v1395_v36  ;;  %v1164_v36 = vld [vmem:[%s2637_s1 + $0x68] sm:$0xf0]  ;;  %v1676_v41 = vld [vmem:[%s2637_s1 + $0x164] sm:$0xf]  ;;  %v2270_v44 = vor.u32 %v1626_v27, %v1100_v30  ;;  %v2278_v47 = vor.u32 %v1627_v31, %v1108_v32  ;;  %v1156_v52 = vld [vmem:[%s2637_s1 + $0x58] sm:$0xf0] }
  0x35   :  { %910 = vmatpush.bf16.msrb.mxu1 %v1459_v37  ;;  %v1660_v37 = vld [vmem:[%s2637_s1 + $0xe4] sm:$0xf]  ;;  %v1228_v40 = vld [vmem:[%s2637_s1 + $0xe8] sm:$0xf0]  ;;  %v1658_v53 = vld [vmem:[%s2637_s1 + $0xd4] sm:$0xf] }
  0x36   :  { %924 = vmatpush.bf16.msrb.mxu2 %v1523_v38  ;;  %v1367_v38 = vor.u32 %v1694_v18, %v1364_v20  ;;  %v1692_v45 = vld [vmem:[%s2637_s1 + $0x1e4] sm:$0xf]  ;;  %v1356_v46 = vld [vmem:[%s2637_s1 + $0x1e8] sm:$0xf0]  ;;  %v1231_v49 = vor.u32 %v1660_v37, %v1228_v40  ;;  %v1674_v56 = vld [vmem:[%s2637_s1 + $0x154] sm:$0xf] }
  0x37   :  { %938 = vmatpush.bf16.msrb.mxu3 %v1587_v42  ;;  %v1292_v42 = vld [vmem:[%s2637_s1 + $0x168] sm:$0xf0]  ;;  %v1359_v54 = vor.u32 %v1692_v45, %v1356_v46  ;;  %v1284_v57 = vld [vmem:[%s2637_s1 + $0x158] sm:$0xf0]  ;;  %v1690_v59 = vld [vmem:[%s2637_s1 + $0x1d4] sm:$0xf] }
  0x38   :  { %897 = vmatpush.bf16.msrb.mxu0 %v1387_v48  ;;  %v1167_v48 = vor.u32 %v1644_v35, %v1164_v36  ;;  %v1348_v60 = vld [vmem:[%s2637_s1 + $0x1d8] sm:$0xf0]  ;;  %v1640_v0 = vld [vmem:[%s2637_s1 + $0x44] sm:$0xf]  ;;  %v1148_v2 = vld [vmem:[%s2637_s1 + $0x48] sm:$0xf0] }
  0x39   :  { %911 = vmatpush.bf16.msrb.mxu1 %v1451_v50  ;;  %v1295_v50 = vor.u32 %v1676_v41, %v1292_v42  ;;  %v1656_v3 = vld [vmem:[%s2637_s1 + $0xc4] sm:$0xf]  ;;  %v1351_v4 = vor.u32 %v1690_v59, %v1348_v60  ;;  %v1276_v7 = vld [vmem:[%s2637_s1 + $0x148] sm:$0xf0]  ;;  %v1638_v14 = vld [vmem:[%s2637_s1 + $0x34] sm:$0xf] }
  0x3a   :  { %925 = vmatpush.bf16.msrb.mxu2 %v1515_v51  ;;  %v1642_v51 = vld [vmem:[%s2637_s1 + $0x54] sm:$0xf]  ;;  %v1688_v8 = vld [vmem:[%s2637_s1 + $0x1c4] sm:$0xf]  ;;  %v1340_v9 = vld [vmem:[%s2637_s1 + $0x1c8] sm:$0xf0] }
  0x3b   :  { %939 = vmatpush.bf16.msrb.mxu3 %v1579_v55  ;;  %v1220_v55 = vld [vmem:[%s2637_s1 + $0xd8] sm:$0xf0]  ;;  %v1159_v61 = vor.u32 %v1642_v51, %v1156_v52  ;;  %v1654_v16 = vld [vmem:[%s2637_s1 + $0xb4] sm:$0xf]  ;;  %v1343_v18 = vor.u32 %v1688_v8, %v1340_v9  ;;  %v1636_v27 = vld [vmem:[%s2637_s1 + $0x24] sm:$0xf] }
  0x3c   :  { %898 = vmatpush.bf16.msrb.mxu0 %v1379_v63  ;;  %v1223_v62 = vor.u32 %v1658_v53, %v1220_v55  ;;  %v1287_v63 = vor.u32 %v1674_v56, %v1284_v57  ;;  %v1140_v15 = vld [vmem:[%s2637_s1 + $0x38] sm:$0xf0]  ;;  %v1670_v20 = vld [vmem:[%s2637_s1 + $0x134] sm:$0xf]  ;;  %v1196_v31 = vld [vmem:[%s2637_s1 + $0xa8] sm:$0xf0] }
  0x3d   :  { %912 = vmatpush.bf16.msrb.mxu1 %v1443_v5  ;;  %v1212_v5 = vld [vmem:[%s2637_s1 + $0xc8] sm:$0xf0]  ;;  %v1268_v21 = vld [vmem:[%s2637_s1 + $0x138] sm:$0xf0]  ;;  %v1686_v22 = vld [vmem:[%s2637_s1 + $0x1b4] sm:$0xf] }
  0x3e   :  { %926 = vmatpush.bf16.msrb.mxu2 %v1507_v6  ;;  %v1672_v6 = vld [vmem:[%s2637_s1 + $0x144] sm:$0xf]  ;;  %v1215_v12 = vor.u32 %v1656_v3, %v1212_v5  ;;  %v1271_v26 = vor.u32 %v1670_v20, %v1268_v21  ;;  %v1324_v35 = vld [vmem:[%s2637_s1 + $0x1a8] sm:$0xf0]  ;;  %v1634_v40 = vld [vmem:[%s2637_s1 + $0x14] sm:$0xf] }
  0x3f   :  { %940 = vmatpush.bf16.msrb.mxu3 %v1571_v11  ;;  %v1151_v11 = vor.u32 %v1640_v0, %v1148_v2  ;;  %v1279_v13 = vor.u32 %v1672_v6, %v1276_v7  ;;  %v1668_v32 = vld [vmem:[%s2637_s1 + $0x124] sm:$0xf]  ;;  %v1124_v41 = vld [vmem:[%s2637_s1 + $0x18] sm:$0xf0]  ;;  %v1650_v42 = vld [vmem:[%s2637_s1 + $0x94] sm:$0xf] }
  0x40   :  { %899 = vmatpush.bf16.msrb.mxu0 %v1371_v19  ;;  %v1204_v19 = vld [vmem:[%s2637_s1 + $0xb8] sm:$0xf0]  ;;  %v1127_v52 = vor.u32 %v1634_v40, %v1124_v41  ;;  %v1632_v53 = vld [vmem:[%s2637_s1 + $0x4] sm:$0xf]  ;;  %v1180_v59 = vld [vmem:[%s2637_s1 + $0x88] sm:$0xf0] }
  0x41   :  { %913 = vmatpush.bf16.msrb.mxu1 %v1435_v23  ;;  %v1332_v23 = vld [vmem:[%s2637_s1 + $0x1b8] sm:$0xf0]  ;;  %v1207_v25 = vor.u32 %v1654_v16, %v1204_v19  ;;  %v1648_v57 = vld [vmem:[%s2637_s1 + $0x84] sm:$0xf]  ;;  %v1308_v0 = vld [vmem:[%s2637_s1 + $0x188] sm:$0xf0] }
  0x42   :  { %927 = vmatpush.bf16.msrb.mxu2 %v1499_v24  ;;  %v1143_v24 = vor.u32 %v1638_v14, %v1140_v15  ;;  %v1335_v30 = vor.u32 %v1686_v22, %v1332_v23  ;;  %v1188_v46 = vld [vmem:[%s2637_s1 + $0x98] sm:$0xf0]  ;;  %v1664_v60 = vld [vmem:[%s2637_s1 + $0x104] sm:$0xf]  ;;  %v1710_v2 = vld [vmem:[%s2637_s1 + $0x274] sm:$0xf]  ;;  %v1183_v9 = vor.u32 %v1648_v57, %v1180_v59 }
  0x43   :  { %941 = vmatpush.bf16.msrb.mxu3 %v1563_v28  ;;  %900 = vmatmul.bf16.vlgmr.msrb.gmra.mxu0 %v2257_v39  ;;  %v1132_v28 = vld [vmem:[%s2637_s1 + $0x28] sm:$0xf0]  ;;  %v1316_v51 = vld [vmem:[%s2637_s1 + $0x198] sm:$0xf0]  ;;  %v1191_v55 = vor.u32 %v1650_v42, %v1188_v46  ;;  %v1742_v7 = vld [vmem:[%s2637_s1 + $0x374] sm:$0xf] }
  0x44   :  { %948 = vmatpush.bf16.msra.mxu0 %v1175_v29  ;;  %914 = vmatmul.bf16.vlgmr.msrb.gmra.mxu1 %v2270_v44  ;;  %v1652_v29 = vld [vmem:[%s2637_s1 + $0xa4] sm:$0xf]  ;;  %v1135_v36 = vor.u32 %v1636_v27, %v1132_v28  ;;  %v1428_v3 = vld [vmem:[%s2637_s1 + $0x278] sm:$0xf0]  ;;  %v1420_v20 = vld [vmem:[%s2637_s1 + $0x268] sm:$0xf0] }
  0x45   :  { %962 = vmatpush.bf16.msra.mxu1 %v1239_v33  ;;  %928 = vmatmul.bf16.vlgmr.msrb.gmra.mxu2 %v2268_v43  ;;  %v1260_v33 = vld [vmem:[%s2637_s1 + $0x128] sm:$0xf0]  ;;  %v1199_v37 = vor.u32 %v1652_v29, %v1196_v31  ;;  %v1492_v6 = vld [vmem:[%s2637_s1 + $0x2f8] sm:$0xf0]  ;;  %v1431_v15 = vor.u32 %v1710_v2, %v1428_v3  ;;  %v1708_v19 = vld [vmem:[%s2637_s1 + $0x264] sm:$0xf] }
  0x46   :  { %976 = vmatpush.bf16.msra.mxu2 %v1303_v34  ;;  %942 = vmatmul.bf16.vlgmr.msrb.gmra.mxu3 %v2278_v47  ;;  %v1684_v34 = vld [vmem:[%s2637_s1 + $0x1a4] sm:$0xf]  ;;  %v1556_v8 = vld [vmem:[%s2637_s1 + $0x378] sm:$0xf0]  ;;  %v1484_v23 = vld [vmem:[%s2637_s1 + $0x2e8] sm:$0xf0]  ;;  %v1423_v28 = vor.u32 %v1708_v19, %v1420_v20 }
  0x47   :  { %990 = vmatpush.bf16.msra.mxu3 %v1367_v38  ;;  %v1263_v38 = vor.u32 %v1668_v32, %v1260_v33  ;;  %v1327_v45 = vor.u32 %v1684_v34, %v1324_v35  ;;  %v1724_v21 = vld [vmem:[%s2637_s1 + $0x2e4] sm:$0xf]  ;;  %v1612_v27 = vld [vmem:[%s2637_s1 + $0x3e8] sm:$0xf0]  ;;  %v1706_v31 = vld [vmem:[%s2637_s1 + $0x254] sm:$0xf] }
  0x48   :  { %949 = vmatpush.bf16.msra.mxu0 %v1167_v48  ;;  %v1666_v48 = vld [vmem:[%s2637_s1 + $0x114] sm:$0xf]  ;;  %v1487_v29 = vor.u32 %v1724_v21, %v1484_v23  ;;  %v1412_v32 = vld [vmem:[%s2637_s1 + $0x258] sm:$0xf0]  ;;  %v1404_v46 = vld [vmem:[%s2637_s1 + $0x248] sm:$0xf0] }
  0x49   :  { %963 = vmatpush.bf16.msra.mxu1 %v1231_v49  ;;  %v1252_v49 = vld [vmem:[%s2637_s1 + $0x118] sm:$0xf0]  ;;  %v1722_v33 = vld [vmem:[%s2637_s1 + $0x2d4] sm:$0xf]  ;;  %v1415_v40 = vor.u32 %v1706_v31, %v1412_v32  ;;  %v1696_v31 = vld [vmem:[%s2637_s1 + $0x204] sm:$0xf] }
  0x4a   :  { %977 = vmatpush.bf16.msra.mxu2 %v1295_v50  ;;  %v1682_v50 = vld [vmem:[%s2637_s1 + $0x194] sm:$0xf]  ;;  %v1255_v56 = vor.u32 %v1666_v48, %v1252_v49  ;;  %v1476_v35 = vld [vmem:[%s2637_s1 + $0x2d8] sm:$0xf0]  ;;  %v1736_v48 = vld [vmem:[%s2637_s1 + $0x344] sm:$0xf] }
  0x4b   :  { %991 = vmatpush.bf16.msra.mxu3 %v1359_v54  ;;  %v1116_v54 = vld [vmem:[%s2637_s1 + $0x8] sm:$0xf0]  ;;  %v1479_v41 = vor.u32 %v1722_v33, %v1476_v35  ;;  %v1718_v57 = vld [vmem:[%s2637_s1 + $0x2b4] sm:$0xf]  ;;  %v1380_v20 = vld [vmem:[%s2637_s1 + $0x218] sm:$0xf0] }
  0x4c   :  { %950 = vmatpush.bf16.msra.mxu0 %v1159_v61  ;;  %v1319_v61 = vor.u32 %v1682_v50, %v1316_v51  ;;  %v1119_v5 = vor.u32 %v1632_v53, %v1116_v54  ;;  %v1532_v49 = vld [vmem:[%s2637_s1 + $0x348] sm:$0xf0]  ;;  %v1752_v50 = vld [vmem:[%s2637_s1 + $0x3c4] sm:$0xf]  ;;  %v1698_v19 = vld [vmem:[%s2637_s1 + $0x214] sm:$0xf] }
  0x4d   :  { %964 = vmatpush.bf16.msra.mxu1 %v1223_v62  ;;  %v1244_v62 = vld [vmem:[%s2637_s1 + $0x108] sm:$0xf0]  ;;  %v1535_v54 = vor.u32 %v1736_v48, %v1532_v49  ;;  %v1714_v21 = vld [vmem:[%s2637_s1 + $0x294] sm:$0xf]  ;;  %v1444_v23 = vld [vmem:[%s2637_s1 + $0x298] sm:$0xf0] }
  0x4e   :  { %978 = vmatpush.bf16.msra.mxu2 %v1287_v63  ;;  %v1680_v63 = vld [vmem:[%s2637_s1 + $0x184] sm:$0xf]  ;;  %v1596_v51 = vld [vmem:[%s2637_s1 + $0x3c8] sm:$0xf0] }
  0x4f   :  { %992 = vmatpush.bf16.msra.mxu3 %v1351_v4  ;;  %v1726_v4 = vld [vmem:[%s2637_s1 + $0x2f4] sm:$0xf]  ;;  %v1311_v14 = vor.u32 %v1680_v63, %v1308_v0  ;;  %v1599_v59 = vor.u32 %v1752_v50, %v1596_v51  ;;  %v1588_v0 = vld [vmem:[%s2637_s1 + $0x3b8] sm:$0xf0]  ;;  %v1372_v32 = vld [vmem:[%s2637_s1 + $0x208] sm:$0xf0] }
  0x50   :  { %951 = vmatpush.bf16.msra.mxu0 %v1151_v11  ;;  %v1247_v11 = vor.u32 %v1664_v60, %v1244_v62  ;;  %v1495_v16 = vor.u32 %v1726_v4, %v1492_v6  ;;  %v1460_v60 = vld [vmem:[%s2637_s1 + $0x2b8] sm:$0xf0]  ;;  %v1750_v63 = vld [vmem:[%s2637_s1 + $0x3b4] sm:$0xf]  ;;  %v1388_v6 = vld [vmem:[%s2637_s1 + $0x228] sm:$0xf0] }
  0x51   :  { %965 = vmatpush.bf16.msra.mxu1 %v1215_v12  ;;  %v1758_v12 = vld [vmem:[%s2637_s1 + $0x3f4] sm:$0xf]  ;;  %v1524_v62 = vld [vmem:[%s2637_s1 + $0x338] sm:$0xf0]  ;;  %v1463_v3 = vor.u32 %v1718_v57, %v1460_v60  ;;  %v1712_v33 = vld [vmem:[%s2637_s1 + $0x284] sm:$0xf] }
  0x52   :  { %979 = vmatpush.bf16.msra.mxu2 %v1279_v13  ;;  %v1620_v13 = vld [vmem:[%s2637_s1 + $0x3f8] sm:$0xf0]  ;;  %v1436_v35 = vld [vmem:[%s2637_s1 + $0x288] sm:$0xf0] }
  0x53   :  { %993 = vmatpush.bf16.msra.mxu3 %v1343_v18  ;;  %v1559_v18 = vor.u32 %v1742_v7, %v1556_v8  ;;  %v1623_v22 = vor.u32 %v1758_v12, %v1620_v13  ;;  %v1716_v7 = vld [vmem:[%s2637_s1 + $0x2a4] sm:$0xf]  ;;  %v1591_v8 = vor.u32 %v1750_v63, %v1588_v0  ;;  %v1516_v12 = vld [vmem:[%s2637_s1 + $0x328] sm:$0xf0] }
  0x54   :  { %952 = vmatpush.bf16.msra.mxu0 %v1143_v24  ;;  %v1740_v24 = vld [vmem:[%s2637_s1 + $0x364] sm:$0xf] }
  0x55   :  { %966 = vmatpush.bf16.msra.mxu1 %v1207_v25  ;;  %v1548_v25 = vld [vmem:[%s2637_s1 + $0x368] sm:$0xf0]  ;;  %v1748_v13 = vld [vmem:[%s2637_s1 + $0x3a4] sm:$0xf] }
  0x56   :  { %980 = vmatpush.bf16.msra.mxu2 %v1271_v26  ;;  %v1756_v26 = vld [vmem:[%s2637_s1 + $0x3e4] sm:$0xf] }
  0x57   :  { %994 = vmatpush.bf16.msra.mxu3 %v1335_v30  ;;  %v1551_v30 = vor.u32 %v1740_v24, %v1548_v25  ;;  %v1615_v34 = vor.u32 %v1756_v26, %v1612_v27  ;;  %v1730_v24 = vld [vmem:[%s2637_s1 + $0x314] sm:$0xf]  ;;  %v1508_v25 = vld [vmem:[%s2637_s1 + $0x318] sm:$0xf0] }
  0x58   :  { %953 = vmatpush.bf16.msra.mxu0 %v1135_v36  ;;  %v1738_v36 = vld [vmem:[%s2637_s1 + $0x354] sm:$0xf]  ;;  %v1572_v27 = vld [vmem:[%s2637_s1 + $0x398] sm:$0xf0] }
  0x59   :  { %967 = vmatpush.bf16.msra.mxu1 %v1199_v37  ;;  %v1540_v37 = vld [vmem:[%s2637_s1 + $0x358] sm:$0xf0]  ;;  %v1746_v26 = vld [vmem:[%s2637_s1 + $0x394] sm:$0xf] }
  0x5a   :  { %981 = vmatpush.bf16.msra.mxu2 %v1263_v38  ;;  %v1754_v38 = vld [vmem:[%s2637_s1 + $0x3d4] sm:$0xf]  ;;  %v1543_v42 = vor.u32 %v1738_v36, %v1540_v37  ;;  %v1728_v36 = vld [vmem:[%s2637_s1 + $0x304] sm:$0xf]  ;;  %v1500_v37 = vld [vmem:[%s2637_s1 + $0x308] sm:$0xf0] }
  0x5b   :  { %995 = vmatpush.bf16.msra.mxu3 %v1327_v45  ;;  %v1704_v45 = vld [vmem:[%s2637_s1 + $0x244] sm:$0xf] }
  0x5c   :  { %954 = vmatpush.bf16.msra.mxu0 %v1127_v52  ;;  %v1407_v52 = vor.u32 %v1704_v45, %v1404_v46 }
  0x5d   :  { %968 = vmatpush.bf16.msra.mxu1 %v1191_v55  ;;  %v1702_v55 = vld [vmem:[%s2637_s1 + $0x234] sm:$0xf] }
  0x5e   :  { %982 = vmatpush.bf16.msra.mxu2 %v1255_v56  ;;  %v1396_v56 = vld [vmem:[%s2637_s1 + $0x238] sm:$0xf0] }
  0x5f   :  { %996 = vmatpush.bf16.msra.mxu3 %v1319_v61  ;;  %v1734_v61 = vld [vmem:[%s2637_s1 + $0x334] sm:$0xf]  ;;  %v1399_v2 = vor.u32 %v1702_v55, %v1396_v56 }
  0x60   :  { %955 = vmatpush.bf16.msra.mxu0 %v1119_v5  ;;  %v1527_v4 = vor.u32 %v1734_v61, %v1524_v62  ;;  %v1700_v5 = vld [vmem:[%s2637_s1 + $0x224] sm:$0xf] }
  0x61   :  { %969 = vmatpush.bf16.msra.mxu1 %v1183_v9  ;;  %v1452_v9 = vld [vmem:[%s2637_s1 + $0x2a8] sm:$0xf0] }
  0x62   :  { %983 = vmatpush.bf16.msra.mxu2 %v1247_v11  ;;  %v1732_v11 = vld [vmem:[%s2637_s1 + $0x324] sm:$0xf] }
  0x63   :  { %997 = vmatpush.bf16.msra.mxu3 %v1311_v14  ;;  %956 = vmatmul.bf16.vlgmr.msra.gmra.mxu0 %v2035_v58  ;;  %v1720_v58 = vld [vmem:[%s2637_s1 + $0x2c4] sm:$0xf]  ;;  %v1580_v14 = vld [vmem:[%s2637_s1 + $0x3a8] sm:$0xf0] }
  0x64   :  { %1004 = vmatpush.bf16.msrb.mxu0 %v1431_v15  ;;  %970 = vmatmul.bf16.vlgmr.msra.gmra.mxu1 %v2071_v10  ;;  %v1468_v10 = vld [vmem:[%s2637_s1 + $0x2c8] sm:$0xf0]  ;;  %v1391_v15 = vor.u32 %v1700_v5, %v1388_v6 }
  0x65   :  { %1018 = vmatpush.bf16.msrb.mxu1 %v1495_v16  ;;  %984 = vmatmul.bf16.vlgmr.msra.gmra.mxu2 %v2049_v1  ;;  %v1604_v1 = vld [vmem:[%s2637_s1 + $0x3d8] sm:$0xf0]  ;;  %v1471_v53 = vor.u32 %v1720_v58, %v1468_v10  ;;  %v1455_v16 = vor.u32 %v1716_v7, %v1452_v9 }
  0x66   :  { %1032 = vmatpush.bf16.msrb.mxu2 %v1559_v18  ;;  %998 = vmatmul.bf16.vlgmr.msra.gmra.mxu3 %v2085_v17  ;;  %v1607_v17 = vor.u32 %v1754_v38, %v1604_v1  ;;  %v1519_v18 = vor.u32 %v1732_v11, %v1516_v12  ;;  %v1744_v38 = vld [vmem:[%s2637_s1 + $0x384] sm:$0xf]  ;;  %v1564_v1 = vld [vmem:[%s2637_s1 + $0x388] sm:$0xf0] }
  0x67   :  { %1046 = vmatpush.bf16.msrb.mxu3 %v1623_v22  ;;  %v1583_v22 = vor.u32 %v1748_v13, %v1580_v14  ;;  %v1567_v45 = vor.u32 %v1744_v38, %v1564_v1 }
  0x68   :  { %1005 = vmatpush.bf16.msrb.mxu0 %v1423_v28  ;;  %v1383_v28 = vor.u32 %v1698_v19, %v1380_v20 }
  0x69   :  { %1019 = vmatpush.bf16.msrb.mxu1 %v1487_v29  ;;  %v1447_v29 = vor.u32 %v1714_v21, %v1444_v23 }
  0x6a   :  { %1033 = vmatpush.bf16.msrb.mxu2 %v1551_v30  ;;  %v1511_v30 = vor.u32 %v1730_v24, %v1508_v25 }
  0x6b   :  { %1047 = vmatpush.bf16.msrb.mxu3 %v1615_v34  ;;  %v1575_v34 = vor.u32 %v1746_v26, %v1572_v27 }
  0x6c   :  { %1006 = vmatpush.bf16.msrb.mxu0 %v1415_v40  ;;  %v1375_v40 = vor.u32 %v1696_v31, %v1372_v32 }
  0x6d   :  { %1020 = vmatpush.bf16.msrb.mxu1 %v1479_v41  ;;  %v1439_v41 = vor.u32 %v1712_v33, %v1436_v35 }
  0x6e   :  { %1034 = vmatpush.bf16.msrb.mxu2 %v1543_v42  ;;  %v1503_v42 = vor.u32 %v1728_v36, %v1500_v37 }
  0x6f   :  { %1048 = vmatpush.bf16.msrb.mxu3 %v1607_v17 }
  0x70   :  { %1007 = vmatpush.bf16.msrb.mxu0 %v1407_v52 }
  0x71   :  { %1021 = vmatpush.bf16.msrb.mxu1 %v1471_v53 }
  0x72   :  { %1035 = vmatpush.bf16.msrb.mxu2 %v1535_v54 }
  0x73   :  { %1049 = vmatpush.bf16.msrb.mxu3 %v1599_v59 }
  0x74   :  { %1008 = vmatpush.bf16.msrb.mxu0 %v1399_v2 }
  0x75   :  { %1022 = vmatpush.bf16.msrb.mxu1 %v1463_v3 }
  0x76   :  { %1036 = vmatpush.bf16.msrb.mxu2 %v1527_v4 }
  0x77   :  { %1050 = vmatpush.bf16.msrb.mxu3 %v1591_v8 }
  0x78   :  { %1009 = vmatpush.bf16.msrb.mxu0 %v1391_v15 }
  0x79   :  { %1023 = vmatpush.bf16.msrb.mxu1 %v1455_v16 }
  0x7a   :  { %1037 = vmatpush.bf16.msrb.mxu2 %v1519_v18 }
  0x7b   :  { %1051 = vmatpush.bf16.msrb.mxu3 %v1583_v22 }
  0x7c   :  { %1010 = vmatpush.bf16.msrb.mxu0 %v1383_v28 }
  0x7d   :  { %1024 = vmatpush.bf16.msrb.mxu1 %v1447_v29 }
  0x7e   :  { %1038 = vmatpush.bf16.msrb.mxu2 %v1511_v30 }
  0x7f   :  { %1052 = vmatpush.bf16.msrb.mxu3 %v1575_v34 }
  0x80   :  { %1011 = vmatpush.bf16.msrb.mxu0 %v1375_v40 }
  0x81   :  { %1025 = vmatpush.bf16.msrb.mxu1 %v1439_v41 }
  0x82   :  { %1039 = vmatpush.bf16.msrb.mxu2 %v1503_v42 }
  0x83   :  { %1053 = vmatpush.bf16.msrb.mxu3 %v1567_v45  ;;  %1012 = vmatmul.bf16.vlgmr.msrb.gmra.mxu0 %v2257_v39  ;;  %v150_v39 = vld [vmem:[%s2639_s2] sm:$0x3] }
  0x84   :  { %1026 = vmatmul.bf16.vlgmr.msrb.gmra.mxu1 %v2270_v44  ;;  %v152_v55 = vperm.slane %v150_v39, 0  ;;  %v153_v62 = vperm.slane %v150_v39, 1 }
  0x85   :  { %1040 = vmatmul.bf16.vlgmr.msrb.gmra.mxu2 %v2268_v43 }
  0x86   :  { %1054 = vmatmul.bf16.vlgmr.msrb.gmra.mxu3 %v2278_v47 }
  0xa0   :  { %v845_v46 = vpop.f32.mrf.mxu0 }
  0xa1   :  { %v859_v58 = vpop.f32.mrf.mxu1  ;;  %v846_v47 = vadd.f32 %v845_v46, %v152_v55 }
  0xa3   :  { %v860_v59 = vadd.f32 %v859_v58, %v846_v47 }
  0xa8   :  { %v873_v17 = vpop.f32.mrf.mxu2  ;;  %v847_v48 = vpop.f32.mrf.mxu0 }
  0xa9   :  { %v887_v10 = vpop.f32.mrf.mxu3  ;;  %v861_v49 = vpop.f32.mrf.mxu1  ;;  %v874_v0 = vadd.f32 %v873_v17, %v860_v59  ;;  %v848_v2 = vadd.f32 %v847_v48, %v152_v55 }
  0xab   :  { %v888_v5 = vadd.f32 %v887_v10, %v874_v0  ;;  %v862_v7 = vadd.f32 %v861_v49, %v848_v2 }
  0xb0   :  { %v875_v50 = vpop.f32.mrf.mxu2 }
  0xb1   :  { %v889_v51 = vpop.f32.mrf.mxu3  ;;  %v876_v13 = vadd.f32 %v875_v50, %v862_v7 }
  0xb3   :  { %v890_v19 = vadd.f32 %v889_v51, %v876_v13 }
  0xc0   :  { %v901_v52 = vpop.f32.mrf.mxu0 }
  0xc1   :  { %v915_v53 = vpop.f32.mrf.mxu1  ;;  %v902_v11 = vadd.f32 %v901_v52, %v888_v5 }
  0xc3   :  { %v916_v16 = vadd.f32 %v915_v53, %v902_v11 }
  0xc8   :  { %v929_v54 = vpop.f32.mrf.mxu2  ;;  %v903_v43 = vpop.f32.mrf.mxu0 }
  0xc9   :  { %v943_v44 = vpop.f32.mrf.mxu3  ;;  %v917_v56 = vpop.f32.mrf.mxu1  ;;  %v930_v24 = vadd.f32 %v929_v54, %v916_v16  ;;  %v904_v27 = vadd.f32 %v903_v43, %v890_v19 }
  0xcb   :  { %v944_v29 = vadd.f32 %v943_v44, %v930_v24  ;;  %v918_v32 = vadd.f32 %v917_v56, %v904_v27 }
  0xcd   :  { %v1064_v37 = vmul.f32 0.1, %v944_v29  ;;  %vm1060_vm0 = vcmp.gt.f32.partialorder %v944_v29, 0.0 }
  0xcf   :  { %v1068_v45 = vsel %vm1060_vm0, %v944_v29, %v1064_v37 }
  0xd0   :  { %v931_v57 = vpop.f32.mrf.mxu2 }
  0xd1   :  { %v945_v60 = vpop.f32.mrf.mxu3  ;;  %v932_v38 = vadd.f32 %v931_v57, %v918_v32 }
  0xd3   :  { %v946_v46 = vadd.f32 %v945_v60, %v932_v38 }
  0xd5   :  { %v1066_v51 = vmul.f32 0.1, %v946_v46  ;;  %vm1062_vm2 = vcmp.gt.f32.partialorder %v946_v46, 0.0 }
  0xd7   :  { %v1070_v39 = vsel %vm1062_vm2, %v946_v46, %v1066_v51 }
  0xe0   :  { %v957_v61 = vpop.f32.mrf.mxu0 }
  0xe1   :  { %v971_v63 = vpop.f32.mrf.mxu1  ;;  %v958_v3 = vadd.f32 %v957_v61, %v153_v62 }
  0xe3   :  { %v972_v8 = vadd.f32 %v971_v63, %v958_v3 }
  0xe8   :  { %v985_v4 = vpop.f32.mrf.mxu2  ;;  %v959_v9 = vpop.f32.mrf.mxu0 }
  0xe9   :  { %v999_v6 = vpop.f32.mrf.mxu3  ;;  %v973_v12 = vpop.f32.mrf.mxu1  ;;  %v986_v14 = vadd.f32 %v985_v4, %v972_v8  ;;  %v960_v15 = vadd.f32 %v959_v9, %v153_v62 }
  0xeb   :  { %v1000_v20 = vadd.f32 %v999_v6, %v986_v14  ;;  %v974_v21 = vadd.f32 %v973_v12, %v960_v15 }
  0xf0   :  { %v987_v18 = vpop.f32.mrf.mxu2 }
  0xf1   :  { %v1001_v22 = vpop.f32.mrf.mxu3  ;;  %v988_v28 = vadd.f32 %v987_v18, %v974_v21 }
  0xf3   :  { %v1002_v33 = vadd.f32 %v1001_v22, %v988_v28 }
 0x100   :  { %v1013_v23 = vpop.f32.mrf.mxu0 }
 0x101   :  { %v1014_v25 = vadd.f32 %v1013_v23, %v1000_v20  ;;  %v1027_v26 = vpop.f32.mrf.mxu1 }
 0x103   :  { %v1028_v30 = vadd.f32 %v1027_v26, %v1014_v25 }
 0x108   :  { %v1041_v31 = vpop.f32.mrf.mxu2  ;;  %v1015_v36 = vpop.f32.mrf.mxu0 }
 0x109   :  { %v1042_v34 = vadd.f32 %v1041_v31, %v1028_v30  ;;  %v1055_v35 = vpop.f32.mrf.mxu3  ;;  %v1016_v40 = vadd.f32 %v1015_v36, %v1002_v33  ;;  %v1029_v42 = vpop.f32.mrf.mxu1 }
 0x10b   :  { %v1056_v1 = vadd.f32 %v1055_v35, %v1042_v34  ;;  %v1030_v17 = vadd.f32 %v1029_v42, %v1016_v40 }
 0x10d   :  { %vm1061_vm1 = vcmp.gt.f32.partialorder %v1056_v1, 0.0  ;;  %v1065_v41 = vmul.f32 0.1, %v1056_v1 }
 0x10f   :  { %v1069_v58 = vsel %vm1061_vm1, %v1056_v1, %v1065_v41 }
 0x110   :  { %v1072_v10 = vpack.c.bf16 %v1069_v58, %v1068_v45  ;;  %v1043_v48 = vpop.f32.mrf.mxu2 }
 0x111   :  { %v1044_v49 = vadd.f32 %v1043_v48, %v1030_v17  ;;  %v1057_v50 = vpop.f32.mrf.mxu3 }
 0x112   :  { %1074 = vst [vmem:[%s2640_s3] sm:$0xff] %v1072_v10 }
 0x113   :  { %v1058_v52 = vadd.f32 %v1057_v50, %v1044_v49 }
 0x115   :  { %vm1063_vm3 = vcmp.gt.f32.partialorder %v1058_v52, 0.0  ;;  %v1067_v53 = vmul.f32 0.1, %v1058_v52 }
 0x117   :  { %v1071_v54 = vsel %vm1063_vm3, %v1058_v52, %v1067_v53 }
 0x118   :  { %v1073_v44 = vpack.c.bf16 %v1071_v54, %v1070_v39 }
 0x11a   :  { %1075 = vst [vmem:[%s2640_s3 + $0x8] sm:$0xff] %v1073_v44 }

// kernel: style_network_forward.19
= control target key start
LH: loop header
LB: loop body
LE: loop exit
PB: predicated region body
PF: predicated region fallthrough
CT: control target
= control target key end

     0   :  { %s818_s12 = smov 0   ;;  %s938_s0 = inlined_call_operand.vmem [shape: bf16[32,512], index: 0, kind: input, shape index: {}]   ;;  %s939_s1 = inlined_call_operand.vmem [shape: bf16[512,128], index: 1, kind: input, shape index: {}]   ;;  %s940_s2 = inlined_call_operand.vmem [shape: f32[1,128], index: 2, kind: input, shape index: {}]   ;;  %s941_s3 = inlined_call_operand.vmem [shape: bf16[32,128], index: 3, kind: output, shape index: {}]  }
   0x1 LB: > { %s583_s13 = sadd.s32 4294967295, %s796_s12   ;;  %p587_p0 = scmp.ge.s32.totalorder %s796_s12, 1  ;;  %s796_s12 = sphi %s818_s12, %s13_s12  }
   0x2   : > { %p139_p1 = scmp.lt.s32.totalorder %s796_s12, 3 }
   0x4   : > { %p140_p2 = pnand %p587_p0, %p139_p1 }
   0x5   : > { %s588_s11 = sshll.u32 (!%p140_p2), %s583_s13, 1 }
   0x6   : > { %143 = sbr.rel (%p140_p2) target bundleno = 195 (0xc3), region = 32  ;;  %p165_p3 = scmp.lt.s32.totalorder (!%p140_p2), %s588_s11, 3 }
   0xb   : > { %v751_v0 = vld [vmem:[%s939_s1 + $0x38] sm:$0xff]  ;;  %v750_v4 = vld [vmem:[%s939_s1 + $0x30] sm:$0xff]  ;;  %v749_v8 = vld [vmem:[%s939_s1 + $0x28] sm:$0xff]  ;;  %s943_s11 = smov (!%p165_p3, %s588_s11), 3 }
   0xc   : > { %v759_v1 = vld [vmem:[%s939_s1 + $0x78] sm:$0xff]  ;;  %461 = vmatpush.bf16.msra.mxu0 %v751_v0  ;;  %v758_v5 = vld [vmem:[%s939_s1 + $0x70] sm:$0xff]  ;;  %v757_v9 = vld [vmem:[%s939_s1 + $0x68] sm:$0xff]  ;;  %s739_s10 = sshll.u32 %s943_s11, 4  ;;  %s592_s7 = sshll.u32 %s943_s11, 2 }
   0xd   : > { %v767_v2 = vld [vmem:[%s939_s1 + $0xb8] sm:$0xff]  ;;  %475 = vmatpush.bf16.msra.mxu1 %v759_v1  ;;  %v766_v6 = vld [vmem:[%s939_s1 + $0xb0] sm:$0xff]  ;;  %v765_v10 = vld [vmem:[%s939_s1 + $0xa8] sm:$0xff]  ;;  %s169_s20 = scalar_lea.vmem %s938_s0, %s739_s10  ;;  %s175_s10 = scalar_lea.vmem %s941_s3, %s592_s7 }
   0xe   : > { %v775_v3 = vld [vmem:[%s939_s1 + $0xf8] sm:$0xff]  ;;  %489 = vmatpush.bf16.msra.mxu2 %v767_v2  ;;  %v774_v7 = vld [vmem:[%s939_s1 + $0xf0] sm:$0xff]  ;;  %v773_v11 = vld [vmem:[%s939_s1 + $0xe8] sm:$0xff] }
   0xf   : > { %503 = vmatpush.bf16.msra.mxu3 %v775_v3  ;;  %v748_v12 = vld [vmem:[%s939_s1 + $0x20] sm:$0xff]  ;;  %v747_v16 = vld [vmem:[%s939_s1 + $0x18] sm:$0xff]  ;;  %v746_v20 = vld [vmem:[%s939_s1 + $0x10] sm:$0xff] }
  0x10   : > { %462 = vmatpush.bf16.msra.mxu0 %v750_v4  ;;  %v756_v13 = vld [vmem:[%s939_s1 + $0x60] sm:$0xff]  ;;  %v755_v17 = vld [vmem:[%s939_s1 + $0x58] sm:$0xff]  ;;  %v754_v21 = vld [vmem:[%s939_s1 + $0x50] sm:$0xff] }
  0x11   : > { %476 = vmatpush.bf16.msra.mxu1 %v758_v5  ;;  %v764_v14 = vld [vmem:[%s939_s1 + $0xa0] sm:$0xff]  ;;  %v763_v18 = vld [vmem:[%s939_s1 + $0x98] sm:$0xff]  ;;  %v762_v22 = vld [vmem:[%s939_s1 + $0x90] sm:$0xff] }
  0x12   : > { %490 = vmatpush.bf16.msra.mxu2 %v766_v6  ;;  %v772_v15 = vld [vmem:[%s939_s1 + $0xe0] sm:$0xff]  ;;  %v771_v19 = vld [vmem:[%s939_s1 + $0xd8] sm:$0xff]  ;;  %v770_v23 = vld [vmem:[%s939_s1 + $0xd0] sm:$0xff] }
  0x13   : > { %504 = vmatpush.bf16.msra.mxu3 %v774_v7  ;;  %v745_v24 = vld [vmem:[%s939_s1 + $0x8] sm:$0xff]  ;;  %v744_v28 = vld [vmem:[%s939_s1] sm:$0xff]  ;;  %v742_v33 = vld [vmem:[%s169_s20 + $0xc] sm:$0xf0] }
  0x14   : > { %463 = vmatpush.bf16.msra.mxu0 %v749_v8  ;;  %v753_v25 = vld [vmem:[%s939_s1 + $0x48] sm:$0xff]  ;;  %v752_v29 = vld [vmem:[%s939_s1 + $0x40] sm:$0xff]  ;;  %v597_v35 = vld [vmem:[%s169_s20 + $0x10] sm:$0xf0] }
  0x15   : > { %477 = vmatpush.bf16.msra.mxu1 %v757_v9  ;;  %v761_v26 = vld [vmem:[%s939_s1 + $0x88] sm:$0xff]  ;;  %v760_v30 = vld [vmem:[%s939_s1 + $0x80] sm:$0xff]  ;;  %v743_v37 = vld [vmem:[%s169_s20 + $0x14] sm:$0xf0] }
  0x16   : > { %491 = vmatpush.bf16.msra.mxu2 %v765_v10  ;;  %v769_v27 = vld [vmem:[%s939_s1 + $0xc8] sm:$0xff]  ;;  %v768_v31 = vld [vmem:[%s939_s1 + $0xc0] sm:$0xff]  ;;  %v605_v39 = vld [vmem:[%s169_s20 + $0x18] sm:$0xf0] }
  0x17   : > { %505 = vmatpush.bf16.msra.mxu3 %v773_v11  ;;  %v595_v32 = vld [vmem:[%s169_s20] sm:$0xf]  ;;  %v740_v34 = vld [vmem:[%s169_s20 + $0x4] sm:$0xf]  ;;  %v603_v36 = vld [vmem:[%s169_s20 + $0x8] sm:$0xf] }
  0x18   : > { %464 = vmatpush.bf16.msra.mxu0 %v748_v12  ;;  %v741_v38 = vld [vmem:[%s169_s20 + $0xc] sm:$0xf]  ;;  %v596_v40 = vor.u32 %v742_v33, %v595_v32  ;;  %v600_v41 = vor.u32 %v740_v34, %v597_v35  ;;  %v604_v42 = vor.u32 %v743_v37, %v603_v36  ;;  %v789_v44 = vld [vmem:[%s940_s2] ss:$0 sm:$0xff] }
  0x19   : > { %478 = vmatpush.bf16.msra.mxu1 %v756_v13  ;;  %v608_v43 = vor.u32 %v741_v38, %v605_v39 }
  0x1a   : > { %492 = vmatpush.bf16.msra.mxu2 %v764_v14 }
  0x1b   : > { %506 = vmatpush.bf16.msra.mxu3 %v772_v15 }
  0x1c   : > { %465 = vmatpush.bf16.msra.mxu0 %v747_v16 }
  0x1d   : > { %479 = vmatpush.bf16.msra.mxu1 %v755_v17 }
  0x1e   : > { %493 = vmatpush.bf16.msra.mxu2 %v763_v18 }
  0x1f   : > { %507 = vmatpush.bf16.msra.mxu3 %v771_v19 }
  0x20   : > { %466 = vmatpush.bf16.msra.mxu0 %v746_v20 }
  0x21   : > { %480 = vmatpush.bf16.msra.mxu1 %v754_v21 }
  0x22   : > { %494 = vmatpush.bf16.msra.mxu2 %v762_v22 }
  0x23   : > { %508 = vmatpush.bf16.msra.mxu3 %v770_v23 }
  0x24   : > { %467 = vmatpush.bf16.msra.mxu0 %v745_v24 }
  0x25   : > { %481 = vmatpush.bf16.msra.mxu1 %v753_v25 }
  0x26   : > { %495 = vmatpush.bf16.msra.mxu2 %v761_v26 }
  0x27   : > { %509 = vmatpush.bf16.msra.mxu3 %v769_v27 }
  0x28   : > { %468 = vmatpush.bf16.msra.mxu0 %v744_v28 }
  0x29   : > { %482 = vmatpush.bf16.msra.mxu1 %v752_v29 }
  0x2a   : > { %496 = vmatpush.bf16.msra.mxu2 %v760_v30 }
  0x2b   : > { %510 = vmatpush.bf16.msra.mxu3 %v768_v31  ;;  %469 = vmatmul.bf16.vlgmr.msra.gmra.mxu0 %v596_v40 }
  0x2c   : > { %483 = vmatmul.bf16.vlgmr.msra.gmra.mxu1 %v600_v41 }
  0x2d   : > { %497 = vmatmul.bf16.vlgmr.msra.gmra.mxu2 %v604_v42 }
  0x2e   : > { %511 = vmatmul.bf16.vlgmr.msra.gmra.mxu3 %v608_v43 }
  0xa8   : > { %v470_v45 = vpop.f32.mrf.mxu0 }
  0xa9   : > { %v471_v46 = vadd.f32 %v789_v44, %v470_v45  ;;  %v484_v47 = vpop.f32.mrf.mxu1 }
  0xab   : > { %v485_v48 = vadd.f32 %v484_v47, %v471_v46 }
  0xb0   : > { %v498_v49 = vpop.f32.mrf.mxu2  ;;  %v472_v51 = vpop.f32.mrf.mxu0 }
  0xb1   : > { %v512_v50 = vpop.f32.mrf.mxu3  ;;  %v499_v52 = vadd.f32 %v498_v49, %v485_v48  ;;  %v473_v53 = vadd.f32 %v789_v44, %v472_v51  ;;  %v486_v54 = vpop.f32.mrf.mxu1 }
  0xb3   : > { %v513_v55 = vadd.f32 %v512_v50, %v499_v52  ;;  %v487_v56 = vadd.f32 %v486_v54, %v473_v53 }
  0xb5   : > { %v519_v60 = vmul.f32 0.1, %v513_v55  ;;  %vm517_vm0 = vcmp.gt.f32.partialorder %v513_v55, 0.0 }
  0xb7   : > { %v521_v63 = vsel %vm517_vm0, %v513_v55, %v519_v60 }
  0xb8   : > { %v500_v57 = vpop.f32.mrf.mxu2 }
  0xb9   : > { %v501_v58 = vadd.f32 %v500_v57, %v487_v56  ;;  %v514_v59 = vpop.f32.mrf.mxu3 }
  0xbb   : > { %v515_v61 = vadd.f32 %v514_v59, %v501_v58 }
  0xbd   : > { %vm518_vm1 = vcmp.gt.f32.partialorder %v515_v61, 0.0  ;;  %v520_v62 = vmul.f32 0.1, %v515_v61 }
  0xbf   : > { %v522_v0 = vsel %vm518_vm1, %v515_v61, %v520_v62 }
  0xc0   : > { %v779_v1 = vpack.c.bf16 %v522_v0, %v521_v63 }
  0xc2   : > { %780 = vst [vmem:[%s175_s10] sm:$0xff] %v779_v1  }
  0xc3 PF: > { %s13_s12 = sadd.s32 1, %s796_s12  }
  0xc4   : > { %p10_p4 = scmp.ge.s32.totalorder %s13_s12, 4  }
  0xc6   :  { %12 = sbr.rel (!%p10_p4) target bundleno = 1 (0x1), region = 62 }

// kernel: style_network_forward.17
= control target key start
LH: loop header
LB: loop body
LE: loop exit
PB: predicated region body
PF: predicated region fallthrough
CT: control target
= control target key end

     0   :  { %s1014_s18 = smov 0   ;;  %s1407_s0 = inlined_call_operand.vmem [shape: bf16[2,10,10,32], index: 0, kind: input, shape index: {}]   ;;  %s1408_s1 = inlined_call_operand.vmem [shape: f32[9,32], index: 1, kind: input, shape index: {}]   ;;  %s1409_s2 = inlined_call_operand.vmem [shape: f32[1,32], index: 2, kind: input, shape index: {}]   ;;  %s1410_s3 = inlined_call_operand.vmem [shape: bf16[32,32], index: 3, kind: input, shape index: {}]   ;;  %s1411_s4 = inlined_call_operand.vmem [shape: f32[1,32], index: 4, kind: input, shape index: {}]   ;;  %s1412_s5 = inlined_call_operand.vmem [shape: bf16[2,8,8,32], index: 5, kind: output, shape index: {}]  }
   0x1 LB: > { %s933_s19 = sadd.s32 4294967295, %s982_s18   ;;  %p937_p0 = scmp.ge.s32.totalorder %s982_s18, 1  ;;  %s982_s18 = sphi %s1014_s18, %s15_s18  }
   0x2   : > { %p187_p1 = scmp.lt.s32.totalorder %s982_s18, 3 }
   0x4   : > { %p188_p2 = pnand %p937_p0, %p187_p1 }
   0x5   : > { %p215_p3 = scmp.lt.s32.totalorder (!%p188_p2), %s933_s19, 1 }
   0x6   : > { %191 = sbr.rel (%p188_p2) target bundleno = 261 (0x105), region = 40 }
   0xb   : > { %v957_v0 = vld [vmem:[%s1410_s3 + $0x8] sm:$0xff]  ;;  %v956_v1 = vld [vmem:[%s1410_s3] sm:$0xff]  ;;  %s1414_s19 = smov (!%p215_p3, %s933_s19), 1  ;;  %vm314_vm0 = vcmask 1046528   ;;  %vm388_vm1 = vcmask 1045504   ;;  %vm795_vm2 = vcmask 261120  }
   0xc   : > { %814 = vmatpush.bf16.msra.mxu0 %v957_v0  ;;  %958 = vmatpush.bf16.msra.mxu1 %v957_v0  ;;  %v246_v2 = vld [vmem:[%s1408_s1] sm:$0xff]  ;;  %s964_s26 = smul.u32 80, %s1414_s19  ;;  %s955_s11 = sshll.u32 %s1414_s19, 5  ;;  %vm869_vm4 = vcmask 257024  }
   0xd   : > { %959 = vmatpush.bf16.msra.mxu2 %v957_v0  ;;  %960 = vmatpush.bf16.msra.mxu3 %v957_v0  ;;  %v1034_v3 = vperm.slane %v246_v2, 0  ;;  %v1036_v4 = vperm.slane %v246_v2, 1  ;;  %v1038_v5 = vperm.slane %v246_v2, 2  ;;  %v1045_v6 = vperm.slane %v246_v2, 3  ;;  %s1386_s14 = scalar_lea.vmem %s1412_s5, %s955_s11 }
   0xe   : > { %s1043_s29 = scalar_lea.vmem %s1407_s0, %s964_s26  ;;  %v1047_v7 = vperm.slane %v246_v2, 4  ;;  %v1049_v8 = vperm.slane %v246_v2, 5  ;;  %v1051_v9 = vperm.slane %v246_v2, 6  ;;  %v1065_v24 = vperm.slane %v246_v2, 7 }
   0xf   : > { %v226_v10 = vld [vmem:[%s1043_s29] sm:$0xf]  ;;  %v227_v11 = vld [vmem:[%s1043_s29 + $0x4] sm:$0x1]  ;;  %v228_v12 = vld [vmem:[%s1043_s29 + $0x8] sm:$0xf] }
  0x10   : > { %815 = vmatpush.bf16.msra.mxu0 %v956_v1  ;;  %961 = vmatpush.bf16.msra.mxu1 %v956_v1  ;;  %v229_v13 = vld [vmem:[%s1043_s29 + $0xc] sm:$0x1]  ;;  %v230_v14 = vld [vmem:[%s1043_s29 + $0x10] sm:$0xf]  ;;  %v231_v15 = vld [vmem:[%s1043_s29 + $0x14] sm:$0x1]  ;;  %v248_v16 = vunpack.c.l.bf16 %v226_v10  ;;  %v249_v17 = vunpack.c.l.bf16 %v228_v12  ;;  %v273_v18 = vunpack.c.l.bf16 %v227_v11 }
  0x11   : > { %962 = vmatpush.bf16.msra.mxu2 %v956_v1  ;;  %963 = vmatpush.bf16.msra.mxu3 %v956_v1  ;;  %v232_v19 = vld [vmem:[%s1043_s29 + $0x18] sm:$0xf]  ;;  %v233_v20 = vld [vmem:[%s1043_s29 + $0x1c] sm:$0x1]  ;;  %v1061_v21 = vunpack.c.l.bf16 %v230_v14  ;;  %v274_v22 = vunpack.c.l.bf16 %v229_v13  ;;  %v1063_v23 = vunpack.c.l.bf16 %v231_v15 }
  0x12   : > { %v1067_v25 = vunpack.c.l.bf16 %v232_v19  ;;  %v257_v26 = vmul.f32 %v1034_v3, %v248_v16  ;;  %v258_v27 = vmul.f32 %v1034_v3, %v249_v17  ;;  %v1071_v28 = vunpack.c.l.bf16 %v233_v20 }
  0x13   : > { %v282_v29 = vmul.f32 %v1036_v4, %v248_v16  ;;  %v283_v30 = vmul.f32 %v1036_v4, %v273_v18  ;;  %v284_v31 = vmul.f32 %v1036_v4, %v249_v17  ;;  %v285_v32 = vmul.f32 %v1036_v4, %v274_v22 }
  0x14   : > { %v356_v33 = vmul.f32 %v1038_v5, %v248_v16  ;;  %v357_v34 = vmul.f32 %v1038_v5, %v273_v18  ;;  %v358_v35 = vmul.f32 %v1038_v5, %v249_v17  ;;  %v359_v36 = vmul.f32 %v1038_v5, %v274_v22  ;;  %v1105_v16 = vld [vmem:[%s1408_s1 + $0x8] ss:$0 sm:$0xff] }
  0x15   : > { %v315_v37 = vrot.slane %v282_v29, 1  ;;  %v316_v38 = vrot.slane %v283_v30, 1  ;;  %v318_v39 = vrot.slane %v284_v31, 1  ;;  %v319_v40 = vrot.slane %v285_v32, 1 }
  0x16   : > { %v389_v41 = vrot.slane %v356_v33, 2  ;;  %v390_v42 = vrot.slane %v357_v34, 2  ;;  %v392_v43 = vrot.slane %v358_v35, 2  ;;  %v393_v44 = vrot.slane %v359_v36, 2 }
  0x17   : > { %v317_v45 = vsel %vm314_vm0, %v315_v37, %v316_v38  ;;  %v320_v46 = vsel %vm314_vm0, %v318_v39, %v319_v40  ;;  %v431_v47 = vmul.f32 %v1045_v6, %v249_v17  ;;  %v432_v48 = vmul.f32 %v1045_v6, %v1061_v21  ;;  %v234_v38 = vld [vmem:[%s1043_s29 + $0x20] sm:$0xf] }
  0x18   : > { %v347_v49 = vadd.f32 %v317_v45, %v257_v26  ;;  %v348_v50 = vadd.f32 %v320_v46, %v258_v27  ;;  %v391_v51 = vsel %vm388_vm1, %v389_v41, %v390_v42  ;;  %v394_v52 = vsel %vm388_vm1, %v392_v43, %v393_v44 }
  0x19   : > { %v449_v53 = vmul.f32 %v1047_v7, %v249_v17  ;;  %v450_v54 = vmul.f32 %v1047_v7, %v274_v22  ;;  %v451_v55 = vmul.f32 %v1047_v7, %v1061_v21  ;;  %v452_v56 = vmul.f32 %v1047_v7, %v1063_v23 }
  0x1a   : > { %v421_v57 = vadd.f32 %v391_v51, %v347_v49  ;;  %v422_v58 = vadd.f32 %v394_v52, %v348_v50  ;;  %v522_v59 = vmul.f32 %v1049_v8, %v249_v17  ;;  %v523_v60 = vmul.f32 %v1049_v8, %v274_v22  ;;  %v235_v51 = vld [vmem:[%s1043_s29 + $0x24] sm:$0x1] }
  0x1b   : > { %v481_v61 = vrot.slane %v449_v53, 1  ;;  %v482_v62 = vrot.slane %v450_v54, 1  ;;  %v484_v63 = vrot.slane %v451_v55, 1  ;;  %v485_v0 = vrot.slane %v452_v56, 1 }
  0x1c   : > { %v439_v1 = vadd.f32 %v431_v47, %v421_v57  ;;  %v440_v2 = vadd.f32 %v432_v48, %v422_v58  ;;  %v524_v10 = vmul.f32 %v1049_v8, %v1061_v21  ;;  %v525_v11 = vmul.f32 %v1049_v8, %v1063_v23  ;;  %v236_v47 = vld [vmem:[%s1043_s29 + $0x28] sm:$0xf]  ;;  %v1139_v57 = vld [vmem:[%s1409_s2] ss:$0 sm:$0xff]  ;;  %v237_v58 = vld [vmem:[%s1043_s29 + $0x2c] sm:$0x1] }
  0x1d   : > { %v483_v12 = vsel %vm314_vm0, %v481_v61, %v482_v62  ;;  %v486_v13 = vsel %vm314_vm0, %v484_v63, %v485_v0  ;;  %v554_v14 = vrot.slane %v522_v59, 2  ;;  %v555_v15 = vrot.slane %v523_v60, 2 }
  0x1e   : > { %v513_v17 = vadd.f32 %v483_v12, %v439_v1  ;;  %v514_v18 = vadd.f32 %v486_v13, %v440_v2  ;;  %v557_v19 = vrot.slane %v524_v10, 2  ;;  %v558_v20 = vrot.slane %v525_v11, 2 }
  0x1f   : > { %v556_v22 = vsel %vm388_vm1, %v554_v14, %v555_v15  ;;  %v596_v26 = vmul.f32 %v1051_v9, %v1061_v21  ;;  %v597_v27 = vmul.f32 %v1051_v9, %v1067_v25  ;;  %v614_v29 = vmul.f32 %v1065_v24, %v1061_v21 }
  0x20   : > { %v559_v30 = vsel %vm388_vm1, %v557_v19, %v558_v20  ;;  %v586_v31 = vadd.f32 %v556_v22, %v513_v17  ;;  %v615_v32 = vmul.f32 %v1065_v24, %v1063_v23  ;;  %v616_v33 = vmul.f32 %v1065_v24, %v1067_v25 }
  0x21   : > { %v587_v34 = vadd.f32 %v559_v30, %v514_v18  ;;  %v617_v35 = vmul.f32 %v1065_v24, %v1071_v28  ;;  %v646_v36 = vrot.slane %v614_v29, 1  ;;  %v687_v37 = vmul.f32 %v1105_v16, %v1061_v21 }
  0x22   : > { %v604_v39 = vadd.f32 %v596_v26, %v586_v31  ;;  %v647_v40 = vrot.slane %v615_v32, 1  ;;  %v649_v41 = vrot.slane %v616_v33, 1  ;;  %v688_v42 = vmul.f32 %v1105_v16, %v1063_v23 }
  0x23   : > { %v605_v43 = vadd.f32 %v597_v27, %v587_v34  ;;  %v650_v44 = vrot.slane %v617_v35, 1  ;;  %v689_v45 = vmul.f32 %v1105_v16, %v1067_v25  ;;  %v690_v46 = vmul.f32 %v1105_v16, %v1071_v28 }
  0x24   : > { %v648_v48 = vsel %vm314_vm0, %v646_v36, %v647_v40  ;;  %v719_v49 = vrot.slane %v687_v37, 2  ;;  %v720_v50 = vrot.slane %v688_v42, 2  ;;  %v1133_v52 = vunpack.c.l.bf16 %v234_v38 }
  0x25   : > { %v651_v53 = vsel %vm314_vm0, %v649_v41, %v650_v44  ;;  %v678_v54 = vadd.f32 %v648_v48, %v604_v39  ;;  %v722_v55 = vrot.slane %v689_v45, 2  ;;  %v723_v56 = vrot.slane %v690_v46, 2 }
  0x26   : > { %v679_v59 = vadd.f32 %v651_v53, %v605_v43  ;;  %v721_v60 = vsel %vm388_vm1, %v719_v49, %v720_v50  ;;  %v1143_v61 = vunpack.c.l.bf16 %v236_v47  ;;  %v259_v62 = vmul.f32 %v1034_v3, %v1061_v21 }
  0x27   : > { %v724_v63 = vsel %vm388_vm1, %v722_v55, %v723_v56  ;;  %v751_v0 = vadd.f32 %v721_v60, %v678_v54  ;;  %v260_v1 = vmul.f32 %v1034_v3, %v1067_v25  ;;  %v1150_v2 = vunpack.c.l.bf16 %v235_v51 }
  0x28   : > { %v752_v10 = vadd.f32 %v724_v63, %v679_v59  ;;  %v1152_v11 = vunpack.c.l.bf16 %v237_v58  ;;  %v286_v12 = vmul.f32 %v1036_v4, %v1061_v21  ;;  %v287_v13 = vmul.f32 %v1036_v4, %v1063_v23 }
  0x29   : > { %v763_v14 = vadd.f32 %v1139_v57, %v751_v0  ;;  %v288_v15 = vmul.f32 %v1036_v4, %v1067_v25  ;;  %v289_v17 = vmul.f32 %v1036_v4, %v1071_v28  ;;  %v360_v18 = vmul.f32 %v1038_v5, %v1061_v21 }
  0x2a   : > { %v764_v19 = vadd.f32 %v1139_v57, %v752_v10  ;;  %v321_v20 = vrot.slane %v286_v12, 1  ;;  %v322_v22 = vrot.slane %v287_v13, 1  ;;  %v361_v26 = vmul.f32 %v1038_v5, %v1063_v23 }
  0x2b   : > { %v324_v27 = vrot.slane %v288_v15, 1  ;;  %v325_v29 = vrot.slane %v289_v17, 1  ;;  %v362_v30 = vmul.f32 %v1038_v5, %v1067_v25  ;;  %v363_v31 = vmul.f32 %v1038_v5, %v1071_v28 }
  0x2c   : > { %v771_v32 = vpack.c.bf16 %v764_v19, %v763_v14  ;;  %v323_v33 = vsel %vm314_vm0, %v321_v20, %v322_v22  ;;  %v395_v34 = vrot.slane %v360_v18, 2  ;;  %v396_v21 = vrot.slane %v361_v26, 2 }
  0x2d   : > { %v326_v35 = vsel %vm314_vm0, %v324_v27, %v325_v29  ;;  %v349_v36 = vadd.f32 %v323_v33, %v259_v62  ;;  %v398_v37 = vrot.slane %v362_v30, 2  ;;  %v399_v38 = vrot.slane %v363_v31, 2 }
  0x2e   : > { %949 = vmatmul.msk.bf16.vlgmr.msra.gmra.mxu0 %vm795_vm2, %v771_v32  ;;  %v350_v23 = vadd.f32 %v326_v35, %v260_v1  ;;  %v397_v39 = vsel %vm388_vm1, %v395_v34, %v396_v21  ;;  %v433_v40 = vmul.f32 %v1045_v6, %v1067_v25  ;;  %v434_v41 = vmul.f32 %v1045_v6, %v1133_v52 }
  0x2f   : > { %v400_v42 = vsel %vm388_vm1, %v398_v37, %v399_v38  ;;  %v423_v43 = vadd.f32 %v397_v39, %v349_v36  ;;  %v453_v44 = vmul.f32 %v1047_v7, %v1067_v25  ;;  %v454_v45 = vmul.f32 %v1047_v7, %v1071_v28  ;;  %v238_v37 = vld [vmem:[%s1043_s29 + $0x30] sm:$0xf]  ;;  %v240_v38 = vld [vmem:[%s1043_s29 + $0x38] sm:$0xf] }
  0x30   : > { %v424_v46 = vadd.f32 %v400_v42, %v350_v23  ;;  %v455_v47 = vmul.f32 %v1047_v7, %v1133_v52  ;;  %v456_v48 = vmul.f32 %v1047_v7, %v1150_v2  ;;  %v526_v49 = vmul.f32 %v1049_v8, %v1067_v25 }
  0x31   : > { %v441_v50 = vadd.f32 %v433_v40, %v423_v43  ;;  %v487_v51 = vrot.slane %v453_v44, 1  ;;  %v488_v53 = vrot.slane %v454_v45, 1  ;;  %v527_v54 = vmul.f32 %v1049_v8, %v1071_v28 }
  0x32   : > { %v442_v55 = vadd.f32 %v434_v41, %v424_v46  ;;  %v490_v56 = vrot.slane %v455_v47, 1  ;;  %v491_v58 = vrot.slane %v456_v48, 1  ;;  %v528_v59 = vmul.f32 %v1049_v8, %v1133_v52  ;;  %v239_v46 = vld [vmem:[%s1043_s29 + $0x34] sm:$0x1]  ;;  %v241_v47 = vld [vmem:[%s1043_s29 + $0x3c] sm:$0x1] }
  0x33   : > { %v489_v60 = vsel %vm314_vm0, %v487_v51, %v488_v53  ;;  %v529_v62 = vmul.f32 %v1049_v8, %v1150_v2  ;;  %v560_v63 = vrot.slane %v526_v49, 2  ;;  %v561_v0 = vrot.slane %v527_v54, 2 }
  0x34   : > { %v492_v25 = vsel %vm314_vm0, %v490_v56, %v491_v58  ;;  %v515_v1 = vadd.f32 %v489_v60, %v441_v50  ;;  %v563_v10 = vrot.slane %v528_v59, 2  ;;  %v598_v28 = vmul.f32 %v1051_v9, %v1133_v52 }
  0x35   : > { %v516_v12 = vadd.f32 %v492_v25, %v442_v55  ;;  %v562_v13 = vsel %vm388_vm1, %v560_v63, %v561_v0  ;;  %v564_v14 = vrot.slane %v529_v62, 2  ;;  %v599_v15 = vmul.f32 %v1051_v9, %v1143_v61 }
  0x36   : > { %v588_v17 = vadd.f32 %v562_v13, %v515_v1  ;;  %v618_v18 = vmul.f32 %v1065_v24, %v1133_v52  ;;  %v619_v19 = vmul.f32 %v1065_v24, %v1150_v2  ;;  %v620_v20 = vmul.f32 %v1065_v24, %v1143_v61 }
  0x37   : > { %v565_v22 = vsel %vm388_vm1, %v563_v10, %v564_v14  ;;  %v621_v26 = vmul.f32 %v1065_v24, %v1152_v11  ;;  %v691_v27 = vmul.f32 %v1105_v16, %v1133_v52  ;;  %v692_v29 = vmul.f32 %v1105_v16, %v1150_v2 }
  0x38   : > { %v589_v30 = vadd.f32 %v565_v22, %v516_v12  ;;  %v606_v31 = vadd.f32 %v598_v28, %v588_v17  ;;  %v652_v32 = vrot.slane %v618_v18, 1  ;;  %v653_v33 = vrot.slane %v619_v19, 1 }
  0x39   : > { %v655_v34 = vrot.slane %v620_v20, 1  ;;  %v656_v21 = vrot.slane %v621_v26, 1  ;;  %v693_v35 = vmul.f32 %v1105_v16, %v1143_v61  ;;  %v694_v36 = vmul.f32 %v1105_v16, %v1152_v11 }
  0x3a   : > { %v607_v23 = vadd.f32 %v599_v15, %v589_v30  ;;  %v654_v39 = vsel %vm314_vm0, %v652_v32, %v653_v33  ;;  %v725_v40 = vrot.slane %v691_v27, 2  ;;  %v726_v41 = vrot.slane %v692_v29, 2 }
  0x3b   : > { %v657_v42 = vsel %vm314_vm0, %v655_v34, %v656_v21  ;;  %v680_v43 = vadd.f32 %v654_v39, %v606_v31  ;;  %v728_v44 = vrot.slane %v693_v35, 2  ;;  %v729_v45 = vrot.slane %v694_v36, 2 }
  0x3c   : > { %v681_v48 = vadd.f32 %v657_v42, %v607_v23  ;;  %v727_v49 = vsel %vm388_vm1, %v725_v40, %v726_v41  ;;  %v1228_v50 = vunpack.c.l.bf16 %v238_v37  ;;  %v1230_v51 = vunpack.c.l.bf16 %v240_v38 }
  0x3d   : > { %v730_v53 = vsel %vm388_vm1, %v728_v44, %v729_v45  ;;  %v753_v54 = vadd.f32 %v727_v49, %v680_v43  ;;  %v261_v55 = vmul.f32 %v1034_v3, %v1133_v52  ;;  %v262_v56 = vmul.f32 %v1034_v3, %v1143_v61 }
  0x3e   : > { %v754_v58 = vadd.f32 %v730_v53, %v681_v48  ;;  %v1237_v59 = vunpack.c.l.bf16 %v239_v46  ;;  %v1239_v60 = vunpack.c.l.bf16 %v241_v47  ;;  %v290_v62 = vmul.f32 %v1036_v4, %v1133_v52 }
  0x3f   : > { %v765_v63 = vadd.f32 %v1139_v57, %v753_v54  ;;  %v291_v0 = vmul.f32 %v1036_v4, %v1150_v2  ;;  %v292_v25 = vmul.f32 %v1036_v4, %v1143_v61  ;;  %v293_v1 = vmul.f32 %v1036_v4, %v1152_v11 }
  0x40   : > { %v766_v10 = vadd.f32 %v1139_v57, %v754_v58  ;;  %v327_v28 = vrot.slane %v290_v62, 1  ;;  %v364_v12 = vmul.f32 %v1038_v5, %v1133_v52  ;;  %v365_v13 = vmul.f32 %v1038_v5, %v1150_v2 }
  0x41   : > { %v328_v14 = vrot.slane %v291_v0, 1  ;;  %v330_v15 = vrot.slane %v292_v25, 1  ;;  %v331_v17 = vrot.slane %v293_v1, 1  ;;  %v366_v18 = vmul.f32 %v1038_v5, %v1143_v61 }
  0x42   : > { %v772_v19 = vpack.c.bf16 %v766_v10, %v765_v63  ;;  %v367_v20 = vmul.f32 %v1038_v5, %v1152_v11  ;;  %v401_v22 = vrot.slane %v364_v12, 2  ;;  %v402_v26 = vrot.slane %v365_v13, 2 }
  0x43   : > { %v329_v27 = vsel %vm314_vm0, %v327_v28, %v328_v14  ;;  %v332_v29 = vsel %vm314_vm0, %v330_v15, %v331_v17  ;;  %v404_v52 = vrot.slane %v366_v18, 2  ;;  %v435_v2 = vmul.f32 %v1045_v6, %v1143_v61 }
  0x44   : > { %950 = vmatmul.msk.bf16.vlgmr.msra.gmra.mxu1 %vm795_vm2, %v772_v19  ;;  %v351_v30 = vadd.f32 %v329_v27, %v261_v55  ;;  %v352_v31 = vadd.f32 %v332_v29, %v262_v56  ;;  %v403_v32 = vsel %vm388_vm1, %v401_v22, %v402_v26  ;;  %v405_v33 = vrot.slane %v367_v20, 2 }
  0x45   : > { %v436_v34 = vmul.f32 %v1045_v6, %v1228_v50  ;;  %v457_v21 = vmul.f32 %v1047_v7, %v1143_v61  ;;  %v458_v35 = vmul.f32 %v1047_v7, %v1152_v11  ;;  %v459_v36 = vmul.f32 %v1047_v7, %v1228_v50 }
  0x46   : > { %v406_v37 = vsel %vm388_vm1, %v404_v52, %v405_v33  ;;  %v425_v38 = vadd.f32 %v403_v32, %v351_v30  ;;  %v460_v23 = vmul.f32 %v1047_v7, %v1237_v59  ;;  %v530_v39 = vmul.f32 %v1049_v8, %v1143_v61 }
  0x47   : > { %v426_v40 = vadd.f32 %v406_v37, %v352_v31  ;;  %v493_v41 = vrot.slane %v457_v21, 1  ;;  %v494_v42 = vrot.slane %v458_v35, 1  ;;  %v496_v43 = vrot.slane %v459_v36, 1 }
  0x48   : > { %v443_v44 = vadd.f32 %v435_v2, %v425_v38  ;;  %v497_v45 = vrot.slane %v460_v23, 1  ;;  %v531_v46 = vmul.f32 %v1049_v8, %v1152_v11  ;;  %v532_v47 = vmul.f32 %v1049_v8, %v1228_v50 }
  0x49   : > { %v444_v48 = vadd.f32 %v436_v34, %v426_v40  ;;  %v495_v49 = vsel %vm314_vm0, %v493_v41, %v494_v42  ;;  %v533_v53 = vmul.f32 %v1049_v8, %v1237_v59  ;;  %v566_v54 = vrot.slane %v530_v39, 2 }
  0x4a   : > { %v498_v61 = vsel %vm314_vm0, %v496_v43, %v497_v45  ;;  %v517_v55 = vadd.f32 %v495_v49, %v443_v44  ;;  %v567_v56 = vrot.slane %v531_v46, 2  ;;  %v569_v58 = vrot.slane %v532_v47, 2 }
  0x4b   : > { %v518_v62 = vadd.f32 %v498_v61, %v444_v48  ;;  %v570_v63 = vrot.slane %v533_v53, 2  ;;  %v600_v11 = vmul.f32 %v1051_v9, %v1228_v50  ;;  %v601_v0 = vmul.f32 %v1051_v9, %v1230_v51  ;;  %v242_v53 = vld [vmem:[%s1043_s29 + $0x40] sm:$0xf] }
  0x4c   : > { %v568_v25 = vsel %vm388_vm1, %v566_v54, %v567_v56  ;;  %v622_v1 = vmul.f32 %v1065_v24, %v1228_v50  ;;  %v623_v10 = vmul.f32 %v1065_v24, %v1237_v59  ;;  %v624_v28 = vmul.f32 %v1065_v24, %v1230_v51 }
  0x4d   : > { %v571_v12 = vsel %vm388_vm1, %v569_v58, %v570_v63  ;;  %v590_v13 = vadd.f32 %v568_v25, %v517_v55  ;;  %v625_v14 = vmul.f32 %v1065_v24, %v1239_v60  ;;  %v695_v15 = vmul.f32 %v1105_v16, %v1228_v50 }
  0x4e   : > { %v591_v17 = vadd.f32 %v571_v12, %v518_v62  ;;  %v658_v18 = vrot.slane %v622_v1, 1  ;;  %v659_v19 = vrot.slane %v623_v10, 1  ;;  %v661_v20 = vrot.slane %v624_v28, 1 }
  0x4f   : > { %v608_v22 = vadd.f32 %v600_v11, %v590_v13  ;;  %v662_v26 = vrot.slane %v625_v14, 1  ;;  %v696_v27 = vmul.f32 %v1105_v16, %v1237_v59  ;;  %v697_v29 = vmul.f32 %v1105_v16, %v1230_v51 }
  0x50   : > { %v609_v52 = vadd.f32 %v601_v0, %v591_v17  ;;  %v660_v2 = vsel %vm314_vm0, %v658_v18, %v659_v19  ;;  %v698_v30 = vmul.f32 %v1105_v16, %v1239_v60  ;;  %v731_v31 = vrot.slane %v695_v15, 2 }
  0x51   : > { %v663_v32 = vsel %vm314_vm0, %v661_v20, %v662_v26  ;;  %v682_v33 = vadd.f32 %v660_v2, %v608_v22  ;;  %v732_v34 = vrot.slane %v696_v27, 2  ;;  %v734_v21 = vrot.slane %v697_v29, 2  ;;  %v244_v29 = vld [vmem:[%s1043_s29 + $0x48] sm:$0xf] }
  0x52   : > { %v683_v35 = vadd.f32 %v663_v32, %v609_v52  ;;  %v735_v36 = vrot.slane %v698_v30, 2  ;;  %v263_v37 = vmul.f32 %v1034_v3, %v1228_v50  ;;  %v264_v38 = vmul.f32 %v1034_v3, %v1230_v51 }
  0x53   : > { %v733_v23 = vsel %vm388_vm1, %v731_v31, %v732_v34  ;;  %v294_v39 = vmul.f32 %v1036_v4, %v1228_v50  ;;  %v295_v40 = vmul.f32 %v1036_v4, %v1237_v59  ;;  %v296_v41 = vmul.f32 %v1036_v4, %v1230_v51 }
  0x54   : > { %v736_v42 = vsel %vm388_vm1, %v734_v21, %v735_v36  ;;  %v755_v43 = vadd.f32 %v733_v23, %v682_v33  ;;  %v297_v44 = vmul.f32 %v1036_v4, %v1239_v60  ;;  %v368_v3 = vmul.f32 %v1038_v5, %v1228_v50  ;;  %v243_v4 = vld [vmem:[%s1043_s29 + $0x44] sm:$0x1]  ;;  %v245_v21 = vld [vmem:[%s1043_s29 + $0x4c] sm:$0x1] }
  0x55   : > { %v756_v45 = vadd.f32 %v736_v42, %v683_v35  ;;  %v333_v46 = vrot.slane %v294_v39, 1  ;;  %v334_v47 = vrot.slane %v295_v40, 1  ;;  %v336_v48 = vrot.slane %v296_v41, 1 }
  0x56   : > { %v767_v49 = vadd.f32 %v1139_v57, %v755_v43  ;;  %v337_v54 = vrot.slane %v297_v44, 1  ;;  %v369_v61 = vmul.f32 %v1038_v5, %v1237_v59  ;;  %v370_v55 = vmul.f32 %v1038_v5, %v1230_v51 }
  0x57   : > { %v768_v56 = vadd.f32 %v1139_v57, %v756_v45  ;;  %v335_v58 = vsel %vm314_vm0, %v333_v46, %v334_v47  ;;  %v371_v50 = vmul.f32 %v1038_v5, %v1239_v60  ;;  %v407_v62 = vrot.slane %v368_v3, 2 }
  0x58   : > { %v338_v63 = vsel %vm314_vm0, %v336_v48, %v337_v54  ;;  %v353_v11 = vadd.f32 %v335_v58, %v263_v37  ;;  %v408_v0 = vrot.slane %v369_v61, 2  ;;  %v410_v25 = vrot.slane %v370_v55, 2 }
  0x59   : > { %v773_v1 = vpack.c.bf16 %v768_v56, %v767_v49  ;;  %v354_v10 = vadd.f32 %v338_v63, %v264_v38  ;;  %v411_v59 = vrot.slane %v371_v50, 2  ;;  %v429_v28 = vunpack.c.l.bf16 %v242_v53 }
  0x5a   : > { %v409_v12 = vsel %vm388_vm1, %v407_v62, %v408_v0  ;;  %v437_v13 = vmul.f32 %v1045_v6, %v1230_v51  ;;  %v447_v14 = vunpack.c.l.bf16 %v243_v4  ;;  %v461_v5 = vmul.f32 %v1047_v7, %v1230_v51 }
  0x5b   : > { %951 = vmatmul.msk.bf16.vlgmr.msra.gmra.mxu2 %vm795_vm2, %v773_v1  ;;  %v412_v15 = vsel %vm388_vm1, %v410_v25, %v411_v59  ;;  %v427_v17 = vadd.f32 %v409_v12, %v353_v11  ;;  %v438_v18 = vmul.f32 %v1045_v6, %v429_v28  ;;  %v462_v19 = vmul.f32 %v1047_v7, %v1239_v60 }
  0x5c   : > { %v428_v20 = vadd.f32 %v412_v15, %v354_v10  ;;  %v463_v22 = vmul.f32 %v1047_v7, %v429_v28  ;;  %v464_v26 = vmul.f32 %v1047_v7, %v447_v14  ;;  %v499_v27 = vrot.slane %v461_v5, 1 }
  0x5d   : > { %v445_v52 = vadd.f32 %v437_v13, %v427_v17  ;;  %v500_v2 = vrot.slane %v462_v19, 1  ;;  %v534_v30 = vmul.f32 %v1049_v8, %v1230_v51  ;;  %v535_v31 = vmul.f32 %v1049_v8, %v1239_v60  ;;  %v975_v17 = vld [vmem:[%s1411_s4] ss:$0 sm:$0xff] }
  0x5e   : > { %v446_v32 = vadd.f32 %v438_v18, %v428_v20  ;;  %v502_v6 = vrot.slane %v463_v22, 1  ;;  %v503_v33 = vrot.slane %v464_v26, 1  ;;  %v536_v34 = vmul.f32 %v1049_v8, %v429_v28 }
  0x5f   : > { %v501_v35 = vsel %vm314_vm0, %v499_v27, %v500_v2  ;;  %v537_v7 = vmul.f32 %v1049_v8, %v447_v14  ;;  %v572_v36 = vrot.slane %v534_v30, 2  ;;  %v573_v37 = vrot.slane %v535_v31, 2 }
  0x60   : > { %v504_v38 = vsel %vm314_vm0, %v502_v6, %v503_v33  ;;  %v519_v23 = vadd.f32 %v501_v35, %v445_v52  ;;  %v575_v39 = vrot.slane %v536_v34, 2  ;;  %v594_v51 = vunpack.c.l.bf16 %v244_v29 }
  0x61   : > { %v520_v40 = vadd.f32 %v504_v38, %v446_v32  ;;  %v574_v60 = vsel %vm388_vm1, %v572_v36, %v573_v37  ;;  %v576_v41 = vrot.slane %v537_v7, 2  ;;  %v602_v42 = vmul.f32 %v1051_v9, %v429_v28 }
  0x62   : > { %v592_v43 = vadd.f32 %v574_v60, %v519_v23  ;;  %v603_v44 = vmul.f32 %v1051_v9, %v594_v51  ;;  %v612_v3 = vunpack.c.l.bf16 %v245_v21  ;;  %v626_v45 = vmul.f32 %v1065_v24, %v429_v28 }
  0x63   : > { %v577_v8 = vsel %vm388_vm1, %v575_v39, %v576_v41  ;;  %v627_v46 = vmul.f32 %v1065_v24, %v447_v14  ;;  %v628_v47 = vmul.f32 %v1065_v24, %v594_v51  ;;  %v699_v48 = vmul.f32 %v1105_v16, %v429_v28 }
  0x64   : > { %v593_v49 = vadd.f32 %v577_v8, %v520_v40  ;;  %v610_v53 = vadd.f32 %v602_v42, %v592_v43  ;;  %v629_v54 = vmul.f32 %v1065_v24, %v612_v3  ;;  %v664_v61 = vrot.slane %v626_v45, 1 }
  0x65   : > { %v665_v55 = vrot.slane %v627_v46, 1  ;;  %v667_v56 = vrot.slane %v628_v47, 1  ;;  %v700_v9 = vmul.f32 %v1105_v16, %v447_v14  ;;  %v701_v4 = vmul.f32 %v1105_v16, %v594_v51 }
  0x66   : > { %v611_v58 = vadd.f32 %v603_v44, %v593_v49  ;;  %v668_v50 = vrot.slane %v629_v54, 1  ;;  %v702_v62 = vmul.f32 %v1105_v16, %v612_v3  ;;  %v737_v63 = vrot.slane %v699_v48, 2 }
  0x67   : > { %v666_v11 = vsel %vm314_vm0, %v664_v61, %v665_v55  ;;  %v738_v0 = vrot.slane %v700_v9, 2  ;;  %v740_v25 = vrot.slane %v701_v4, 2 }
  0x68   : > { %v669_v1 = vsel %vm314_vm0, %v667_v56, %v668_v50  ;;  %v684_v24 = vadd.f32 %v666_v11, %v610_v53  ;;  %v741_v10 = vrot.slane %v702_v62, 2 }
  0x69   : > { %v685_v59 = vadd.f32 %v669_v1, %v611_v58  ;;  %v739_v28 = vsel %vm388_vm1, %v737_v63, %v738_v0 }
  0x6a   : > { %v742_v12 = vsel %vm388_vm1, %v740_v25, %v741_v10  ;;  %v757_v13 = vadd.f32 %v739_v28, %v684_v24 }
  0x6b   : > { %v758_v14 = vadd.f32 %v742_v12, %v685_v59 }
  0x6c   : > { %v769_v5 = vadd.f32 %v1139_v57, %v757_v13 }
  0x6d   : > { %v770_v16 = vadd.f32 %v1139_v57, %v758_v14 }
  0x6f   : > { %v774_v15 = vpack.c.bf16 %v770_v16, %v769_v5 }
  0x71   : > { %952 = vmatmul.msk.bf16.vlgmr.msra.gmra.mxu3 %vm795_vm2, %v774_v15 }
  0xab   : > { %v817_v18 = vpop.f32.mrf.mxu0 }
  0xac   : > { %v818_v19 = vadd.f32 %v975_v17, %v817_v18 }
  0xae   : > { %vm837_vm3 = vcmp.gt.f32.partialorder %v818_v19, 0.0  ;;  %v845_v20 = vmul.f32 0.1, %v818_v19 }
  0xb0   : > { %v853_v57 = vsel %vm837_vm3, %v818_v19, %v845_v20 }
  0xb1   : > { %v861_v22 = vpack.c.bf16 %v853_v57, %v853_v57 }
  0xb3   : > { %870 = vst.msk [vmem:[%s1386_s14] sm:$0xf] %vm869_vm4, %v861_v22  ;;  %v819_v30 = vpop.f32.mrf.mxu0 }
  0xb4   : > { %v820_v32 = vadd.f32 %v975_v17, %v819_v30 }
  0xb6   : > { %vm838_vm6 = vcmp.gt.f32.partialorder %v820_v32, 0.0  ;;  %v846_v33 = vmul.f32 0.1, %v820_v32 }
  0xb8   : > { %v854_v21 = vsel %vm838_vm6, %v820_v32, %v846_v33 }
  0xb9   : > { %v862_v7 = vpack.c.bf16 %v854_v21, %v854_v21 }
  0xbb   : > { %871 = vst.msk [vmem:[%s1386_s14 + $0x4] sm:$0xf] %vm869_vm4, %v862_v7 }
  0xc1   : > { %v822_v26 = vpop.f32.mrf.mxu1 }
  0xc2   : > { %v823_v27 = vadd.f32 %v975_v17, %v822_v26 }
  0xc4   : > { %vm839_vm5 = vcmp.gt.f32.partialorder %v823_v27, 0.0  ;;  %v847_v29 = vmul.f32 0.1, %v823_v27 }
  0xc6   : > { %v855_v52 = vsel %vm839_vm5, %v823_v27, %v847_v29 }
  0xc7   : > { %v863_v2 = vpack.c.bf16 %v855_v52, %v855_v52 }
  0xc9   : > { %872 = vst.msk [vmem:[%s1386_s14 + $0x8] sm:$0xf] %vm869_vm4, %v863_v2  ;;  %v824_v31 = vpop.f32.mrf.mxu1 }
  0xca   : > { %v825_v6 = vadd.f32 %v975_v17, %v824_v31 }
  0xcc   : > { %vm840_vm7 = vcmp.gt.f32.partialorder %v825_v6, 0.0  ;;  %v848_v34 = vmul.f32 0.1, %v825_v6 }
  0xce   : > { %v856_v35 = vsel %vm840_vm7, %v825_v6, %v848_v34 }
  0xcf   : > { %v864_v36 = vpack.c.bf16 %v856_v35, %v856_v35 }
  0xd1   : > { %873 = vst.msk [vmem:[%s1386_s14 + $0xc] sm:$0xf] %vm869_vm4, %v864_v36 }
  0xde   : > { %v827_v37 = vpop.f32.mrf.mxu2 }
  0xdf   : > { %v828_v38 = vadd.f32 %v975_v17, %v827_v37 }
  0xe1   : > { %vm841_vm8 = vcmp.gt.f32.partialorder %v828_v38, 0.0  ;;  %v849_v23 = vmul.f32 0.1, %v828_v38 }
  0xe3   : > { %v857_v39 = vsel %vm841_vm8, %v828_v38, %v849_v23 }
  0xe4   : > { %v865_v51 = vpack.c.bf16 %v857_v39, %v857_v39 }
  0xe6   : > { %874 = vst.msk [vmem:[%s1386_s14 + $0x10] sm:$0xf] %vm869_vm4, %v865_v51  ;;  %v829_v40 = vpop.f32.mrf.mxu2 }
  0xe7   : > { %v830_v60 = vadd.f32 %v975_v17, %v829_v40 }
  0xe9   : > { %vm842_vm9 = vcmp.gt.f32.partialorder %v830_v60, 0.0  ;;  %v850_v41 = vmul.f32 0.1, %v830_v60 }
  0xeb   : > { %v858_v42 = vsel %vm842_vm9, %v830_v60, %v850_v41 }
  0xec   : > { %v866_v43 = vpack.c.bf16 %v858_v42, %v858_v42 }
  0xee   : > { %875 = vst.msk [vmem:[%s1386_s14 + $0x14] sm:$0xf] %vm869_vm4, %v866_v43 }
  0xf4   : > { %v832_v44 = vpop.f32.mrf.mxu3 }
  0xf5   : > { %v833_v3 = vadd.f32 %v975_v17, %v832_v44 }
  0xf7   : > { %vm843_vm10 = vcmp.gt.f32.partialorder %v833_v3, 0.0  ;;  %v851_v45 = vmul.f32 0.1, %v833_v3 }
  0xf9   : > { %v859_v8 = vsel %vm843_vm10, %v833_v3, %v851_v45 }
  0xfa   : > { %v867_v46 = vpack.c.bf16 %v859_v8, %v859_v8 }
  0xfc   : > { %876 = vst.msk [vmem:[%s1386_s14 + $0x18] sm:$0xf] %vm869_vm4, %v867_v46  ;;  %v834_v47 = vpop.f32.mrf.mxu3 }
  0xfd   : > { %v835_v48 = vadd.f32 %v975_v17, %v834_v47 }
  0xff   : > { %vm844_vm11 = vcmp.gt.f32.partialorder %v835_v48, 0.0  ;;  %v852_v49 = vmul.f32 0.1, %v835_v48 }
 0x101   : > { %v860_v53 = vsel %vm844_vm11, %v835_v48, %v852_v49 }
 0x102   : > { %v868_v54 = vpack.c.bf16 %v860_v53, %v860_v53 }
 0x104   : > { %877 = vst.msk [vmem:[%s1386_s14 + $0x1c] sm:$0xf] %vm869_vm4, %v868_v54 }
 0x105 PF: > { %s15_s18 = sadd.s32 1, %s982_s18  }
 0x106   : > { %p12_p4 = scmp.ge.s32.totalorder %s15_s18, 4  }
 0x108   :  { %14 = sbr.rel (!%p12_p4) target bundleno = 1 (0x1), region = 70 }

// kernel: style_network_forward.21
= control target key start
LH: loop header
LB: loop body
LE: loop exit
PB: predicated region body
PF: predicated region fallthrough
CT: control target
= control target key end

     0   :  { %s1508_s12 = smov 0   ;;  %s2070_s0 = inlined_call_operand.vmem [shape: bf16[512,128], index: 0, kind: input, shape index: {}]   ;;  %s2071_s1 = inlined_call_operand.vmem [shape: bf16[128,128], index: 1, kind: input, shape index: {}]   ;;  %s2072_s2 = inlined_call_operand.vmem [shape: f32[1,128], index: 2, kind: input, shape index: {}]   ;;  %s2073_s3 = inlined_call_operand.vmem [shape: f32[512,128], index: 3, kind: output, shape index: {}]  }
   0x1 LB: > { %s1155_s13 = sadd.s32 4294967295, %s1486_s12   ;;  %p1159_p0 = scmp.ge.s32.totalorder %s1486_s12, 1  ;;  %s1486_s12 = sphi %s1508_s12, %s13_s12  }
   0x2   : > { %p138_p1 = scmp.lt.s32.totalorder %s1486_s12, 3 }
   0x4   : > { %p139_p2 = pnand %p1159_p0, %p138_p1 }
   0x5   : > { %s1160_s22 = sshll.u32 (!%p139_p2), %s1155_s13, 5 }
   0x6   : > { %142 = sbr.rel (%p139_p2) target bundleno = 323 (0x143), region = 32  ;;  %p163_p3 = scmp.lt.s32.totalorder (!%p139_p2), %s1160_s22, 63 }
   0xb   : > { %v1317_v0 = vld [vmem:[%s2071_s1 + $0x38] sm:$0xff]  ;;  %v1316_v1 = vld [vmem:[%s2071_s1 + $0x30] sm:$0xff]  ;;  %v1315_v2 = vld [vmem:[%s2071_s1 + $0x28] sm:$0xff]  ;;  %s2121_s22 = smov (!%p163_p3, %s1160_s22), 63 }
   0xc   : > { %370 = vmatpush.bf16.msra.mxu0 %v1317_v0  ;;  %1318 = vmatpush.bf16.msra.mxu1 %v1317_v0  ;;  %v1314_v3 = vld [vmem:[%s2071_s1 + $0x20] sm:$0xff]  ;;  %v1313_v4 = vld [vmem:[%s2071_s1 + $0x18] sm:$0xff]  ;;  %v1312_v5 = vld [vmem:[%s2071_s1 + $0x10] sm:$0xff]  ;;  %s1161_s29 = sshll.u32 %s2121_s22, 2  ;;  %s1163_s10 = sshll.u32 %s2121_s22, 3 }
   0xd   : > { %1319 = vmatpush.bf16.msra.mxu2 %v1317_v0  ;;  %1320 = vmatpush.bf16.msra.mxu3 %v1317_v0  ;;  %v1311_v6 = vld [vmem:[%s2071_s1 + $0x8] sm:$0xff]  ;;  %v1310_v7 = vld [vmem:[%s2071_s1] sm:$0xff]  ;;  %s1546_s7 = scalar_lea.vmem %s2070_s0, %s1161_s29  ;;  %s1622_s14 = scalar_lea.vmem %s2073_s3, %s1163_s10 }
   0xe   : > { %v1294_v8 = vld [vmem:[%s1546_s7] sm:$0xff]  ;;  %v1295_v12 = vld [vmem:[%s1546_s7 + $0x8] sm:$0xff]  ;;  %v1296_v16 = vld [vmem:[%s1546_s7 + $0x10] sm:$0xff] }
   0xf   : > { %v1298_v9 = vld [vmem:[%s1546_s7 + $0x20] sm:$0xff]  ;;  %v1299_v13 = vld [vmem:[%s1546_s7 + $0x28] sm:$0xff]  ;;  %v1300_v17 = vld [vmem:[%s1546_s7 + $0x30] sm:$0xff] }
  0x10   : > { %371 = vmatpush.bf16.msra.mxu0 %v1316_v1  ;;  %1321 = vmatpush.bf16.msra.mxu1 %v1316_v1  ;;  %v1302_v10 = vld [vmem:[%s1546_s7 + $0x40] sm:$0xff]  ;;  %v1303_v14 = vld [vmem:[%s1546_s7 + $0x48] sm:$0xff]  ;;  %v1304_v18 = vld [vmem:[%s1546_s7 + $0x50] sm:$0xff] }
  0x11   : > { %1322 = vmatpush.bf16.msra.mxu2 %v1316_v1  ;;  %1323 = vmatpush.bf16.msra.mxu3 %v1316_v1  ;;  %v1306_v11 = vld [vmem:[%s1546_s7 + $0x60] sm:$0xff]  ;;  %v1307_v15 = vld [vmem:[%s1546_s7 + $0x68] sm:$0xff]  ;;  %v1308_v19 = vld [vmem:[%s1546_s7 + $0x70] sm:$0xff] }
  0x12   : > { %v1297_v20 = vld [vmem:[%s1546_s7 + $0x18] sm:$0xff]  ;;  %v1567_v24 = vld [vmem:[%s2072_s2] ss:$0 sm:$0xff] }
  0x13   : > { %v1301_v21 = vld [vmem:[%s1546_s7 + $0x38] sm:$0xff] }
  0x14   : > { %372 = vmatpush.bf16.msra.mxu0 %v1315_v2  ;;  %1324 = vmatpush.bf16.msra.mxu1 %v1315_v2  ;;  %v1305_v22 = vld [vmem:[%s1546_s7 + $0x58] sm:$0xff] }
  0x15   : > { %1325 = vmatpush.bf16.msra.mxu2 %v1315_v2  ;;  %1326 = vmatpush.bf16.msra.mxu3 %v1315_v2  ;;  %v1309_v23 = vld [vmem:[%s1546_s7 + $0x78] sm:$0xff] }
  0x18   : > { %373 = vmatpush.bf16.msra.mxu0 %v1314_v3  ;;  %1327 = vmatpush.bf16.msra.mxu1 %v1314_v3 }
  0x19   : > { %1328 = vmatpush.bf16.msra.mxu2 %v1314_v3  ;;  %1329 = vmatpush.bf16.msra.mxu3 %v1314_v3 }
  0x1c   : > { %374 = vmatpush.bf16.msra.mxu0 %v1313_v4  ;;  %1330 = vmatpush.bf16.msra.mxu1 %v1313_v4 }
  0x1d   : > { %1331 = vmatpush.bf16.msra.mxu2 %v1313_v4  ;;  %1332 = vmatpush.bf16.msra.mxu3 %v1313_v4 }
  0x20   : > { %375 = vmatpush.bf16.msra.mxu0 %v1312_v5  ;;  %1333 = vmatpush.bf16.msra.mxu1 %v1312_v5 }
  0x21   : > { %1334 = vmatpush.bf16.msra.mxu2 %v1312_v5  ;;  %1335 = vmatpush.bf16.msra.mxu3 %v1312_v5 }
  0x24   : > { %376 = vmatpush.bf16.msra.mxu0 %v1311_v6  ;;  %1336 = vmatpush.bf16.msra.mxu1 %v1311_v6 }
  0x25   : > { %1337 = vmatpush.bf16.msra.mxu2 %v1311_v6  ;;  %1338 = vmatpush.bf16.msra.mxu3 %v1311_v6 }
  0x28   : > { %377 = vmatpush.bf16.msra.mxu0 %v1310_v7  ;;  %1339 = vmatpush.bf16.msra.mxu1 %v1310_v7 }
  0x29   : > { %1340 = vmatpush.bf16.msra.mxu2 %v1310_v7  ;;  %1341 = vmatpush.bf16.msra.mxu3 %v1310_v7 }
  0x2b   : > { %378 = vmatmul.bf16.vlgmr.msra.gmra.mxu0 %v1294_v8  ;;  %398 = vmatmul.bf16.vlgmr.msra.gmra.mxu1 %v1298_v9 }
  0x2c   : > { %418 = vmatmul.bf16.vlgmr.msra.gmra.mxu2 %v1302_v10  ;;  %438 = vmatmul.bf16.vlgmr.msra.gmra.mxu3 %v1306_v11 }
  0x3b   : > { %383 = vmatmul.bf16.gmra.mxu0 %v1295_v12  ;;  %403 = vmatmul.bf16.gmra.mxu1 %v1299_v13 }
  0x3c   : > { %423 = vmatmul.bf16.gmra.mxu2 %v1303_v14  ;;  %443 = vmatmul.bf16.gmra.mxu3 %v1307_v15 }
  0x4b   : > { %388 = vmatmul.bf16.gmra.mxu0 %v1296_v16  ;;  %408 = vmatmul.bf16.gmra.mxu1 %v1300_v17 }
  0x4c   : > { %428 = vmatmul.bf16.gmra.mxu2 %v1304_v18  ;;  %448 = vmatmul.bf16.gmra.mxu3 %v1308_v19 }
  0x5b   : > { %393 = vmatmul.bf16.gmra.mxu0 %v1297_v20  ;;  %413 = vmatmul.bf16.gmra.mxu1 %v1301_v21 }
  0x5c   : > { %433 = vmatmul.bf16.gmra.mxu2 %v1305_v22  ;;  %453 = vmatmul.bf16.gmra.mxu3 %v1309_v23 }
  0xa8   : > { %v379_v25 = vpop.f32.mrf.mxu0  ;;  %v399_v26 = vpop.f32.mrf.mxu1 }
  0xa9   : > { %v380_v27 = vadd.f32 %v1567_v24, %v379_v25  ;;  %v400_v28 = vadd.f32 %v1567_v24, %v399_v26 }
  0xab   : > { %v1260_v29 = vmul.f32 -1.442695, %v380_v27  ;;  %v1268_v30 = vmul.f32 -1.442695, %v400_v28 }
  0xad   : > { %1351 = vpow2.f32 %v1260_v29 }
  0xae   : > { %1353 = vpow2.f32 %v1268_v30 }
  0xaf   : > { %v419_v31 = vpop.f32.mrf.mxu2  ;;  %v439_v32 = vpop.f32.mrf.mxu3 }
  0xb0   : > { %v420_v33 = vadd.f32 %v1567_v24, %v419_v31  ;;  %v440_v34 = vadd.f32 %v1567_v24, %v439_v32  ;;  %v381_v35 = vpop.f32.mrf.mxu0  ;;  %v401_v36 = vpop.f32.mrf.mxu1 }
  0xb1   : > { %v382_v37 = vadd.f32 %v1567_v24, %v381_v35  ;;  %v402_v38 = vadd.f32 %v1567_v24, %v401_v36 }
  0xb2   : > { %v1276_v39 = vmul.f32 -1.442695, %v420_v33  ;;  %v1284_v40 = vmul.f32 -1.442695, %v440_v34 }
  0xb3   : > { %v1352_v41 = vpop.eup %1351  ;;  %v1261_v44 = vmul.f32 -1.442695, %v382_v37  ;;  %v1269_v46 = vmul.f32 -1.442695, %v402_v38 }
  0xb4   : > { %v1354_v42 = vpop.eup %1353  ;;  %v1575_v43 = vadd.f32 1.0, %v1352_v41  ;;  %1355 = vpow2.f32 %v1276_v39 }
  0xb5   : > { %v1577_v45 = vadd.f32 1.0, %v1354_v42  ;;  %1357 = vpow2.f32 %v1284_v40 }
  0xb6   : > { %1359 = vrcp.f32 %v1575_v43  ;;  %v596_v50 = vand.u32 2147483647, %v1575_v43  ;;  %v598_v51 = vand.u32 2147483648, %v1575_v43  ;;  %vm592_vm0 = vweird.f32 %v1575_v43 }
  0xb7   : > { %1361 = vrcp.f32 %v1577_v45  ;;  %v421_v47 = vpop.f32.mrf.mxu2  ;;  %v441_v48 = vpop.f32.mrf.mxu3  ;;  %v716_v54 = vand.u32 2147483647, %v1577_v45  ;;  %v718_v58 = vand.u32 2147483648, %v1577_v45  ;;  %vm712_vm1 = vweird.f32 %v1577_v45 }
  0xb8   : > { %1363 = vpow2.f32 %v1261_v44  ;;  %v422_v49 = vadd.f32 %v1567_v24, %v421_v47  ;;  %v384_v52 = vpop.f32.mrf.mxu0  ;;  %v442_v56 = vadd.f32 %v1567_v24, %v441_v48  ;;  %v404_v63 = vpop.f32.mrf.mxu1  ;;  %vm1595_vm2 = vcmp.eq.f32.partialorder %v596_v50, 8.507059e+37 }
  0xb9   : > { %1365 = vpow2.f32 %v1269_v46  ;;  %v385_v62 = vadd.f32 %v1567_v24, %v384_v52  ;;  %v599_v3 = vor.u32 1.1754944e-38, %v598_v51  ;;  %vm1601_vm3 = vcmp.eq.f32.partialorder %v716_v54, 8.507059e+37 }
  0xba   : > { %v1356_v53 = vpop.eup %1355  ;;  %v1277_v55 = vmul.f32 -1.442695, %v422_v49  ;;  %v1285_v7 = vmul.f32 -1.442695, %v442_v56  ;;  %v719_v10 = vor.u32 1.1754944e-38, %v718_v58  ;;  %v405_v11 = vadd.f32 %v1567_v24, %v404_v63 }
  0xbb   : > { %v1358_v57 = vpop.eup %1357  ;;  %v1587_v59 = vadd.f32 1.0, %v1356_v53  ;;  %v1262_v14 = vmul.f32 -1.442695, %v385_v62 }
  0xbc   : > { %v1360_v60 = vpop.eup %1359  ;;  %v1591_v61 = vadd.f32 1.0, %v1358_v57  ;;  %v1617_v25 = vmul.f32 -1.442695, %v405_v11 }
  0xbd   : > { %v1362_v0 = vpop.eup %1361  ;;  %v588_v1 = vmul.f32 %v1360_v60, %v1575_v43  ;;  %1367 = vrcp.f32 %v1587_v59  ;;  %vm593_vm4 = vweird.f32 %v1360_v60  ;;  %v836_v13 = vand.u32 2147483647, %v1587_v59 }
  0xbe   : > { %v1364_v4 = vpop.eup %1363  ;;  %v708_v5 = vmul.f32 %v1362_v0, %v1577_v45  ;;  %1369 = vpow2.f32 %v1277_v55  ;;  %v838_v16 = vand.u32 2147483648, %v1587_v59  ;;  %vm713_vm5 = vweird.f32 %v1362_v0  ;;  %vm594_vm6 = vmor %vm592_vm0, %vm593_vm4 }
  0xbf   : > { %v1366_v8 = vpop.eup %1365  ;;  %v589_v9 = vsub.f32 1.0, %v588_v1  ;;  %1371 = vrcp.f32 %v1591_v61  ;;  %v1610_v17 = vadd.f32 1.0, %v1364_v4  ;;  %v956_v20 = vand.u32 2147483647, %v1591_v61  ;;  %v424_v29 = vpop.f32.mrf.mxu2  ;;  %vm714_vm9 = vmor %vm712_vm1, %vm713_vm5 }
  0xc0   : > { %v709_v12 = vsub.f32 1.0, %v708_v5  ;;  %v1612_v18 = vadd.f32 1.0, %v1366_v8  ;;  %1373 = vpow2.f32 %v1285_v7  ;;  %v958_v23 = vand.u32 2147483648, %v1591_v61  ;;  %v444_v56 = vpop.f32.mrf.mxu3  ;;  %v386_v11 = vpop.f32.mrf.mxu0 }
  0xc1   : > { %v590_v15 = vmul.f32 %v1360_v60, %v589_v9  ;;  %1375 = vrcp.f32 %v1610_v17  ;;  %vm832_vm7 = vweird.f32 %v1587_v59  ;;  %vm952_vm8 = vweird.f32 %v1591_v61 }
  0xc2   : > { %v710_v19 = vmul.f32 %v1362_v0, %v709_v12  ;;  %vm1633_vm10 = vcmp.eq.f32.partialorder %v836_v13, 8.507059e+37  ;;  %v839_v33 = vor.u32 1.1754944e-38, %v838_v16  ;;  %1377 = vrcp.f32 %v1612_v18 }
  0xc3   : > { %v1368_v21 = vpop.eup %1367  ;;  %v591_v22 = vadd.f32 %v1360_v60, %v590_v15  ;;  %vm1641_vm11 = vcmp.eq.f32.partialorder %v956_v20, 8.507059e+37  ;;  %v959_v40 = vor.u32 1.1754944e-38, %v958_v23  ;;  %v611_v41 = vand.u32 2147483647, %v1610_v17 }
  0xc4   : > { %v1370_v26 = vpop.eup %1369  ;;  %v711_v27 = vadd.f32 %v1362_v0, %v710_v19  ;;  %v828_v28 = vmul.f32 %v1368_v21, %v1587_v59  ;;  %v425_v42 = vadd.f32 %v1567_v24, %v424_v29  ;;  %vm833_vm12 = vweird.f32 %v1368_v21  ;;  %v406_v29 = vpop.f32.mrf.mxu1 }
  0xc5   : > { %v1372_v30 = vpop.eup %1371  ;;  %v595_v31 = vsel %vm594_vm6, %v1360_v60, %v591_v22  ;;  %v1651_v46 = vadd.f32 1.0, %v1370_v26  ;;  %vm607_vm14 = vweird.f32 %v1610_v17  ;;  %v613_v48 = vand.u32 2147483648, %v1610_v17  ;;  %vm834_vm15 = vmor %vm832_vm7, %vm833_vm12 }
  0xc6   : > { %v600_v34 = vsel %vm1595_vm2, %v599_v3, %v595_v31  ;;  %v715_v35 = vsel %vm714_vm9, %v1362_v0, %v711_v27  ;;  %v829_v36 = vsub.f32 1.0, %v828_v28  ;;  %v948_v37 = vmul.f32 %v1372_v30, %v1591_v61  ;;  %v1374_v43 = vpop.eup %1373 }
  0xc7   : > { %1067 = vst [vmem:[%s1622_s14] sm:$0xff] %v600_v34  ;;  %v720_v39 = vsel %vm1601_vm3, %v719_v10, %v715_v35  ;;  %v1376_v47 = vpop.eup %1375  ;;  %vm953_vm13 = vweird.f32 %v1372_v30  ;;  %1379 = vpow2.f32 %v1262_v14  ;;  %v1656_v52 = vadd.f32 1.0, %v1374_v43 }
  0xc8   : > { %1075 = vst [vmem:[%s1622_s14 + $0x40] sm:$0xff] %v720_v39  ;;  %v830_v44 = vmul.f32 %v1368_v21, %v829_v36  ;;  %v949_v45 = vsub.f32 1.0, %v948_v37  ;;  %v603_v51 = vmul.f32 %v1376_v47, %v1610_v17  ;;  %v1378_v53 = vpop.eup %1377  ;;  %vm1660_vm0 = vcmp.eq.f32.partialorder %v611_v41, 8.507059e+37  ;;  %vm954_vm2 = vmor %vm952_vm8, %vm953_vm13 }
  0xc9   : > { %vm727_vm1 = vweird.f32 %v1612_v18  ;;  %v731_v55 = vand.u32 2147483647, %v1612_v18  ;;  %1381 = vrcp.f32 %v1651_v46  ;;  %v723_v62 = vmul.f32 %v1378_v53, %v1612_v18 }
  0xca   : > { %v831_v49 = vadd.f32 %v1368_v21, %v830_v44  ;;  %v950_v50 = vmul.f32 %v1372_v30, %v949_v45  ;;  %v604_v60 = vsub.f32 1.0, %v603_v51  ;;  %vm608_vm3 = vweird.f32 %v1376_v47 }
  0xcb   : > { %v733_v63 = vand.u32 2147483648, %v1612_v18  ;;  %v851_v0 = vand.u32 2147483647, %v1651_v46  ;;  %v724_v3 = vsub.f32 1.0, %v723_v62  ;;  %1383 = vrcp.f32 %v1656_v52  ;;  %vm609_vm6 = vmor %vm607_vm14, %vm608_vm3 }
  0xcc   : > { %v835_v57 = vsel %vm834_vm15, %v1368_v21, %v831_v49  ;;  %v951_v58 = vadd.f32 %v1372_v30, %v950_v50  ;;  %v605_v2 = vmul.f32 %v1376_v47, %v604_v60  ;;  %v614_v6 = vor.u32 1.1754944e-38, %v613_v48 }
  0xcd   : > { %v840_v59 = vsel %vm1633_vm10, %v839_v33, %v835_v57  ;;  %v1380_v4 = vpop.eup %1379  ;;  %vm1679_vm4 = vcmp.eq.f32.partialorder %v731_v55, 8.507059e+37  ;;  %v853_v61 = vand.u32 2147483648, %v1651_v46  ;;  %v725_v9 = vmul.f32 %v1378_v53, %v724_v3  ;;  %v446_v33 = vpop.f32.mrf.mxu3 }
  0xce   : > { %1083 = vst [vmem:[%s1622_s14 + $0x80] sm:$0xff] %v840_v59  ;;  %v955_v1 = vsel %vm954_vm2, %v1372_v30, %v951_v58  ;;  %v606_v8 = vadd.f32 %v1376_v47, %v605_v2  ;;  %vm728_vm5 = vweird.f32 %v1378_v53  ;;  %v1685_v10 = vadd.f32 1.0, %v1380_v4  ;;  %v426_v30 = vpop.f32.mrf.mxu2 }
  0xcf   : > { %v960_v5 = vsel %vm1641_vm11, %v959_v40, %v955_v1  ;;  %v1382_v12 = vpop.eup %1381  ;;  %v734_v13 = vor.u32 1.1754944e-38, %v733_v63  ;;  %vm847_vm7 = vweird.f32 %v1651_v46  ;;  %1385 = vpow2.f32 %v1617_v25  ;;  %vm729_vm9 = vmor %vm727_vm1, %vm728_vm5 }
  0xd0   : > { %1091 = vst [vmem:[%s1622_s14 + $0xc0] sm:$0xff] %v960_v5  ;;  %v1278_v14 = vmul.f32 -1.442695, %v425_v42  ;;  %v610_v15 = vsel %vm609_vm6, %v1376_v47, %v606_v8  ;;  %v726_v16 = vadd.f32 %v1378_v53, %v725_v9  ;;  %v843_v19 = vmul.f32 %v1382_v12, %v1651_v46  ;;  %v389_v9 = vpop.f32.mrf.mxu0 }
  0xd1   : > { %vm1693_vm8 = vcmp.eq.f32.partialorder %v851_v0, 8.507059e+37  ;;  %v445_v21 = vadd.f32 %v1567_v24, %v444_v56  ;;  %v615_v17 = vsel %vm1660_vm0, %v614_v6, %v610_v15  ;;  %v854_v22 = vor.u32 1.1754944e-38, %v853_v61  ;;  %v1384_v25 = vpop.eup %1383 }
  0xd2   : > { %1387 = vrcp.f32 %v1685_v10  ;;  %v387_v23 = vadd.f32 %v1567_v24, %v386_v11  ;;  %1068 = vst [vmem:[%s1622_s14 + $0x8] sm:$0xff] %v615_v17  ;;  %v730_v26 = vsel %vm729_vm9, %v1378_v53, %v726_v16  ;;  %v844_v27 = vsub.f32 1.0, %v843_v19 }
  0xd3   : > { %vm967_vm10 = vweird.f32 %v1656_v52  ;;  %v971_v28 = vand.u32 2147483647, %v1656_v52  ;;  %v735_v18 = vsel %vm1679_vm4, %v734_v13, %v730_v26  ;;  %v963_v31 = vmul.f32 %v1384_v25, %v1656_v52 }
  0xd4   : > { %v973_v32 = vand.u32 2147483648, %v1656_v52  ;;  %1389 = vpow2.f32 %v1278_v14  ;;  %1076 = vst [vmem:[%s1622_s14 + $0x48] sm:$0xff] %v735_v18  ;;  %v845_v34 = vmul.f32 %v1382_v12, %v844_v27  ;;  %vm848_vm11 = vweird.f32 %v1382_v12 }
  0xd5   : > { %vm968_vm12 = vweird.f32 %v1384_v25  ;;  %v1286_v35 = vmul.f32 -1.442695, %v445_v21  ;;  %v1386_v36 = vpop.eup %1385  ;;  %v964_v37 = vsub.f32 1.0, %v963_v31  ;;  %v1263_v38 = vmul.f32 -1.442695, %v387_v23  ;;  %vm849_vm13 = vmor %vm847_vm7, %vm848_vm11 }
  0xd6   : > { %v407_v39 = vadd.f32 %v1567_v24, %v406_v29  ;;  %v427_v40 = vadd.f32 %v1567_v24, %v426_v30  ;;  %v846_v41 = vadd.f32 %v1382_v12, %v845_v34  ;;  %v1715_v42 = vadd.f32 1.0, %v1386_v36  ;;  %vm969_vm0 = vmor %vm967_vm10, %vm968_vm12 }
  0xd7   : > { %1391 = vpow2.f32 %v1286_v35  ;;  %v447_v43 = vadd.f32 %v1567_v24, %v446_v33  ;;  %v965_v45 = vmul.f32 %v1384_v25, %v964_v37  ;;  %vm1720_vm14 = vcmp.eq.f32.partialorder %v971_v28, 8.507059e+37 }
  0xd8   : > { %v1388_v44 = vpop.eup %1387  ;;  %1393 = vpow2.f32 %v1263_v38  ;;  %v1271_v47 = vmul.f32 -1.442695, %v407_v39  ;;  %v1279_v48 = vmul.f32 -1.442695, %v427_v40  ;;  %v850_v49 = vsel %vm849_vm13, %v1382_v12, %v846_v41 }
  0xd9   : > { %v618_v51 = vmul.f32 %v1388_v44, %v1685_v10  ;;  %1395 = vrcp.f32 %v1715_v42  ;;  %v855_v54 = vsel %vm1693_vm8, %v854_v22, %v850_v49  ;;  %v966_v55 = vadd.f32 %v1384_v25, %v965_v45 }
  0xda   : > { %v1390_v53 = vpop.eup %1389  ;;  %v974_v46 = vor.u32 1.1754944e-38, %v973_v32  ;;  %vm622_vm15 = vweird.f32 %v1685_v10  ;;  %1084 = vst [vmem:[%s1622_s14 + $0x88] sm:$0xff] %v855_v54  ;;  %v626_v57 = vand.u32 2147483647, %v1685_v10  ;;  %1397 = vpow2.f32 %v1271_v47 }
  0xdb   : > { %v619_v56 = vsub.f32 1.0, %v618_v51  ;;  %v1734_v58 = vadd.f32 1.0, %v1390_v53  ;;  %v970_v60 = vsel %vm969_vm0, %v1384_v25, %v966_v55  ;;  %v628_v62 = vand.u32 2147483648, %v1685_v10 }
  0xdc   : > { %1399 = vpow2.f32 %v1279_v48  ;;  %v1287_v59 = vmul.f32 -1.442695, %v447_v43  ;;  %v975_v0 = vsel %vm1720_vm14, %v974_v46, %v970_v60  ;;  %vm623_vm1 = vweird.f32 %v1388_v44 }
  0xdd   : > { %v1392_v63 = vpop.eup %1391  ;;  %v620_v1 = vmul.f32 %v1388_v44, %v619_v56  ;;  %1401 = vrcp.f32 %v1734_v58  ;;  %1092 = vst [vmem:[%s1622_s14 + $0xc8] sm:$0xff] %v975_v0  ;;  %v746_v2 = vand.u32 2147483647, %v1715_v42  ;;  %v748_v6 = vand.u32 2147483648, %v1715_v42  ;;  %vm624_vm2 = vmor %vm622_vm15, %vm623_vm1 }
  0xde   : > { %v1394_v52 = vpop.eup %1393  ;;  %v1742_v3 = vadd.f32 1.0, %v1392_v63  ;;  %1403 = vpow2.f32 %v1287_v59  ;;  %vm627_vm3 = vcmp.eq.f32.partialorder %v626_v57, 8.507059e+37  ;;  %v629_v61 = vor.u32 1.1754944e-38, %v628_v62  ;;  %v429_v57 = vpop.f32.mrf.mxu2 }
  0xdf   : > { %v1396_v4 = vpop.eup %1395  ;;  %v621_v5 = vadd.f32 %v1388_v44, %v620_v1  ;;  %v1745_v7 = vadd.f32 1.0, %v1394_v52  ;;  %v866_v13 = vand.u32 2147483647, %v1734_v58  ;;  %v868_v14 = vand.u32 2147483648, %v1734_v58 }
  0xe0   : > { %v738_v8 = vmul.f32 %v1396_v4, %v1715_v42  ;;  %v1398_v11 = vpop.eup %1397  ;;  %1405 = vrcp.f32 %v1742_v3  ;;  %vm742_vm4 = vweird.f32 %v1715_v42  ;;  %vm1756_vm5 = vcmp.eq.f32.partialorder %v746_v2, 8.507059e+37  ;;  %v409_v42 = vpop.f32.mrf.mxu1 }
  0xe1   : > { %v625_v12 = vsel %vm624_vm2, %v1388_v44, %v621_v5  ;;  %1407 = vrcp.f32 %v1745_v7  ;;  %v749_v21 = vor.u32 1.1754944e-38, %v748_v6  ;;  %vm862_vm6 = vweird.f32 %v1734_v58 }
  0xe2   : > { %v1400_v15 = vpop.eup %1399  ;;  %v630_v16 = vsel %vm627_vm3, %v629_v61, %v625_v12  ;;  %v739_v19 = vsub.f32 1.0, %v738_v8  ;;  %v390_v17 = vadd.f32 %v1567_v24, %v389_v9  ;;  %vm743_vm7 = vweird.f32 %v1396_v4 }
  0xe3   : > { %v1402_v10 = vpop.eup %1401  ;;  %1069 = vst [vmem:[%s1622_s14 + $0x10] sm:$0xff] %v630_v16  ;;  %v986_v25 = vand.u32 2147483647, %v1742_v3  ;;  %vm1764_vm8 = vcmp.eq.f32.partialorder %v866_v13, 8.507059e+37  ;;  %v869_v28 = vor.u32 1.1754944e-38, %v868_v14  ;;  %v988_v29 = vand.u32 2147483648, %v1742_v3  ;;  %vm744_vm10 = vmor %vm742_vm4, %vm743_vm7  ;;  %v449_v14 = vpop.f32.mrf.mxu3 }
  0xe4   : > { %v740_v22 = vmul.f32 %v1396_v4, %v739_v19  ;;  %v858_v23 = vmul.f32 %v1402_v10, %v1734_v58  ;;  %v1404_v26 = vpop.eup %1403  ;;  %v1769_v30 = vadd.f32 1.0, %v1398_v11  ;;  %vm982_vm9 = vweird.f32 %v1742_v3 }
  0xe5   : > { %v1772_v32 = vadd.f32 1.0, %v1400_v15  ;;  %vm863_vm11 = vweird.f32 %v1402_v10  ;;  %vm637_vm12 = vweird.f32 %v1745_v7  ;;  %v641_v34 = vand.u32 2147483647, %v1745_v7  ;;  %v391_v15 = vpop.f32.mrf.mxu0 }
  0xe6   : > { %v741_v18 = vadd.f32 %v1396_v4, %v740_v22  ;;  %v859_v31 = vsub.f32 1.0, %v858_v23  ;;  %v1406_v33 = vpop.eup %1405  ;;  %v643_v35 = vand.u32 2147483648, %v1745_v7  ;;  %1409 = vrcp.f32 %v1769_v30  ;;  %vm864_vm14 = vmor %vm862_vm6, %vm863_vm11 }
  0xe7   : > { %v1408_v36 = vpop.eup %1407  ;;  %v978_v39 = vmul.f32 %v1406_v33, %v1742_v3  ;;  %vm1781_vm13 = vcmp.eq.f32.partialorder %v986_v25, 8.507059e+37  ;;  %v1785_v41 = vadd.f32 1.0, %v1404_v26  ;;  %v989_v44 = vor.u32 1.1754944e-38, %v988_v29 }
  0xe8   : > { %v745_v37 = vsel %vm744_vm10, %v1396_v4, %v741_v18  ;;  %v860_v38 = vmul.f32 %v1402_v10, %v859_v31  ;;  %v633_v45 = vmul.f32 %v1408_v36, %v1745_v7  ;;  %v761_v47 = vand.u32 2147483647, %v1769_v30 }
  0xe9   : > { %v750_v43 = vsel %vm1756_vm5, %v749_v21, %v745_v37  ;;  %v979_v49 = vsub.f32 1.0, %v978_v39  ;;  %v763_v50 = vand.u32 2147483648, %v1769_v30  ;;  %1411 = vrcp.f32 %v1772_v32  ;;  %v411_v21 = vpop.f32.mrf.mxu1  ;;  %v431_v37 = vpop.f32.mrf.mxu2 }
  0xea   : > { %1077 = vst [vmem:[%s1622_s14 + $0x50] sm:$0xff] %v750_v43  ;;  %v861_v48 = vadd.f32 %v1402_v10, %v860_v38  ;;  %v634_v51 = vsub.f32 1.0, %v633_v45  ;;  %vm1797_vm15 = vcmp.eq.f32.partialorder %v641_v34, 8.507059e+37  ;;  %v644_v54 = vor.u32 1.1754944e-38, %v643_v35 }
  0xeb   : > { %v1264_v55 = vmul.f32 -1.442695, %v390_v17  ;;  %v980_v56 = vmul.f32 %v1406_v33, %v979_v49  ;;  %vm983_vm0 = vweird.f32 %v1406_v33  ;;  %1413 = vrcp.f32 %v1785_v41 }
  0xec   : > { %v865_v46 = vsel %vm864_vm14, %v1402_v10, %v861_v48  ;;  %v1410_v60 = vpop.eup %1409  ;;  %v635_v58 = vmul.f32 %v1408_v36, %v634_v51  ;;  %vm638_vm1 = vweird.f32 %v1408_v36  ;;  %vm757_vm2 = vweird.f32 %v1769_v30  ;;  %vm984_vm4 = vmor %vm982_vm9, %vm983_vm0 }
  0xed   : > { %v870_v62 = vsel %vm1764_vm8, %v869_v28, %v865_v46  ;;  %v981_v59 = vadd.f32 %v1406_v33, %v980_v56  ;;  %v753_v63 = vmul.f32 %v1410_v60, %v1769_v30  ;;  %vm1807_vm3 = vcmp.eq.f32.partialorder %v761_v47, 8.507059e+37  ;;  %vm639_vm6 = vmor %vm637_vm12, %vm638_vm1 }
  0xee   : > { %1085 = vst [vmem:[%s1622_s14 + $0x90] sm:$0xff] %v870_v62  ;;  %v764_v1 = vor.u32 1.1754944e-38, %v763_v50  ;;  %v881_v52 = vand.u32 2147483647, %v1772_v32  ;;  %v636_v2 = vadd.f32 %v1408_v36, %v635_v58  ;;  %vm877_vm5 = vweird.f32 %v1772_v32 }
  0xef   : > { %v883_v4 = vand.u32 2147483648, %v1772_v32  ;;  %1415 = vpow2.f32 %v1264_v55  ;;  %v410_v5 = vadd.f32 %v1567_v24, %v409_v42  ;;  %v1412_v6 = vpop.eup %1411  ;;  %v985_v61 = vsel %vm984_vm4, %v1406_v33, %v981_v59 }
  0xf0   : > { %v754_v8 = vsub.f32 1.0, %v753_v63  ;;  %vm758_vm7 = vweird.f32 %v1410_v60  ;;  %v430_v3 = vadd.f32 %v1567_v24, %v429_v57  ;;  %v990_v9 = vsel %vm1781_vm13, %v989_v44, %v985_v61  ;;  %v394_v57 = vpop.f32.mrf.mxu0 }
  0xf1   : > { %v640_v11 = vsel %vm639_vm6, %v1408_v36, %v636_v2  ;;  %v873_v12 = vmul.f32 %v1412_v6, %v1772_v32  ;;  %vm997_vm8 = vweird.f32 %v1785_v41  ;;  %v1001_v13 = vand.u32 2147483647, %v1785_v41  ;;  %v1414_v16 = vpop.eup %1413  ;;  %1093 = vst [vmem:[%s1622_s14 + $0xd0] sm:$0xff] %v990_v9  ;;  %vm759_vm10 = vmor %vm757_vm2, %vm758_vm7 }
  0xf2   : > { %v645_v7 = vsel %vm1797_vm15, %v644_v54, %v640_v11  ;;  %v755_v19 = vmul.f32 %v1410_v60, %v754_v8  ;;  %v1003_v10 = vand.u32 2147483648, %v1785_v41  ;;  %v1272_v20 = vmul.f32 -1.442695, %v410_v5  ;;  %v451_v54 = vpop.f32.mrf.mxu3 }
  0xf3   : > { %1070 = vst [vmem:[%s1622_s14 + $0x18] sm:$0xff] %v645_v7  ;;  %v874_v17 = vsub.f32 1.0, %v873_v12  ;;  %vm878_vm9 = vweird.f32 %v1412_v6  ;;  %v993_v22 = vmul.f32 %v1414_v16, %v1785_v41  ;;  %v1280_v23 = vmul.f32 -1.442695, %v430_v3 }
  0xf4   : > { %v756_v25 = vadd.f32 %v1410_v60, %v755_v19  ;;  %1417 = vpow2.f32 %v1272_v20  ;;  %v450_v26 = vadd.f32 %v1567_v24, %v449_v14  ;;  %v392_v27 = vadd.f32 %v1567_v24, %v391_v15  ;;  %vm879_vm12 = vmor %vm877_vm5, %vm878_vm9 }
  0xf5   : > { %v1416_v28 = vpop.eup %1415  ;;  %v875_v29 = vmul.f32 %v1412_v6, %v874_v17  ;;  %v994_v18 = vsub.f32 1.0, %v993_v22  ;;  %1419 = vpow2.f32 %v1280_v23  ;;  %v412_v31 = vadd.f32 %v1567_v24, %v411_v21 }
  0xf6   : > { %v760_v33 = vsel %vm759_vm10, %v1410_v60, %v756_v25  ;;  %v1838_v34 = vadd.f32 1.0, %v1416_v28  ;;  %v1288_v35 = vmul.f32 -1.442695, %v450_v26  ;;  %v1265_v36 = vmul.f32 -1.442695, %v392_v27 }
  0xf7   : > { %v765_v38 = vsel %vm1807_vm3, %v764_v1, %v760_v33  ;;  %v876_v39 = vadd.f32 %v1412_v6, %v875_v29  ;;  %v995_v40 = vmul.f32 %v1414_v16, %v994_v18  ;;  %vm998_vm11 = vweird.f32 %v1414_v16 }
  0xf8   : > { %1078 = vst [vmem:[%s1622_s14 + $0x58] sm:$0xff] %v765_v38  ;;  %vm882_vm13 = vcmp.eq.f32.partialorder %v881_v52, 8.507059e+37  ;;  %v884_v30 = vor.u32 1.1754944e-38, %v883_v4  ;;  %1421 = vrcp.f32 %v1838_v34  ;;  %v1273_v42 = vmul.f32 -1.442695, %v412_v31  ;;  %vm999_vm14 = vmor %vm997_vm8, %vm998_vm11 }
  0xf9   : > { %v880_v43 = vsel %vm879_vm12, %v1412_v6, %v876_v39  ;;  %v996_v44 = vadd.f32 %v1414_v16, %v995_v40  ;;  %1423 = vpow2.f32 %v1288_v35  ;;  %v432_v45 = vadd.f32 %v1567_v24, %v431_v37 }
  0xfa   : > { %v1418_v47 = vpop.eup %1417  ;;  %v885_v48 = vsel %vm882_vm13, %v884_v30, %v880_v43  ;;  %v1004_v49 = vor.u32 1.1754944e-38, %v1003_v10  ;;  %1425 = vpow2.f32 %v1265_v36  ;;  %vm1002_vm15 = vcmp.eq.f32.partialorder %v1001_v13, 8.507059e+37 }
  0xfb   : > { %v1420_v32 = vpop.eup %1419  ;;  %1086 = vst [vmem:[%s1622_s14 + $0x98] sm:$0xff] %v885_v48  ;;  %v1000_v50 = vsel %vm999_vm14, %v1414_v16, %v996_v44  ;;  %v656_v51 = vand.u32 2147483647, %v1838_v34  ;;  %v1852_v53 = vadd.f32 1.0, %v1418_v47  ;;  %1427 = vpow2.f32 %v1273_v42 }
  0xfc   : > { %v1005_v55 = vsel %vm1002_vm15, %v1004_v49, %v1000_v50  ;;  %v1854_v46 = vadd.f32 1.0, %v1420_v32  ;;  %v1281_v56 = vmul.f32 -1.442695, %v432_v45  ;;  %v658_v60 = vand.u32 2147483648, %v1838_v34  ;;  %v414_v49 = vpop.f32.mrf.mxu1  ;;  %v434_v32 = vpop.f32.mrf.mxu2 }
  0xfd   : > { %1094 = vst [vmem:[%s1622_s14 + $0xd8] sm:$0xff] %v1005_v55  ;;  %1429 = vrcp.f32 %v1852_v53  ;;  %v452_v62 = vadd.f32 %v1567_v24, %v451_v54  ;;  %vm652_vm0 = vweird.f32 %v1838_v34  ;;  %vm1863_vm1 = vcmp.eq.f32.partialorder %v656_v51, 8.507059e+37 }
  0xfe   : > { %v1422_v41 = vpop.eup %1421  ;;  %1431 = vrcp.f32 %v1854_v46  ;;  %v395_v0 = vadd.f32 %v1567_v24, %v394_v57  ;;  %v776_v52 = vand.u32 2147483647, %v1852_v53  ;;  %v778_v2 = vand.u32 2147483648, %v1852_v53 }
  0xff   : > { %v1424_v58 = vpop.eup %1423  ;;  %v648_v59 = vmul.f32 %v1422_v41, %v1838_v34  ;;  %1433 = vpow2.f32 %v1281_v56  ;;  %v896_v6 = vand.u32 2147483647, %v1854_v46  ;;  %v898_v61 = vand.u32 2147483648, %v1854_v46 }
 0x100   : > { %v1426_v1 = vpop.eup %1425  ;;  %v1870_v4 = vadd.f32 1.0, %v1424_v58  ;;  %v659_v9 = vor.u32 1.1754944e-38, %v658_v60  ;;  %vm772_vm2 = vweird.f32 %v1852_v53  ;;  %v1289_v24 = vmul.f32 -1.442695, %v452_v62 }
 0x101   : > { %v649_v5 = vsub.f32 1.0, %v648_v59  ;;  %v1874_v8 = vadd.f32 1.0, %v1426_v1  ;;  %v1428_v3 = vpop.eup %1427  ;;  %vm653_vm3 = vweird.f32 %v1422_v41  ;;  %v1266_v13 = vmul.f32 -1.442695, %v395_v0 }
 0x102   : > { %1435 = vrcp.f32 %v1870_v4  ;;  %vm1880_vm4 = vcmp.eq.f32.partialorder %v776_v52, 8.507059e+37  ;;  %v779_v7 = vor.u32 1.1754944e-38, %v778_v2  ;;  %vm892_vm5 = vweird.f32 %v1854_v46  ;;  %vm654_vm7 = vmor %vm652_vm0, %vm653_vm3 }
 0x103   : > { %v1430_v11 = vpop.eup %1429  ;;  %v650_v12 = vmul.f32 %v1422_v41, %v649_v5  ;;  %1437 = vrcp.f32 %v1874_v8  ;;  %vm1886_vm6 = vcmp.eq.f32.partialorder %v896_v6, 8.507059e+37  ;;  %v899_v21 = vor.u32 1.1754944e-38, %v898_v61 }
 0x104   : > { %v1432_v14 = vpop.eup %1431  ;;  %v768_v15 = vmul.f32 %v1430_v11, %v1852_v53  ;;  %v1016_v17 = vand.u32 2147483647, %v1870_v4  ;;  %v1018_v25 = vand.u32 2147483648, %v1870_v4  ;;  %v1894_v26 = vadd.f32 1.0, %v1428_v3 }
 0x105   : > { %v651_v19 = vadd.f32 %v1422_v41, %v650_v12  ;;  %v888_v10 = vmul.f32 %v1432_v14, %v1854_v46  ;;  %v1434_v22 = vpop.eup %1433  ;;  %1439 = vpow2.f32 %v1289_v24  ;;  %vm773_vm8 = vweird.f32 %v1430_v11 }
 0x106   : > { %v769_v23 = vsub.f32 1.0, %v768_v15  ;;  %v1896_v29 = vadd.f32 1.0, %v1434_v22  ;;  %1441 = vpow2.f32 %v1266_v13  ;;  %vm893_vm9 = vweird.f32 %v1432_v14  ;;  %vm774_vm12 = vmor %vm772_vm2, %vm773_vm8  ;;  %v396_v13 = vpop.f32.mrf.mxu0  ;;  %v436_v22 = vpop.f32.mrf.mxu2 }
 0x107   : > { %v655_v27 = vsel %vm654_vm7, %v1422_v41, %v651_v19  ;;  %v889_v28 = vsub.f32 1.0, %v888_v10  ;;  %1443 = vrcp.f32 %v1894_v26  ;;  %vm1012_vm10 = vweird.f32 %v1870_v4  ;;  %vm894_vm13 = vmor %vm892_vm5, %vm893_vm9  ;;  %v1479_v10 = vld [vmem:[%s2072_s2] ss:$0 sm:$0xff] }
 0x108   : > { %v1436_v18 = vpop.eup %1435  ;;  %v660_v31 = vsel %vm1863_vm1, %v659_v9, %v655_v27  ;;  %v770_v33 = vmul.f32 %v1430_v11, %v769_v23  ;;  %vm667_vm11 = vweird.f32 %v1874_v8  ;;  %v673_v39 = vand.u32 2147483648, %v1874_v8  ;;  %v454_v9 = vpop.f32.mrf.mxu3 }
 0x109   : > { %v1438_v34 = vpop.eup %1437  ;;  %1071 = vst [vmem:[%s1622_s14 + $0x20] sm:$0xff] %v660_v31  ;;  %v890_v35 = vmul.f32 %v1432_v14, %v889_v28  ;;  %v1008_v36 = vmul.f32 %v1436_v18, %v1870_v4  ;;  %v671_v42 = vand.u32 2147483647, %v1874_v8  ;;  %1445 = vrcp.f32 %v1896_v29 }
 0x10a   : > { %v771_v37 = vadd.f32 %v1430_v11, %v770_v33  ;;  %v663_v38 = vmul.f32 %v1438_v34, %v1874_v8  ;;  %vm1913_vm14 = vcmp.eq.f32.partialorder %v1016_v17, 8.507059e+37  ;;  %v1019_v47 = vor.u32 1.1754944e-38, %v1018_v25  ;;  %v416_v17 = vpop.f32.mrf.mxu1 }
 0x10b   : > { %v891_v40 = vadd.f32 %v1432_v14, %v890_v35  ;;  %v1009_v30 = vsub.f32 1.0, %v1008_v36  ;;  %v1440_v43 = vpop.eup %1439  ;;  %vm1013_vm15 = vweird.f32 %v1436_v18  ;;  %vm668_vm0 = vweird.f32 %v1438_v34 }
 0x10c   : > { %v775_v44 = vsel %vm774_vm12, %v1430_v11, %v771_v37  ;;  %v664_v48 = vsub.f32 1.0, %v663_v38  ;;  %v1442_v50 = vpop.eup %1441  ;;  %v674_v57 = vor.u32 1.1754944e-38, %v673_v39  ;;  %v791_v62 = vand.u32 2147483647, %v1894_v26  ;;  %vm1014_vm1 = vmor %vm1012_vm10, %vm1013_vm15 }
 0x10d   : > { %v780_v51 = vsel %vm1880_vm4, %v779_v7, %v775_v44  ;;  %v895_v53 = vsel %vm894_vm13, %v1432_v14, %v891_v40  ;;  %v1010_v54 = vmul.f32 %v1436_v18, %v1009_v30  ;;  %v1444_v55 = vpop.eup %1443  ;;  %v1925_v58 = vadd.f32 1.0, %v1440_v43  ;;  %vm669_vm2 = vmor %vm667_vm11, %vm668_vm0 }
 0x10e   : > { %1079 = vst [vmem:[%s1622_s14 + $0x60] sm:$0xff] %v780_v51  ;;  %v900_v46 = vsel %vm1886_vm6, %v899_v21, %v895_v53  ;;  %v665_v56 = vmul.f32 %v1438_v34, %v664_v48  ;;  %v783_v60 = vmul.f32 %v1444_v55, %v1894_v26  ;;  %v793_v63 = vand.u32 2147483648, %v1894_v26 }
 0x10f   : > { %1087 = vst [vmem:[%s1622_s14 + $0xa0] sm:$0xff] %v900_v46  ;;  %v1011_v41 = vadd.f32 %v1436_v18, %v1010_v54  ;;  %v911_v0 = vand.u32 2147483647, %v1896_v29  ;;  %v1931_v1 = vadd.f32 1.0, %v1442_v50  ;;  %v1446_v52 = vpop.eup %1445  ;;  %v913_v6 = vand.u32 2147483648, %v1896_v29 }
 0x110   : > { %v666_v59 = vadd.f32 %v1438_v34, %v665_v56  ;;  %v784_v5 = vsub.f32 1.0, %v783_v60  ;;  %1447 = vrcp.f32 %v1925_v58  ;;  %vm672_vm3 = vcmp.eq.f32.partialorder %v671_v42, 8.507059e+37 }
 0x111   : > { %v1015_v2 = vsel %vm1014_vm1, %v1436_v18, %v1011_v41  ;;  %v903_v3 = vmul.f32 %v1446_v52, %v1896_v29  ;;  %vm787_vm4 = vweird.f32 %v1894_v26  ;;  %vm788_vm5 = vweird.f32 %v1444_v55 }
 0x112   : > { %v1020_v4 = vsel %vm1913_vm14, %v1019_v47, %v1015_v2  ;;  %v670_v61 = vsel %vm669_vm2, %v1438_v34, %v666_v59  ;;  %v785_v11 = vmul.f32 %v1444_v55, %v784_v5  ;;  %vm1943_vm6 = vcmp.eq.f32.partialorder %v791_v62, 8.507059e+37  ;;  %vm789_vm9 = vmor %vm787_vm4, %vm788_vm5 }
 0x113   : > { %1095 = vst [vmem:[%s1622_s14 + $0xe0] sm:$0xff] %v1020_v4  ;;  %v675_v24 = vsel %vm672_vm3, %v674_v57, %v670_v61  ;;  %v904_v12 = vsub.f32 1.0, %v903_v3  ;;  %vm907_vm7 = vweird.f32 %v1896_v29  ;;  %1449 = vrcp.f32 %v1931_v1 }
 0x114   : > { %1072 = vst [vmem:[%s1622_s14 + $0x28] sm:$0xff] %v675_v24  ;;  %v786_v14 = vadd.f32 %v1444_v55, %v785_v11  ;;  %v794_v15 = vor.u32 1.1754944e-38, %v793_v63  ;;  %vm1949_vm8 = vcmp.eq.f32.partialorder %v911_v0, 8.507059e+37  ;;  %v914_v7 = vor.u32 1.1754944e-38, %v913_v6 }
 0x115   : > { %v905_v19 = vmul.f32 %v1446_v52, %v904_v12  ;;  %vm908_vm10 = vweird.f32 %v1446_v52  ;;  %vm1027_vm11 = vweird.f32 %v1925_v58  ;;  %v415_v20 = vadd.f32 %v1479_v10, %v414_v49  ;;  %v456_v49 = vpop.f32.mrf.mxu3 }
 0x116   : > { %v435_v21 = vadd.f32 %v1479_v10, %v434_v32  ;;  %v1448_v23 = vpop.eup %1447  ;;  %v790_v25 = vsel %vm789_vm9, %v1444_v55, %v786_v14  ;;  %v1031_v26 = vand.u32 2147483647, %v1925_v58  ;;  %v455_v27 = vadd.f32 %v1479_v10, %v454_v9  ;;  %vm909_vm12 = vmor %vm907_vm7, %vm908_vm10 }
 0x117   : > { %v397_v28 = vadd.f32 %v1479_v10, %v396_v13  ;;  %v795_v18 = vsel %vm1943_vm6, %v794_v15, %v790_v25  ;;  %v906_v31 = vadd.f32 %v1446_v52, %v905_v19  ;;  %v1023_v33 = vmul.f32 %v1448_v23, %v1925_v58 }
 0x118   : > { %v1033_v34 = vand.u32 2147483648, %v1925_v58  ;;  %1080 = vst [vmem:[%s1622_s14 + $0x68] sm:$0xff] %v795_v18  ;;  %v1274_v35 = vmul.f32 -1.442695, %v415_v20  ;;  %v1282_v36 = vmul.f32 -1.442695, %v435_v21  ;;  %v417_v37 = vadd.f32 %v1479_v10, %v416_v17 }
 0x119   : > { %v437_v38 = vadd.f32 %v1479_v10, %v436_v22  ;;  %v1450_v39 = vpop.eup %1449  ;;  %v910_v40 = vsel %vm909_vm12, %v1446_v52, %v906_v31  ;;  %v1024_v30 = vsub.f32 1.0, %v1023_v33  ;;  %v1290_v42 = vmul.f32 -1.442695, %v455_v27 }
 0x11a   : > { %v1267_v43 = vmul.f32 -1.442695, %v397_v28  ;;  %v915_v44 = vsel %vm1949_vm8, %v914_v7, %v910_v40  ;;  %vm1028_vm13 = vweird.f32 %v1448_v23  ;;  %v678_v45 = vmul.f32 %v1450_v39, %v1931_v1 }
 0x11b   : > { %1451 = vpow2.f32 %v1274_v35  ;;  %1088 = vst [vmem:[%s1622_s14 + $0xa8] sm:$0xff] %v915_v44  ;;  %v1025_v47 = vmul.f32 %v1448_v23, %v1024_v30  ;;  %v1275_v29 = vmul.f32 -1.442695, %v417_v37  ;;  %v1283_v48 = vmul.f32 -1.442695, %v437_v38  ;;  %vm1029_vm15 = vmor %vm1027_vm11, %vm1028_vm13 }
 0x11c   : > { %1453 = vpow2.f32 %v1282_v36  ;;  %v679_v32 = vsub.f32 1.0, %v678_v45  ;;  %vm682_vm14 = vweird.f32 %v1931_v1  ;;  %v686_v50 = vand.u32 2147483647, %v1931_v1 }
 0x11d   : > { %1455 = vpow2.f32 %v1290_v42  ;;  %v1026_v51 = vadd.f32 %v1448_v23, %v1025_v47  ;;  %v1034_v53 = vor.u32 1.1754944e-38, %v1033_v34  ;;  %v688_v54 = vand.u32 2147483648, %v1931_v1 }
 0x11e   : > { %1457 = vpow2.f32 %v1267_v43  ;;  %v680_v55 = vmul.f32 %v1450_v39, %v679_v32  ;;  %vm683_vm0 = vweird.f32 %v1450_v39  ;;  %v457_v46 = vadd.f32 %v1479_v10, %v456_v49 }
 0x11f   : > { %1459 = vpow2.f32 %v1275_v29  ;;  %v1030_v56 = vsel %vm1029_vm15, %v1448_v23, %v1026_v51  ;;  %vm1032_vm1 = vcmp.eq.f32.partialorder %v1031_v26, 8.507059e+37  ;;  %vm684_vm2 = vmor %vm682_vm14, %vm683_vm0  ;;  %v689_v59 = vor.u32 1.1754944e-38, %v688_v54 }
 0x120   : > { %1461 = vpow2.f32 %v1283_v48  ;;  %v1035_v41 = vsel %vm1032_vm1, %v1034_v53, %v1030_v56  ;;  %v681_v60 = vadd.f32 %v1450_v39, %v680_v55  ;;  %vm687_vm3 = vcmp.eq.f32.partialorder %v686_v50, 8.507059e+37 }
 0x121   : > { %v1452_v57 = vpop.eup %1451  ;;  %1096 = vst [vmem:[%s1622_s14 + $0xe8] sm:$0xff] %v1035_v41  ;;  %v1291_v2 = vmul.f32 -1.442695, %v457_v46 }
 0x122   : > { %v1454_v62 = vpop.eup %1453  ;;  %v1979_v63 = vadd.f32 1.0, %v1452_v57  ;;  %v685_v0 = vsel %vm684_vm2, %v1450_v39, %v681_v60 }
 0x123   : > { %v1456_v58 = vpop.eup %1455  ;;  %v1981_v52 = vadd.f32 1.0, %v1454_v62  ;;  %v690_v6 = vsel %vm687_vm3, %v689_v59, %v685_v0 }
 0x124   : > { %v1458_v5 = vpop.eup %1457  ;;  %1463 = vrcp.f32 %v1979_v63  ;;  %1073 = vst [vmem:[%s1622_s14 + $0x30] sm:$0xff] %v690_v6  ;;  %v1986_v1 = vadd.f32 1.0, %v1456_v58  ;;  %v806_v9 = vand.u32 2147483647, %v1979_v63  ;;  %v808_v11 = vand.u32 2147483648, %v1979_v63 }
 0x125   : > { %v1460_v4 = vpop.eup %1459  ;;  %1465 = vrcp.f32 %v1981_v52  ;;  %v1988_v3 = vadd.f32 1.0, %v1458_v5  ;;  %v926_v8 = vand.u32 2147483647, %v1981_v52  ;;  %v928_v12 = vand.u32 2147483648, %v1981_v52 }
 0x126   : > { %v1462_v61 = vpop.eup %1461  ;;  %v1991_v24 = vadd.f32 1.0, %v1460_v4  ;;  %1467 = vpow2.f32 %v1291_v2  ;;  %vm802_vm4 = vweird.f32 %v1979_v63  ;;  %vm922_vm5 = vweird.f32 %v1981_v52 }
 0x127   : > { %1469 = vrcp.f32 %v1986_v1  ;;  %v1998_v13 = vadd.f32 1.0, %v1462_v61  ;;  %vm2004_vm6 = vcmp.eq.f32.partialorder %v806_v9, 8.507059e+37  ;;  %v1046_v19 = vand.u32 2147483647, %v1986_v1 }
 0x128   : > { %1471 = vrcp.f32 %v1988_v3  ;;  %v1048_v10 = vand.u32 2147483648, %v1986_v1  ;;  %v809_v20 = vor.u32 1.1754944e-38, %v808_v11  ;;  %v701_v17 = vand.u32 2147483647, %v1988_v3 }
 0x129   : > { %1473 = vrcp.f32 %v1991_v24  ;;  %v703_v22 = vand.u32 2147483648, %v1988_v3  ;;  %vm2013_vm7 = vcmp.eq.f32.partialorder %v926_v8, 8.507059e+37  ;;  %v929_v27 = vor.u32 1.1754944e-38, %v928_v12 }
 0x12a   : > { %v1464_v14 = vpop.eup %1463  ;;  %1475 = vrcp.f32 %v1998_v13  ;;  %vm1042_vm9 = vweird.f32 %v1986_v1  ;;  %vm697_vm10 = vweird.f32 %v1988_v3  ;;  %vm2021_vm12 = vcmp.eq.f32.partialorder %v1046_v19, 8.507059e+37 }
 0x12b   : > { %v1466_v15 = vpop.eup %1465  ;;  %v798_v16 = vmul.f32 %v1464_v14, %v1979_v63  ;;  %vm803_vm8 = vweird.f32 %v1464_v14  ;;  %v1049_v36 = vor.u32 1.1754944e-38, %v1048_v10  ;;  %vm817_vm13 = vweird.f32 %v1991_v24 }
 0x12c   : > { %v918_v21 = vmul.f32 %v1466_v15, %v1981_v52  ;;  %v1468_v23 = vpop.eup %1467  ;;  %vm923_vm11 = vweird.f32 %v1466_v15  ;;  %vm2027_vm14 = vcmp.eq.f32.partialorder %v701_v17, 8.507059e+37  ;;  %v704_v30 = vor.u32 1.1754944e-38, %v703_v22  ;;  %vm804_vm15 = vmor %vm802_vm4, %vm803_vm8 }
 0x12d   : > { %v799_v25 = vsub.f32 1.0, %v798_v16  ;;  %v1470_v28 = vpop.eup %1469  ;;  %v821_v42 = vand.u32 2147483647, %v1991_v24  ;;  %v823_v47 = vand.u32 2147483648, %v1991_v24  ;;  %v586_v49 = vadd.f32 1.0, %v1468_v23  ;;  %vm924_vm1 = vmor %vm922_vm5, %vm923_vm11 }
 0x12e   : > { %v919_v18 = vsub.f32 1.0, %v918_v21  ;;  %v1472_v31 = vpop.eup %1471  ;;  %v1038_v34 = vmul.f32 %v1470_v28, %v1986_v1  ;;  %vm1043_vm0 = vweird.f32 %v1470_v28  ;;  %v941_v63 = vand.u32 2147483647, %v1998_v13 }
 0x12f   : > { %v800_v33 = vmul.f32 %v1464_v14, %v799_v25  ;;  %v1474_v37 = vpop.eup %1473  ;;  %v693_v39 = vmul.f32 %v1472_v31, %v1988_v3  ;;  %vm698_vm2 = vweird.f32 %v1472_v31  ;;  %vm1044_vm4 = vmor %vm1042_vm9, %vm1043_vm0  ;;  %1477 = vrcp.f32 %v586_v49 }
 0x130   : > { %v920_v38 = vmul.f32 %v1466_v15, %v919_v18  ;;  %v1039_v44 = vsub.f32 1.0, %v1038_v34  ;;  %v813_v45 = vmul.f32 %v1474_v37, %v1991_v24  ;;  %v1476_v32 = vpop.eup %1475  ;;  %vm818_vm3 = vweird.f32 %v1474_v37  ;;  %vm699_vm5 = vmor %vm697_vm10, %vm698_vm2 }
 0x131   : > { %v801_v43 = vadd.f32 %v1464_v14, %v800_v33  ;;  %v694_v48 = vsub.f32 1.0, %v693_v39  ;;  %v933_v56 = vmul.f32 %v1476_v32, %v1998_v13  ;;  %v824_v52 = vor.u32 1.1754944e-38, %v823_v47 }
 0x132   : > { %v921_v29 = vadd.f32 %v1466_v15, %v920_v38  ;;  %v1040_v51 = vmul.f32 %v1470_v28, %v1039_v44  ;;  %v814_v53 = vsub.f32 1.0, %v813_v45  ;;  %v943_v2 = vand.u32 2147483648, %v1998_v13 }
 0x133   : > { %v805_v50 = vsel %vm804_vm15, %v1464_v14, %v801_v43  ;;  %v695_v46 = vmul.f32 %v1472_v31, %v694_v48  ;;  %v934_v59 = vsub.f32 1.0, %v933_v56  ;;  %vm822_vm8 = vcmp.eq.f32.partialorder %v821_v42, 8.507059e+37 }
 0x134   : > { %v810_v54 = vsel %vm2004_vm6, %v809_v20, %v805_v50  ;;  %v925_v55 = vsel %vm924_vm1, %v1466_v15, %v921_v29  ;;  %v1041_v41 = vadd.f32 %v1470_v28, %v1040_v51  ;;  %v815_v60 = vmul.f32 %v1474_v37, %v814_v53  ;;  %vm819_vm6 = vmor %vm817_vm13, %vm818_vm3 }
 0x135   : > { %1081 = vst [vmem:[%s1622_s14 + $0x70] sm:$0xff] %v810_v54  ;;  %v930_v57 = vsel %vm2013_vm7, %v929_v27, %v925_v55  ;;  %v696_v62 = vadd.f32 %v1472_v31, %v695_v46  ;;  %v935_v4 = vmul.f32 %v1476_v32, %v934_v59  ;;  %vm938_vm7 = vweird.f32 %v1476_v32  ;;  %v1478_v8 = vpop.eup %1477 }
 0x136   : > { %1089 = vst [vmem:[%s1622_s14 + $0xb0] sm:$0xff] %v930_v57  ;;  %v1045_v58 = vsel %vm1044_vm4, %v1470_v28, %v1041_v41  ;;  %v816_v0 = vadd.f32 %v1474_v37, %v815_v60  ;;  %vm937_vm9 = vweird.f32 %v1998_v13  ;;  %v944_v11 = vor.u32 1.1754944e-38, %v943_v2 }
 0x137   : > { %v1050_v5 = vsel %vm2021_vm12, %v1049_v36, %v1045_v58  ;;  %v700_v6 = vsel %vm699_vm5, %v1472_v31, %v696_v62  ;;  %v936_v9 = vadd.f32 %v1476_v32, %v935_v4  ;;  %vm939_vm10 = vmor %vm937_vm9, %vm938_vm7  ;;  %vm942_vm11 = vcmp.eq.f32.partialorder %v941_v63, 8.507059e+37 }
 0x138   : > { %1097 = vst [vmem:[%s1622_s14 + $0xf0] sm:$0xff] %v1050_v5  ;;  %v705_v61 = vsel %vm2027_vm14, %v704_v30, %v700_v6  ;;  %v820_v1 = vsel %vm819_vm6, %v1474_v37, %v816_v0  ;;  %v1053_v14 = vmul.f32 %v1478_v8, %v586_v49  ;;  %v1063_v16 = vand.u32 2147483648, %v586_v49 }
 0x139   : > { %1074 = vst [vmem:[%s1622_s14 + $0x38] sm:$0xff] %v705_v61  ;;  %v825_v3 = vsel %vm822_vm8, %v824_v52, %v820_v1  ;;  %v940_v24 = vsel %vm939_vm10, %v1476_v32, %v936_v9  ;;  %vm1058_vm12 = vweird.f32 %v1478_v8  ;;  %v1061_v19 = vand.u32 2147483647, %v586_v49 }
 0x13a   : > { %1082 = vst [vmem:[%s1622_s14 + $0x78] sm:$0xff] %v825_v3  ;;  %v945_v12 = vsel %vm942_vm11, %v944_v11, %v940_v24  ;;  %v1054_v15 = vsub.f32 1.0, %v1053_v14  ;;  %vm1057_vm13 = vweird.f32 %v586_v49  ;;  %v1064_v20 = vor.u32 1.1754944e-38, %v1063_v16 }
 0x13b   : > { %1090 = vst [vmem:[%s1622_s14 + $0xb8] sm:$0xff] %v945_v12  ;;  %vm1059_vm14 = vmor %vm1057_vm13, %vm1058_vm12  ;;  %vm1062_vm15 = vcmp.eq.f32.partialorder %v1061_v19, 8.507059e+37 }
 0x13c   : > { %v1055_v7 = vmul.f32 %v1478_v8, %v1054_v15 }
 0x13e   : > { %v1056_v10 = vadd.f32 %v1478_v8, %v1055_v7 }
 0x140   : > { %v1060_v13 = vsel %vm1059_vm14, %v1478_v8, %v1056_v10 }
 0x141   : > { %v1065_v21 = vsel %vm1062_vm15, %v1064_v20, %v1060_v13 }
 0x142   : > { %1098 = vst [vmem:[%s1622_s14 + $0xf8] sm:$0xff] %v1065_v21 }
 0x143 PF: > { %s13_s12 = sadd.s32 1, %s1486_s12  }
 0x144   : > { %p10_p4 = scmp.ge.s32.totalorder %s13_s12, 4  }
 0x146   :  { %12 = sbr.rel (!%p10_p4) target bundleno = 1 (0x1), region = 62 }

</bundles_post_ra>
